<compile_context>
chip_gen: v7x
topology: tpu7x:2x2x1
jax: 0.10.0
libtpu: 0.0.40
codegen_flags: <defaults>
</compile_context>

<pallas_src>
import functools

import jax
import jax.numpy as jnp
from jax import lax
from jax.experimental import pallas as pl
from jax.experimental.pallas import tpu as pltpu

C_PAD = 128          # lane-padded output-channel width for intermediate layers
C_REAL = 32          # real channel count of every intermediate layer
_BN_EPS = 1e-5


def _round_up(n, m):
    return ((n + m - 1) // m) * m


def _pick_tile(m, cap=512):
    """Largest multiple-of-8 divisor of m that is <= cap (m itself if small)."""
    if m <= cap:
        return m
    t = cap - (cap % 8)
    while t >= 8:
        if m % t == 0:
            return t
        t -= 8
    return m


def _vmem_limit_bytes():
    """Per-generation scoped-VMEM budget (~half of physical, capped)."""
    try:
        cap = int(pltpu.get_tpu_info().vmem_capacity_bytes)
        return max(16 * 1024 * 1024, min(cap // 2, 64 * 1024 * 1024))
    except Exception:
        return 32 * 1024 * 1024


_VMEM_LIMIT = _vmem_limit_bytes()


# ----------------------------------------------------------------------------
# Pallas kernels
# ----------------------------------------------------------------------------
def _conv_relu_stats_kernel(x_ref, w_ref, b_ref, o_ref, sum_ref, ssq_ref):
    """Fused conv-as-matmul + bias + ReLU (PyTorch order: Conv -> ReLU -> BN).
    Streams pre-BN activation tiles (tiled out_spec) and accumulates per-column
    BN statistics (sum / sum-of-squares, f32) into tiny resident outputs.
    Note: stats are f32 and post-ReLU magnitudes are O(1), so the single-pass
    E[x^2]-E[x]^2 variance is numerically benign at these scales."""
    i = pl.program_id(0)

    @pl.when(i == 0)
    def _init():
        sum_ref[...] = jnp.zeros_like(sum_ref)
        ssq_ref[...] = jnp.zeros_like(ssq_ref)

    y = jnp.dot(x_ref[...], w_ref[...], preferred_element_type=jnp.float32)
    y = jnp.maximum(y + b_ref[...], 0.0)
    sum_ref[...] += jnp.sum(y, axis=0, keepdims=True)
    ssq_ref[...] += jnp.sum(y * y, axis=0, keepdims=True)
    o_ref[...] = y.astype(o_ref.dtype)


def _bn_affine_kernel(final_act, x_ref, scale_ref, shift_ref, o_ref):
    """Per-channel BN affine (+ optional Tanh -> clamp[0,1] -> 5-bit quantize).
    Epilogue math stays f32 (no bf16 VPU/EUP on v5e)."""
    y = x_ref[...].astype(jnp.float32) * scale_ref[...] + shift_ref[...]
    if final_act == "tanh_quant":
        # Matches the PyTorch reference exactly: tanh, clamp(0, 1),
        # round(z * 31) / 31 (negative tanh range collapses to 0).
        y = jnp.clip(jnp.tanh(y), 0.0, 1.0)
        y = jnp.round(y * 31.0) * (1.0 / 31.0)
    o_ref[...] = y.astype(o_ref.dtype)


def _conv_sigmoid_kernel(x_ref, w_ref, b_ref, o_ref):
    y = jnp.dot(x_ref[...], w_ref[...], preferred_element_type=jnp.float32)
    o_ref[...] = jax.nn.sigmoid(y + b_ref[...]).astype(o_ref.dtype)


# ----------------------------------------------------------------------------
# pallas_call wrappers
# ----------------------------------------------------------------------------
def conv_relu_stats(patches, w2d, b2d):
    """patches (M, K) bf16, w2d (K, C) bf16, b2d (1, C) f32 ->
       (pre-BN act (M, C) bf16, sum (1, C) f32, sum-sq (1, C) f32)."""
    M, K = patches.shape
    C = w2d.shape[1]
    tm = _pick_tile(M)
    return pl.pallas_call(
        _conv_relu_stats_kernel,
        out_shape=(jax.ShapeDtypeStruct((M, C), jnp.bfloat16),
                   jax.ShapeDtypeStruct((1, C), jnp.float32),
                   jax.ShapeDtypeStruct((1, C), jnp.float32)),
        grid=(M // tm,),
        in_specs=[
            pl.BlockSpec((tm, K), lambda i: (i, 0)),   # row-tiled, pipelined
            pl.BlockSpec((K, C), lambda i: (0, 0)),    # grid-invariant weight
            pl.BlockSpec((1, C), lambda i: (0, 0)),    # bias
        ],
        out_specs=(
            pl.BlockSpec((tm, C), lambda i: (i, 0)),   # streamed pre-BN tiles
            pl.BlockSpec((1, C), lambda i: (0, 0)),    # resident stats (sum)
            pl.BlockSpec((1, C), lambda i: (0, 0)),    # resident stats (ssq)
        ),
        compiler_params=pltpu.CompilerParams(
            dimension_semantics=("arbitrary",),        # stats reduce over tiles
            vmem_limit_bytes=_VMEM_LIMIT),
    )(patches, w2d, b2d)


def bn_affine(act, scale, shift, final_act="none"):
    """Elementwise per-channel affine [+tanh/quant]; tiled, megacore-parallel."""
    M, C = act.shape
    tm = _pick_tile(M)
    return pl.pallas_call(
        functools.partial(_bn_affine_kernel, final_act),
        out_shape=jax.ShapeDtypeStruct((M, C), jnp.bfloat16),
        grid=(M // tm,),
        in_specs=[
            pl.BlockSpec((tm, C), lambda i: (i, 0)),
            pl.BlockSpec((1, C), lambda i: (0, 0)),
            pl.BlockSpec((1, C), lambda i: (0, 0)),
        ],
        out_specs=pl.BlockSpec((tm, C), lambda i: (i, 0)),
        compiler_params=pltpu.CompilerParams(
            dimension_semantics=("parallel",),
            vmem_limit_bytes=_VMEM_LIMIT),
    )(act, scale, shift)


def conv_sigmoid(patches, w2d, b2d):
    M, K = patches.shape
    C = w2d.shape[1]
    tm = _pick_tile(M)
    return pl.pallas_call(
        _conv_sigmoid_kernel,
        out_shape=jax.ShapeDtypeStruct((M, C), jnp.float32),
        grid=(M // tm,),
        in_specs=[
            pl.BlockSpec((tm, K), lambda i: (i, 0)),
            pl.BlockSpec((K, C), lambda i: (0, 0)),
            pl.BlockSpec((1, C), lambda i: (0, 0)),
        ],
        out_specs=pl.BlockSpec((tm, C), lambda i: (i, 0)),
        compiler_params=pltpu.CompilerParams(
            dimension_semantics=("parallel",),
            vmem_limit_bytes=_VMEM_LIMIT),
    )(patches, w2d, b2d)


# ----------------------------------------------------------------------------
# Tiny XLA glue: im2col / pixel-shuffle layout + O(channels) BN scalar math
# ----------------------------------------------------------------------------
def _im2col(x, k, stride, pad):
    """x (N, H, W, Cin) -> patches (N*Ho*Wo, K8), K8 = k*k*Cin rounded to 8."""
    N, H, W, Cin = x.shape
    xp = jnp.pad(x, ((0, 0), (pad, pad), (pad, pad), (0, 0)))
    Hp, Wp = H + 2 * pad, W + 2 * pad
    Ho = (Hp - k) // stride + 1
    Wo = (Wp - k) // stride + 1
    cols = []
    for di in range(k):
        for dj in range(k):
            cols.append(xp[:, di:di + stride * (Ho - 1) + 1:stride,
                              dj:dj + stride * (Wo - 1) + 1:stride, :])
    p = jnp.stack(cols, axis=3).reshape(N * Ho * Wo, k * k * Cin)
    K8 = _round_up(k * k * Cin, 8)
    if K8 != k * k * Cin:
        p = jnp.pad(p, ((0, 0), (0, K8 - k * k * Cin)))
    return p, (N, Ho, Wo)


def _shuffle_patches(x):
    """Sub-pixel form of ConvT(k=3, s=2, p=1, op=1): 2x2 stride-1 windows of
    the high-padded input.  x (N, H, W, Cin) -> (N*H*W, 4*Cin)."""
    N, H, W, Cin = x.shape
    xp = jnp.pad(x, ((0, 0), (0, 1), (0, 1), (0, 0)))    # output_padding side
    cols = []
    for a in range(2):
        for b in range(2):
            cols.append(xp[:, a:a + H, b:b + W, :])
    p = jnp.stack(cols, axis=3).reshape(N * H * W, 4 * Cin)
    return p, (N, H, W)


def _unshuffle(y, n, h, w, cout):
    """(N*H*W, 4*cout) columns ordered (r, c, ch) -> (N, 2H, 2W, cout)."""
    y = y.reshape(n, h, w, 2, 2, cout)
    y = jnp.transpose(y, (0, 1, 3, 2, 4, 5))
    return y.reshape(n, 2 * h, 2 * w, cout)


def _bn_scale_shift(s, q, count, gamma, beta, groups=1):
    """Training-mode BatchNorm2d math (biased batch variance, like PyTorch's
    forward).  O(channels) work on (1, 128) vectors -> kept as XLA glue; the
    O(M*C) reduction and normalization run in the Pallas kernels.
    For the pixel-shuffle ConvT layout each channel occupies `groups` columns
    (one per 2x2 sub-position): reduce across groups, then tile back."""
    if groups > 1:
        cg = s.shape[1] // groups
        s = jnp.sum(s.reshape(groups, cg), axis=0, keepdims=True)
        q = jnp.sum(q.reshape(groups, cg), axis=0, keepdims=True)
        count = count * groups
    inv = 1.0 / float(count)
    mean = s * inv
    var = jnp.maximum(q * inv - mean * mean, 0.0)
    scale = gamma * lax.rsqrt(var + _BN_EPS)
    shift = beta - mean * scale
    if groups > 1:
        scale = jnp.tile(scale, (1, groups))
        shift = jnp.tile(shift, (1, groups))
    return scale, shift


# ----------------------------------------------------------------------------
# Layers
# ----------------------------------------------------------------------------
def conv_bn_layer(x, layer, k, stride, pad, final_act="none"):
    """Conv2d -> ReLU -> BatchNorm2d [-> Tanh -> clamp -> 5-bit quantize]."""
    w2d, b2d, gamma, beta = layer
    patches, (n, ho, wo) = _im2col(x, k, stride, pad)
    act, s, q = conv_relu_stats(patches, w2d, b2d)
    scale, shift = _bn_scale_shift(s, q, n * ho * wo, gamma, beta, groups=1)
    y = bn_affine(act, scale, shift, final_act)
    return y.reshape(n, ho, wo, -1)[..., :C_REAL]


def convT2x_bn_layer(x, layer):
    """ConvTranspose2d(k=3, s=2, p=1, op=1) -> ReLU -> BatchNorm2d in the
    sub-pixel (pixel-shuffle) formulation: one lane-dense (M, 128)x(128, 128)
    matmul per layer; the 2x spatial interleave is a cheap XLA reshape."""
    w2d, b2d, gamma, beta = layer
    patches, (n, h, w) = _shuffle_patches(x)
    act, s, q = conv_relu_stats(patches, w2d, b2d)
    scale, shift = _bn_scale_shift(s, q, n * h * w, gamma, beta, groups=4)
    y = bn_affine(act, scale, shift)
    return _unshuffle(y, n, h, w, C_REAL)


def convT_sigmoid_layer(x, layer):
    """ConvTranspose2d(32->1, k=3, s=1, p=1) -> Sigmoid.
    A stride-1 ConvT is an ordinary conv with flipped kernel & swapped chans
    (weights converted once at prep time).  Output padded to 8 lanes only."""
    w2d, b2d = layer
    patches, (n, ho, wo) = _im2col(x, 3, 1, 1)
    y = conv_sigmoid(patches, w2d, b2d)
    return y[:, :1].reshape(n, ho, wo, 1)


def autoencoder_forward(params, x_nchw):
    x = jnp.transpose(x_nchw, (0, 2, 3, 1)).astype(jnp.bfloat16)   # NHWC
    # Encoder: Conv+ReLU+BN ; Conv+ReLU+BN+Tanh -> clamp/quantize (5-bit)
    h = conv_bn_layer(x, params["e1"], k=3, stride=2, pad=1)
    z = conv_bn_layer(h, params["e2"], k=3, stride=2, pad=1,
                      final_act="tanh_quant")
    # Decoder: ConvT+ReLU+BN x2 ; ConvT+Sigmoid
    d = convT2x_bn_layer(z, params["d1"])
    d = convT2x_bn_layer(d, params["d2"])
    y = convT_sigmoid_layer(d, params["d3"])
    return jnp.transpose(y, (0, 3, 1, 2))                           # NCHW f32


# ----------------------------------------------------------------------------
# Parameter init (PyTorch layouts / fan-in) + one-time kernel-ready packing
# ----------------------------------------------------------------------------
def init_raw_params(key):
    """Deterministic random params in PyTorch layouts with PyTorch fan-in:
    Conv2d fan_in = Cin*k*k ; ConvTranspose2d fan_in = Cout*k*k.
    (BatchNorm running stats are not tracked: this reproduces train-mode
    forward behaviour, which uses batch statistics.)"""
    ks = jax.random.split(key, 10)

    def u(k, shape, fan_in):
        bound = 1.0 / float(fan_in) ** 0.5
        return jax.random.uniform(k, shape, jnp.float32, -bound, bound)

    return {
        # Conv2d weight layout (Cout, Cin, kh, kw)
        "e1": (u(ks[0], (32, 1, 3, 3), 1 * 9),  u(ks[1], (32,), 1 * 9)),
        "e2": (u(ks[2], (32, 32, 3, 3), 32 * 9), u(ks[3], (32,), 32 * 9)),
        # ConvTranspose2d weight layout (Cin, Cout, kh, kw)
        "d1": (u(ks[4], (32, 32, 3, 3), 32 * 9), u(ks[5], (32,), 32 * 9)),
        "d2": (u(ks[6], (32, 32, 3, 3), 32 * 9), u(ks[7], (32,), 32 * 9)),
        "d3": (u(ks[8], (32, 1, 3, 3), 1 * 9),  u(ks[9], (1,), 1 * 9)),
    }


def prepare_params(raw, mxu_dtype=jnp.bfloat16):
    """Pack weights into kernel-ready 2-D matrices (bf16 MXU operands);
    biases / BN params stay f32.  Only output channels are lane-padded."""

    def finish(w2d, bvec, cout_pad):
        k_, co = w2d.shape
        k8 = _round_up(k_, 8)
        w2d = jnp.pad(w2d, ((0, k8 - k_), (0, cout_pad - co)))
        b2d = jnp.pad(bvec.reshape(1, co), ((0, 0), (0, cout_pad - co)))
        return w2d.astype(mxu_dtype), b2d.astype(jnp.float32)

    def conv_w2d(w_oihw, bvec, cout_pad):
        co, ci, kh, kw = w_oihw.shape
        w = jnp.transpose(w_oihw, (2, 3, 1, 0)).reshape(kh * kw * ci, co)
        return finish(w, bvec, cout_pad)

    def convT_s1_w2d(w_iohw, bvec, cout_pad):
        # stride-1 ConvTranspose == conv with flipped kernel & swapped channels
        ci, co, kh, kw = w_iohw.shape
        w = jnp.transpose(w_iohw[:, :, ::-1, ::-1], (2, 3, 0, 1))
        return finish(w.reshape(kh * kw * ci, co), bvec, cout_pad)

    def convT_s2_pixelshuffle(w_iohw, bvec):
        # ConvT(k=3, s=2, p=1, op=1) as a 2x2/stride-1 conv emitting the 2x2
        # output sub-block of every input pixel.  Rows = (a, b, ci) window
        # offset, cols = (r, c, co) output parity & channel.  Tap map
        # (parity r, offset a) -> original kernel index ky:
        #   (0,0)->1, (1,0)->2, (1,1)->0, (0,1)->structural zero.
        ci, co, _, _ = w_iohw.shape
        tap = {(0, 0): 1, (1, 0): 2, (1, 1): 0}
        wb = jnp.zeros((2, 2, ci, 2, 2, co), jnp.float32)
        for r in range(2):
            for c in range(2):
                for a in range(2):
                    for b in range(2):
                        if (r, a) in tap and (c, b) in tap:
                            ky, kx = tap[(r, a)], tap[(c, b)]
                            wb = wb.at[a, b, :, r, c, :].set(w_iohw[:, :, ky, kx])
        w2d = wb.reshape(4 * ci, 4 * co).astype(mxu_dtype)
        b2d = jnp.tile(bvec.reshape(1, co), (1, 4)).astype(jnp.float32)
        return w2d, b2d

    def bn(c, pad_to=None):
        g = jnp.ones((1, c), jnp.float32)
        be = jnp.zeros((1, c), jnp.float32)
        if pad_to is not None and pad_to != c:
            g = jnp.pad(g, ((0, 0), (0, pad_to - c)))     # zero-pad -> padded
            be = jnp.pad(be, ((0, 0), (0, pad_to - c)))   # columns stay zero
        return g, be

    p = {}
    w, b = raw["e1"]; p["e1"] = conv_w2d(w, b, C_PAD) + bn(C_REAL, C_PAD)
    w, b = raw["e2"]; p["e2"] = conv_w2d(w, b, C_PAD) + bn(C_REAL, C_PAD)
    w, b = raw["d1"]; p["d1"] = convT_s2_pixelshuffle(w, b) + bn(C_REAL)
    w, b = raw["d2"]; p["d2"] = convT_s2_pixelshuffle(w, b) + bn(C_REAL)
    w, b = raw["d3"]; p["d3"] = convT_s1_w2d(w, b, 8)    # 1 real out channel
    return p


# ----------------------------------------------------------------------------
if __name__ == "__main__":
    key = jax.random.PRNGKey(0)
    k_param, k_x = jax.random.split(key)
    params = prepare_params(init_raw_params(k_param))
    x = jax.random.normal(k_x, (2, 1, 16, 16), dtype=jnp.float32)   # NCHW

    out = jax.jit(autoencoder_forward)(params, x)
    out = jax.block_until_ready(out)

    assert out.shape == (2, 1, 16, 16), out.shape
    assert out.dtype == jnp.float32, out.dtype
    assert bool(jnp.all(jnp.isfinite(out)))
    assert bool(jnp.all((out >= 0.0) & (out <= 1.0)))    # sigmoid range
    print("KERNEL_OK")
</pallas_src>

<mosaic_0001>
module attributes {stable_mosaic.version = 11 : i64} {
  func.func @_bn_affine_kernel(%arg0: i32, %arg1: memref<128x128xbf16, #tpu.memory_space<vmem>>, %arg2: memref<1x128xf32, #tpu.memory_space<vmem>>, %arg3: memref<1x128xf32, #tpu.memory_space<vmem>>, %arg4: memref<128x128xbf16, #tpu.memory_space<vmem>>) attributes {dimension_semantics = [#tpu.dimension_semantics<parallel>], iteration_bounds = array<i64: 1>, scalar_prefetch = 0 : i64, scratch_operands = 0 : i64, tpu.core_type = #tpu.core_type<tc>, window_params = [{transform_indices = @transform_0, window_bounds = array<i64: 128, 128>}, {pipeline_mode = #tpu.pipeline_mode<synchronous>, transform_indices = @transform_1, window_bounds = array<i64: 1, 128>}, {pipeline_mode = #tpu.pipeline_mode<synchronous>, transform_indices = @transform_2, window_bounds = array<i64: 1, 128>}, {transform_indices = @transform_3, window_bounds = array<i64: 128, 128>}]} {
    %c0 = arith.constant 0 : index
    %c0_0 = arith.constant 0 : index
    %0 = vector.load %arg1[%c0, %c0_0] : memref<128x128xbf16, #tpu.memory_space<vmem>>, vector<128x128xbf16>
    %1 = arith.extf %0 : vector<128x128xbf16> to vector<128x128xf32>
    %c0_1 = arith.constant 0 : index
    %c0_2 = arith.constant 0 : index
    %2 = vector.load %arg2[%c0_1, %c0_2] : memref<1x128xf32, #tpu.memory_space<vmem>>, vector<1x128xf32>
    %3 = vector.broadcast %2 : vector<1x128xf32> to vector<128x128xf32>
    %4 = arith.mulf %1, %3 : vector<128x128xf32>
    %c0_3 = arith.constant 0 : index
    %c0_4 = arith.constant 0 : index
    %5 = vector.load %arg3[%c0_3, %c0_4] : memref<1x128xf32, #tpu.memory_space<vmem>>, vector<1x128xf32>
    %6 = vector.broadcast %5 : vector<1x128xf32> to vector<128x128xf32>
    %7 = arith.addf %4, %6 : vector<128x128xf32>
    %8 = arith.truncf %7 : vector<128x128xf32> to vector<128x128xbf16>
    %c0_5 = arith.constant 0 : index
    %c0_6 = arith.constant 0 : index
    %9 = vector.load %arg4[%c0_5, %c0_6] : memref<128x128xbf16, #tpu.memory_space<vmem>>, vector<128x128xbf16>
    tpu.vector_store %arg4[%c0_5, %c0_6], %8 {strides = array<i32>} : memref<128x128xbf16, #tpu.memory_space<vmem>>, vector<128x128xbf16>,
    return
  }
  func.func @transform_0(%arg0: i32) -> (i32, i32) {
    %c0_i32 = arith.constant 0 : i32
    %c0_i32_0 = arith.constant 0 : i32
    return %arg0, %c0_i32 : i32, i32
  }
  func.func @transform_1(%arg0: i32) -> (i32, i32) {
    %c0_i32 = arith.constant 0 : i32
    %c0_i32_0 = arith.constant 0 : i32
    %c0_i32_1 = arith.constant 0 : i32
    return %c0_i32, %c0_i32_0 : i32, i32
  }
  func.func @transform_2(%arg0: i32) -> (i32, i32) {
    %c0_i32 = arith.constant 0 : i32
    %c0_i32_0 = arith.constant 0 : i32
    %c0_i32_1 = arith.constant 0 : i32
    return %c0_i32, %c0_i32_0 : i32, i32
  }
  func.func @transform_3(%arg0: i32) -> (i32, i32) {
    %c0_i32 = arith.constant 0 : i32
    %c0_i32_0 = arith.constant 0 : i32
    return %arg0, %c0_i32 : i32, i32
  }
}

module attributes {stable_mosaic.version = 11 : i64} {
  func.func @_conv_relu_stats_kernel(%arg0: i32, %arg1: memref<128x16xbf16, #tpu.memory_space<vmem>>, %arg2: memref<16x128xbf16, #tpu.memory_space<vmem>>, %arg3: memref<1x128xf32, #tpu.memory_space<vmem>>, %arg4: memref<128x128xbf16, #tpu.memory_space<vmem>>, %arg5: memref<1x128xf32, #tpu.memory_space<vmem>>, %arg6: memref<1x128xf32, #tpu.memory_space<vmem>>) attributes {dimension_semantics = [#tpu.dimension_semantics<arbitrary>], iteration_bounds = array<i64: 1>, scalar_prefetch = 0 : i64, scratch_operands = 0 : i64, tpu.core_type = #tpu.core_type<tc>, window_params = [{transform_indices = @transform_0, window_bounds = array<i64: 128, 16>}, {pipeline_mode = #tpu.pipeline_mode<synchronous>, transform_indices = @transform_1, window_bounds = array<i64: 16, 128>}, {pipeline_mode = #tpu.pipeline_mode<synchronous>, transform_indices = @transform_2, window_bounds = array<i64: 1, 128>}, {transform_indices = @transform_3, window_bounds = array<i64: 128, 128>}, {pipeline_mode = #tpu.pipeline_mode<synchronous>, transform_indices = @transform_4, window_bounds = array<i64: 1, 128>}, {pipeline_mode = #tpu.pipeline_mode<synchronous>, transform_indices = @transform_5, window_bounds = array<i64: 1, 128>}]} {
    %c0_i32 = arith.constant 0 : i32
    %0 = arith.cmpi eq, %arg0, %c0_i32 : i32
    %1 = arith.extui %0 : i1 to i32
    %c0_i32_0 = arith.constant 0 : i32
    %2 = arith.cmpi ne, %1, %c0_i32_0 : i32
    scf.if %2 {
      %cst_19 = arith.constant 0.000000e+00 : f32
      %24 = vector.broadcast %cst_19 : f32 to vector<1x128xf32>
      %c0_20 = arith.constant 0 : index
      %c0_21 = arith.constant 0 : index
      %25 = vector.load %arg5[%c0_20, %c0_21] : memref<1x128xf32, #tpu.memory_space<vmem>>, vector<1x128xf32>
      tpu.vector_store %arg5[%c0_20, %c0_21], %24 {strides = array<i32>} : memref<1x128xf32, #tpu.memory_space<vmem>>, vector<1x128xf32>,
      %cst_22 = arith.constant 0.000000e+00 : f32
      %26 = vector.broadcast %cst_22 : f32 to vector<1x128xf32>
      %c0_23 = arith.constant 0 : index
      %c0_24 = arith.constant 0 : index
      %27 = vector.load %arg6[%c0_23, %c0_24] : memref<1x128xf32, #tpu.memory_space<vmem>>, vector<1x128xf32>
      tpu.vector_store %arg6[%c0_23, %c0_24], %26 {strides = array<i32>} : memref<1x128xf32, #tpu.memory_space<vmem>>, vector<1x128xf32>,
    } else {
    }
    %c0 = arith.constant 0 : index
    %c0_1 = arith.constant 0 : index
    %3 = vector.load %arg1[%c0, %c0_1] : memref<128x16xbf16, #tpu.memory_space<vmem>>, vector<128x16xbf16>
    %c0_2 = arith.constant 0 : index
    %c0_3 = arith.constant 0 : index
    %4 = vector.load %arg2[%c0_2, %c0_3] : memref<16x128xbf16, #tpu.memory_space<vmem>>, vector<16x128xbf16>
    %cst = arith.constant dense<0.000000e+00> : vector<128x128xf32>
    %5 = tpu.matmul %3, %4, %cst {dimension_numbers = #tpu.dot_dimension_numbers<[1], [0], [0], [1], [0, 0, 1, 1], [], []>} : vector<128x16xbf16>, vector<16x128xbf16>, vector<128x128xf32> -> vector<128x128xf32>
    %c0_4 = arith.constant 0 : index
    %c0_5 = arith.constant 0 : index
    %6 = vector.load %arg3[%c0_4, %c0_5] : memref<1x128xf32, #tpu.memory_space<vmem>>, vector<1x128xf32>
    %7 = vector.broadcast %6 : vector<1x128xf32> to vector<128x128xf32>
    %8 = arith.addf %5, %7 : vector<128x128xf32>
    %cst_6 = arith.constant 0.000000e+00 : f32
    %9 = vector.broadcast %cst_6 : f32 to vector<128x128xf32>
    %10 = arith.maximumf %8, %9 : vector<128x128xf32>
    %c0_7 = arith.constant 0 : index
    %c0_8 = arith.constant 0 : index
    %11 = vector.load %arg5[%c0_7, %c0_8] : memref<1x128xf32, #tpu.memory_space<vmem>>, vector<1x128xf32>
    %cst_9 = arith.constant dense<0.000000e+00> : vector<128xf32>
    %12 = vector.multi_reduction <add>, %10, %cst_9 [0] : vector<128x128xf32> to vector<128xf32>
    %13 = vector.shape_cast %12 : vector<128xf32> to vector<1x128xf32>
    %14 = arith.addf %11, %13 : vector<1x128xf32>
    %c0_10 = arith.constant 0 : index
    %c0_11 = arith.constant 0 : index
    %15 = vector.load %arg5[%c0_10, %c0_11] : memref<1x128xf32, #tpu.memory_space<vmem>>, vector<1x128xf32>
    tpu.vector_store %arg5[%c0_10, %c0_11], %14 {strides = array<i32>} : memref<1x128xf32, #tpu.memory_space<vmem>>, vector<1x128xf32>,
    %c0_12 = arith.constant 0 : index
    %c0_13 = arith.constant 0 : index
    %16 = vector.load %arg6[%c0_12, %c0_13] : memref<1x128xf32, #tpu.memory_space<vmem>>, vector<1x128xf32>
    %17 = arith.mulf %10, %10 : vector<128x128xf32>
    %cst_14 = arith.constant dense<0.000000e+00> : vector<128xf32>
    %18 = vector.multi_reduction <add>, %17, %cst_14 [0] : vector<128x128xf32> to vector<128xf32>
    %19 = vector.shape_cast %18 : vector<128xf32> to vector<1x128xf32>
    %20 = arith.addf %16, %19 : vector<1x128xf32>
    %c0_15 = arith.constant 0 : index
    %c0_16 = arith.constant 0 : index
    %21 = vector.load %arg6[%c0_15, %c0_16] : memref<1x128xf32, #tpu.memory_space<vmem>>, vector<1x128xf32>
    tpu.vector_store %arg6[%c0_15, %c0_16], %20 {strides = array<i32>} : memref<1x128xf32, #tpu.memory_space<vmem>>, vector<1x128xf32>,
    %22 = arith.truncf %10 : vector<128x128xf32> to vector<128x128xbf16>
    %c0_17 = arith.constant 0 : index
    %c0_18 = arith.constant 0 : index
    %23 = vector.load %arg4[%c0_17, %c0_18] : memref<128x128xbf16, #tpu.memory_space<vmem>>, vector<128x128xbf16>
    tpu.vector_store %arg4[%c0_17, %c0_18], %22 {strides = array<i32>} : memref<128x128xbf16, #tpu.memory_space<vmem>>, vector<128x128xbf16>,
    return
  }
  func.func @transform_0(%arg0: i32) -> (i32, i32) {
    %c0_i32 = arith.constant 0 : i32
    %c0_i32_0 = arith.constant 0 : i32
    return %arg0, %c0_i32 : i32, i32
  }
  func.func @transform_1(%arg0: i32) -> (i32, i32) {
    %c0_i32 = arith.constant 0 : i32
    %c0_i32_0 = arith.constant 0 : i32
    %c0_i32_1 = arith.constant 0 : i32
    return %c0_i32, %c0_i32_0 : i32, i32
  }
  func.func @transform_2(%arg0: i32) -> (i32, i32) {
    %c0_i32 = arith.constant 0 : i32
    %c0_i32_0 = arith.constant 0 : i32
    %c0_i32_1 = arith.constant 0 : i32
    return %c0_i32, %c0_i32_0 : i32, i32
  }
  func.func @transform_3(%arg0: i32) -> (i32, i32) {
    %c0_i32 = arith.constant 0 : i32
    %c0_i32_0 = arith.constant 0 : i32
    return %arg0, %c0_i32 : i32, i32
  }
  func.func @transform_4(%arg0: i32) -> (i32, i32) {
    %c0_i32 = arith.constant 0 : i32
    %c0_i32_0 = arith.constant 0 : i32
    %c0_i32_1 = arith.constant 0 : i32
    return %c0_i32, %c0_i32_0 : i32, i32
  }
  func.func @transform_5(%arg0: i32) -> (i32, i32) {
    %c0_i32 = arith.constant 0 : i32
    %c0_i32_0 = arith.constant 0 : i32
    %c0_i32_1 = arith.constant 0 : i32
    return %c0_i32, %c0_i32_0 : i32, i32
  }
}

module attributes {stable_mosaic.version = 11 : i64} {
  func.func @_conv_relu_stats_kernel(%arg0: i32, %arg1: memref<32x288xbf16, #tpu.memory_space<vmem>>, %arg2: memref<288x128xbf16, #tpu.memory_space<vmem>>, %arg3: memref<1x128xf32, #tpu.memory_space<vmem>>, %arg4: memref<32x128xbf16, #tpu.memory_space<vmem>>, %arg5: memref<1x128xf32, #tpu.memory_space<vmem>>, %arg6: memref<1x128xf32, #tpu.memory_space<vmem>>) attributes {dimension_semantics = [#tpu.dimension_semantics<arbitrary>], iteration_bounds = array<i64: 1>, scalar_prefetch = 0 : i64, scratch_operands = 0 : i64, tpu.core_type = #tpu.core_type<tc>, window_params = [{transform_indices = @transform_0, window_bounds = array<i64: 32, 288>}, {pipeline_mode = #tpu.pipeline_mode<synchronous>, transform_indices = @transform_1, window_bounds = array<i64: 288, 128>}, {pipeline_mode = #tpu.pipeline_mode<synchronous>, transform_indices = @transform_2, window_bounds = array<i64: 1, 128>}, {transform_indices = @transform_3, window_bounds = array<i64: 32, 128>}, {pipeline_mode = #tpu.pipeline_mode<synchronous>, transform_indices = @transform_4, window_bounds = array<i64: 1, 128>}, {pipeline_mode = #tpu.pipeline_mode<synchronous>, transform_indices = @transform_5, window_bounds = array<i64: 1, 128>}]} {
    %c0_i32 = arith.constant 0 : i32
    %0 = arith.cmpi eq, %arg0, %c0_i32 : i32
    %1 = arith.extui %0 : i1 to i32
    %c0_i32_0 = arith.constant 0 : i32
    %2 = arith.cmpi ne, %1, %c0_i32_0 : i32
    scf.if %2 {
      %cst_19 = arith.constant 0.000000e+00 : f32
      %24 = vector.broadcast %cst_19 : f32 to vector<1x128xf32>
      %c0_20 = arith.constant 0 : index
      %c0_21 = arith.constant 0 : index
      %25 = vector.load %arg5[%c0_20, %c0_21] : memref<1x128xf32, #tpu.memory_space<vmem>>, vector<1x128xf32>
      tpu.vector_store %arg5[%c0_20, %c0_21], %24 {strides = array<i32>} : memref<1x128xf32, #tpu.memory_space<vmem>>, vector<1x128xf32>,
      %cst_22 = arith.constant 0.000000e+00 : f32
      %26 = vector.broadcast %cst_22 : f32 to vector<1x128xf32>
      %c0_23 = arith.constant 0 : index
      %c0_24 = arith.constant 0 : index
      %27 = vector.load %arg6[%c0_23, %c0_24] : memref<1x128xf32, #tpu.memory_space<vmem>>, vector<1x128xf32>
      tpu.vector_store %arg6[%c0_23, %c0_24], %26 {strides = array<i32>} : memref<1x128xf32, #tpu.memory_space<vmem>>, vector<1x128xf32>,
    } else {
    }
    %c0 = arith.constant 0 : index
    %c0_1 = arith.constant 0 : index
    %3 = vector.load %arg1[%c0, %c0_1] : memref<32x288xbf16, #tpu.memory_space<vmem>>, vector<32x288xbf16>
    %c0_2 = arith.constant 0 : index
    %c0_3 = arith.constant 0 : index
    %4 = vector.load %arg2[%c0_2, %c0_3] : memref<288x128xbf16, #tpu.memory_space<vmem>>, vector<288x128xbf16>
    %cst = arith.constant dense<0.000000e+00> : vector<32x128xf32>
    %5 = tpu.matmul %3, %4, %cst {dimension_numbers = #tpu.dot_dimension_numbers<[1], [0], [0], [1], [0, 0, 1, 1], [], []>} : vector<32x288xbf16>, vector<288x128xbf16>, vector<32x128xf32> -> vector<32x128xf32>
    %c0_4 = arith.constant 0 : index
    %c0_5 = arith.constant 0 : index
    %6 = vector.load %arg3[%c0_4, %c0_5] : memref<1x128xf32, #tpu.memory_space<vmem>>, vector<1x128xf32>
    %7 = vector.broadcast %6 : vector<1x128xf32> to vector<32x128xf32>
    %8 = arith.addf %5, %7 : vector<32x128xf32>
    %cst_6 = arith.constant 0.000000e+00 : f32
    %9 = vector.broadcast %cst_6 : f32 to vector<32x128xf32>
    %10 = arith.maximumf %8, %9 : vector<32x128xf32>
    %c0_7 = arith.constant 0 : index
    %c0_8 = arith.constant 0 : index
    %11 = vector.load %arg5[%c0_7, %c0_8] : memref<1x128xf32, #tpu.memory_space<vmem>>, vector<1x128xf32>
    %cst_9 = arith.constant dense<0.000000e+00> : vector<128xf32>
    %12 = vector.multi_reduction <add>, %10, %cst_9 [0] : vector<32x128xf32> to vector<128xf32>
    %13 = vector.shape_cast %12 : vector<128xf32> to vector<1x128xf32>
    %14 = arith.addf %11, %13 : vector<1x128xf32>
    %c0_10 = arith.constant 0 : index
    %c0_11 = arith.constant 0 : index
    %15 = vector.load %arg5[%c0_10, %c0_11] : memref<1x128xf32, #tpu.memory_space<vmem>>, vector<1x128xf32>
    tpu.vector_store %arg5[%c0_10, %c0_11], %14 {strides = array<i32>} : memref<1x128xf32, #tpu.memory_space<vmem>>, vector<1x128xf32>,
    %c0_12 = arith.constant 0 : index
    %c0_13 = arith.constant 0 : index
    %16 = vector.load %arg6[%c0_12, %c0_13] : memref<1x128xf32, #tpu.memory_space<vmem>>, vector<1x128xf32>
    %17 = arith.mulf %10, %10 : vector<32x128xf32>
    %cst_14 = arith.constant dense<0.000000e+00> : vector<128xf32>
    %18 = vector.multi_reduction <add>, %17, %cst_14 [0] : vector<32x128xf32> to vector<128xf32>
    %19 = vector.shape_cast %18 : vector<128xf32> to vector<1x128xf32>
    %20 = arith.addf %16, %19 : vector<1x128xf32>
    %c0_15 = arith.constant 0 : index
    %c0_16 = arith.constant 0 : index
    %21 = vector.load %arg6[%c0_15, %c0_16] : memref<1x128xf32, #tpu.memory_space<vmem>>, vector<1x128xf32>
    tpu.vector_store %arg6[%c0_15, %c0_16], %20 {strides = array<i32>} : memref<1x128xf32, #tpu.memory_space<vmem>>, vector<1x128xf32>,
    %22 = arith.truncf %10 : vector<32x128xf32> to vector<32x128xbf16>
    %c0_17 = arith.constant 0 : index
    %c0_18 = arith.constant 0 : index
    %23 = vector.load %arg4[%c0_17, %c0_18] : memref<32x128xbf16, #tpu.memory_space<vmem>>, vector<32x128xbf16>
    tpu.vector_store %arg4[%c0_17, %c0_18], %22 {strides = array<i32>} : memref<32x128xbf16, #tpu.memory_space<vmem>>, vector<32x128xbf16>,
    return
  }
  func.func @transform_0(%arg0: i32) -> (i32, i32) {
    %c0_i32 = arith.constant 0 : i32
    %c0_i32_0 = arith.constant 0 : i32
    return %arg0, %c0_i32 : i32, i32
  }
  func.func @transform_1(%arg0: i32) -> (i32, i32) {
    %c0_i32 = arith.constant 0 : i32
    %c0_i32_0 = arith.constant 0 : i32
    %c0_i32_1 = arith.constant 0 : i32
    return %c0_i32, %c0_i32_0 : i32, i32
  }
  func.func @transform_2(%arg0: i32) -> (i32, i32) {
    %c0_i32 = arith.constant 0 : i32
    %c0_i32_0 = arith.constant 0 : i32
    %c0_i32_1 = arith.constant 0 : i32
    return %c0_i32, %c0_i32_0 : i32, i32
  }
  func.func @transform_3(%arg0: i32) -> (i32, i32) {
    %c0_i32 = arith.constant 0 : i32
    %c0_i32_0 = arith.constant 0 : i32
    return %arg0, %c0_i32 : i32, i32
  }
  func.func @transform_4(%arg0: i32) -> (i32, i32) {
    %c0_i32 = arith.constant 0 : i32
    %c0_i32_0 = arith.constant 0 : i32
    %c0_i32_1 = arith.constant 0 : i32
    return %c0_i32, %c0_i32_0 : i32, i32
  }
  func.func @transform_5(%arg0: i32) -> (i32, i32) {
    %c0_i32 = arith.constant 0 : i32
    %c0_i32_0 = arith.constant 0 : i32
    %c0_i32_1 = arith.constant 0 : i32
    return %c0_i32, %c0_i32_0 : i32, i32
  }
}

module attributes {stable_mosaic.version = 11 : i64} {
  func.func @_bn_affine_kernel(%arg0: i32, %arg1: memref<32x128xbf16, #tpu.memory_space<vmem>>, %arg2: memref<1x128xf32, #tpu.memory_space<vmem>>, %arg3: memref<1x128xf32, #tpu.memory_space<vmem>>, %arg4: memref<32x128xbf16, #tpu.memory_space<vmem>>) attributes {dimension_semantics = [#tpu.dimension_semantics<parallel>], iteration_bounds = array<i64: 1>, scalar_prefetch = 0 : i64, scratch_operands = 0 : i64, tpu.core_type = #tpu.core_type<tc>, window_params = [{transform_indices = @transform_0, window_bounds = array<i64: 32, 128>}, {pipeline_mode = #tpu.pipeline_mode<synchronous>, transform_indices = @transform_1, window_bounds = array<i64: 1, 128>}, {pipeline_mode = #tpu.pipeline_mode<synchronous>, transform_indices = @transform_2, window_bounds = array<i64: 1, 128>}, {transform_indices = @transform_3, window_bounds = array<i64: 32, 128>}]} {
    %c0 = arith.constant 0 : index
    %c0_0 = arith.constant 0 : index
    %0 = vector.load %arg1[%c0, %c0_0] : memref<32x128xbf16, #tpu.memory_space<vmem>>, vector<32x128xbf16>
    %1 = arith.extf %0 : vector<32x128xbf16> to vector<32x128xf32>
    %c0_1 = arith.constant 0 : index
    %c0_2 = arith.constant 0 : index
    %2 = vector.load %arg2[%c0_1, %c0_2] : memref<1x128xf32, #tpu.memory_space<vmem>>, vector<1x128xf32>
    %3 = vector.broadcast %2 : vector<1x128xf32> to vector<32x128xf32>
    %4 = arith.mulf %1, %3 : vector<32x128xf32>
    %c0_3 = arith.constant 0 : index
    %c0_4 = arith.constant 0 : index
    %5 = vector.load %arg3[%c0_3, %c0_4] : memref<1x128xf32, #tpu.memory_space<vmem>>, vector<1x128xf32>
    %6 = vector.broadcast %5 : vector<1x128xf32> to vector<32x128xf32>
    %7 = arith.addf %4, %6 : vector<32x128xf32>
    %8 = math.tanh %7 : vector<32x128xf32>
    %cst = arith.constant 0.000000e+00 : f32
    %cst_5 = arith.constant 1.000000e+00 : f32
    %9 = vector.broadcast %cst : f32 to vector<32x128xf32>
    %10 = arith.maximumf %9, %8 : vector<32x128xf32>
    %11 = vector.broadcast %cst_5 : f32 to vector<32x128xf32>
    %12 = arith.minimumf %11, %10 : vector<32x128xf32>
    %cst_6 = arith.constant 3.100000e+01 : f32
    %13 = vector.broadcast %cst_6 : f32 to vector<32x128xf32>
    %14 = arith.mulf %12, %13 : vector<32x128xf32>
    %15 = math.roundeven %14 : vector<32x128xf32>
    %cst_7 = arith.constant 0.0322580636 : f32
    %16 = vector.broadcast %cst_7 : f32 to vector<32x128xf32>
    %17 = arith.mulf %15, %16 : vector<32x128xf32>
    %18 = arith.truncf %17 : vector<32x128xf32> to vector<32x128xbf16>
    %c0_8 = arith.constant 0 : index
    %c0_9 = arith.constant 0 : index
    %19 = vector.load %arg4[%c0_8, %c0_9] : memref<32x128xbf16, #tpu.memory_space<vmem>>, vector<32x128xbf16>
    tpu.vector_store %arg4[%c0_8, %c0_9], %18 {strides = array<i32>} : memref<32x128xbf16, #tpu.memory_space<vmem>>, vector<32x128xbf16>,
    return
  }
  func.func @transform_0(%arg0: i32) -> (i32, i32) {
    %c0_i32 = arith.constant 0 : i32
    %c0_i32_0 = arith.constant 0 : i32
    return %arg0, %c0_i32 : i32, i32
  }
  func.func @transform_1(%arg0: i32) -> (i32, i32) {
    %c0_i32 = arith.constant 0 : i32
    %c0_i32_0 = arith.constant 0 : i32
    %c0_i32_1 = arith.constant 0 : i32
    return %c0_i32, %c0_i32_0 : i32, i32
  }
  func.func @transform_2(%arg0: i32) -> (i32, i32) {
    %c0_i32 = arith.constant 0 : i32
    %c0_i32_0 = arith.constant 0 : i32
    %c0_i32_1 = arith.constant 0 : i32
    return %c0_i32, %c0_i32_0 : i32, i32
  }
  func.func @transform_3(%arg0: i32) -> (i32, i32) {
    %c0_i32 = arith.constant 0 : i32
    %c0_i32_0 = arith.constant 0 : i32
    return %arg0, %c0_i32 : i32, i32
  }
}

module attributes {stable_mosaic.version = 11 : i64} {
  func.func @_bn_affine_kernel(%arg0: i32, %arg1: memref<32x128xbf16, #tpu.memory_space<vmem>>, %arg2: memref<1x128xf32, #tpu.memory_space<vmem>>, %arg3: memref<1x128xf32, #tpu.memory_space<vmem>>, %arg4: memref<32x128xbf16, #tpu.memory_space<vmem>>) attributes {dimension_semantics = [#tpu.dimension_semantics<parallel>], iteration_bounds = array<i64: 1>, scalar_prefetch = 0 : i64, scratch_operands = 0 : i64, tpu.core_type = #tpu.core_type<tc>, window_params = [{transform_indices = @transform_0, window_bounds = array<i64: 32, 128>}, {pipeline_mode = #tpu.pipeline_mode<synchronous>, transform_indices = @transform_1, window_bounds = array<i64: 1, 128>}, {pipeline_mode = #tpu.pipeline_mode<synchronous>, transform_indices = @transform_2, window_bounds = array<i64: 1, 128>}, {transform_indices = @transform_3, window_bounds = array<i64: 32, 128>}]} {
    %c0 = arith.constant 0 : index
    %c0_0 = arith.constant 0 : index
    %0 = vector.load %arg1[%c0, %c0_0] : memref<32x128xbf16, #tpu.memory_space<vmem>>, vector<32x128xbf16>
    %1 = arith.extf %0 : vector<32x128xbf16> to vector<32x128xf32>
    %c0_1 = arith.constant 0 : index
    %c0_2 = arith.constant 0 : index
    %2 = vector.load %arg2[%c0_1, %c0_2] : memref<1x128xf32, #tpu.memory_space<vmem>>, vector<1x128xf32>
    %3 = vector.broadcast %2 : vector<1x128xf32> to vector<32x128xf32>
    %4 = arith.mulf %1, %3 : vector<32x128xf32>
    %c0_3 = arith.constant 0 : index
    %c0_4 = arith.constant 0 : index
    %5 = vector.load %arg3[%c0_3, %c0_4] : memref<1x128xf32, #tpu.memory_space<vmem>>, vector<1x128xf32>
    %6 = vector.broadcast %5 : vector<1x128xf32> to vector<32x128xf32>
    %7 = arith.addf %4, %6 : vector<32x128xf32>
    %8 = arith.truncf %7 : vector<32x128xf32> to vector<32x128xbf16>
    %c0_5 = arith.constant 0 : index
    %c0_6 = arith.constant 0 : index
    %9 = vector.load %arg4[%c0_5, %c0_6] : memref<32x128xbf16, #tpu.memory_space<vmem>>, vector<32x128xbf16>
    tpu.vector_store %arg4[%c0_5, %c0_6], %8 {strides = array<i32>} : memref<32x128xbf16, #tpu.memory_space<vmem>>, vector<32x128xbf16>,
    return
  }
  func.func @transform_0(%arg0: i32) -> (i32, i32) {
    %c0_i32 = arith.constant 0 : i32
    %c0_i32_0 = arith.constant 0 : i32
    return %arg0, %c0_i32 : i32, i32
  }
  func.func @transform_1(%arg0: i32) -> (i32, i32) {
    %c0_i32 = arith.constant 0 : i32
    %c0_i32_0 = arith.constant 0 : i32
    %c0_i32_1 = arith.constant 0 : i32
    return %c0_i32, %c0_i32_0 : i32, i32
  }
  func.func @transform_2(%arg0: i32) -> (i32, i32) {
    %c0_i32 = arith.constant 0 : i32
    %c0_i32_0 = arith.constant 0 : i32
    %c0_i32_1 = arith.constant 0 : i32
    return %c0_i32, %c0_i32_0 : i32, i32
  }
  func.func @transform_3(%arg0: i32) -> (i32, i32) {
    %c0_i32 = arith.constant 0 : i32
    %c0_i32_0 = arith.constant 0 : i32
    return %arg0, %c0_i32 : i32, i32
  }
}

module attributes {stable_mosaic.version = 11 : i64} {
  func.func @_conv_relu_stats_kernel(%arg0: i32, %arg1: memref<32x128xbf16, #tpu.memory_space<vmem>>, %arg2: memref<128x128xbf16, #tpu.memory_space<vmem>>, %arg3: memref<1x128xf32, #tpu.memory_space<vmem>>, %arg4: memref<32x128xbf16, #tpu.memory_space<vmem>>, %arg5: memref<1x128xf32, #tpu.memory_space<vmem>>, %arg6: memref<1x128xf32, #tpu.memory_space<vmem>>) attributes {dimension_semantics = [#tpu.dimension_semantics<arbitrary>], iteration_bounds = array<i64: 1>, scalar_prefetch = 0 : i64, scratch_operands = 0 : i64, tpu.core_type = #tpu.core_type<tc>, window_params = [{transform_indices = @transform_0, window_bounds = array<i64: 32, 128>}, {pipeline_mode = #tpu.pipeline_mode<synchronous>, transform_indices = @transform_1, window_bounds = array<i64: 128, 128>}, {pipeline_mode = #tpu.pipeline_mode<synchronous>, transform_indices = @transform_2, window_bounds = array<i64: 1, 128>}, {transform_indices = @transform_3, window_bounds = array<i64: 32, 128>}, {pipeline_mode = #tpu.pipeline_mode<synchronous>, transform_indices = @transform_4, window_bounds = array<i64: 1, 128>}, {pipeline_mode = #tpu.pipeline_mode<synchronous>, transform_indices = @transform_5, window_bounds = array<i64: 1, 128>}]} {
    %c0_i32 = arith.constant 0 : i32
    %0 = arith.cmpi eq, %arg0, %c0_i32 : i32
    %1 = arith.extui %0 : i1 to i32
    %c0_i32_0 = arith.constant 0 : i32
    %2 = arith.cmpi ne, %1, %c0_i32_0 : i32
    scf.if %2 {
      %cst_19 = arith.constant 0.000000e+00 : f32
      %24 = vector.broadcast %cst_19 : f32 to vector<1x128xf32>
      %c0_20 = arith.constant 0 : index
      %c0_21 = arith.constant 0 : index
      %25 = vector.load %arg5[%c0_20, %c0_21] : memref<1x128xf32, #tpu.memory_space<vmem>>, vector<1x128xf32>
      tpu.vector_store %arg5[%c0_20, %c0_21], %24 {strides = array<i32>} : memref<1x128xf32, #tpu.memory_space<vmem>>, vector<1x128xf32>,
      %cst_22 = arith.constant 0.000000e+00 : f32
      %26 = vector.broadcast %cst_22 : f32 to vector<1x128xf32>
      %c0_23 = arith.constant 0 : index
      %c0_24 = arith.constant 0 : index
      %27 = vector.load %arg6[%c0_23, %c0_24] : memref<1x128xf32, #tpu.memory_space<vmem>>, vector<1x128xf32>
      tpu.vector_store %arg6[%c0_23, %c0_24], %26 {strides = array<i32>} : memref<1x128xf32, #tpu.memory_space<vmem>>, vector<1x128xf32>,
    } else {
    }
    %c0 = arith.constant 0 : index
    %c0_1 = arith.constant 0 : index
    %3 = vector.load %arg1[%c0, %c0_1] : memref<32x128xbf16, #tpu.memory_space<vmem>>, vector<32x128xbf16>
    %c0_2 = arith.constant 0 : index
    %c0_3 = arith.constant 0 : index
    %4 = vector.load %arg2[%c0_2, %c0_3] : memref<128x128xbf16, #tpu.memory_space<vmem>>, vector<128x128xbf16>
    %cst = arith.constant dense<0.000000e+00> : vector<32x128xf32>
    %5 = tpu.matmul %3, %4, %cst {dimension_numbers = #tpu.dot_dimension_numbers<[1], [0], [0], [1], [0, 0, 1, 1], [], []>} : vector<32x128xbf16>, vector<128x128xbf16>, vector<32x128xf32> -> vector<32x128xf32>
    %c0_4 = arith.constant 0 : index
    %c0_5 = arith.constant 0 : index
    %6 = vector.load %arg3[%c0_4, %c0_5] : memref<1x128xf32, #tpu.memory_space<vmem>>, vector<1x128xf32>
    %7 = vector.broadcast %6 : vector<1x128xf32> to vector<32x128xf32>
    %8 = arith.addf %5, %7 : vector<32x128xf32>
    %cst_6 = arith.constant 0.000000e+00 : f32
    %9 = vector.broadcast %cst_6 : f32 to vector<32x128xf32>
    %10 = arith.maximumf %8, %9 : vector<32x128xf32>
    %c0_7 = arith.constant 0 : index
    %c0_8 = arith.constant 0 : index
    %11 = vector.load %arg5[%c0_7, %c0_8] : memref<1x128xf32, #tpu.memory_space<vmem>>, vector<1x128xf32>
    %cst_9 = arith.constant dense<0.000000e+00> : vector<128xf32>
    %12 = vector.multi_reduction <add>, %10, %cst_9 [0] : vector<32x128xf32> to vector<128xf32>
    %13 = vector.shape_cast %12 : vector<128xf32> to vector<1x128xf32>
    %14 = arith.addf %11, %13 : vector<1x128xf32>
    %c0_10 = arith.constant 0 : index
    %c0_11 = arith.constant 0 : index
    %15 = vector.load %arg5[%c0_10, %c0_11] : memref<1x128xf32, #tpu.memory_space<vmem>>, vector<1x128xf32>
    tpu.vector_store %arg5[%c0_10, %c0_11], %14 {strides = array<i32>} : memref<1x128xf32, #tpu.memory_space<vmem>>, vector<1x128xf32>,
    %c0_12 = arith.constant 0 : index
    %c0_13 = arith.constant 0 : index
    %16 = vector.load %arg6[%c0_12, %c0_13] : memref<1x128xf32, #tpu.memory_space<vmem>>, vector<1x128xf32>
    %17 = arith.mulf %10, %10 : vector<32x128xf32>
    %cst_14 = arith.constant dense<0.000000e+00> : vector<128xf32>
    %18 = vector.multi_reduction <add>, %17, %cst_14 [0] : vector<32x128xf32> to vector<128xf32>
    %19 = vector.shape_cast %18 : vector<128xf32> to vector<1x128xf32>
    %20 = arith.addf %16, %19 : vector<1x128xf32>
    %c0_15 = arith.constant 0 : index
    %c0_16 = arith.constant 0 : index
    %21 = vector.load %arg6[%c0_15, %c0_16] : memref<1x128xf32, #tpu.memory_space<vmem>>, vector<1x128xf32>
    tpu.vector_store %arg6[%c0_15, %c0_16], %20 {strides = array<i32>} : memref<1x128xf32, #tpu.memory_space<vmem>>, vector<1x128xf32>,
    %22 = arith.truncf %10 : vector<32x128xf32> to vector<32x128xbf16>
    %c0_17 = arith.constant 0 : index
    %c0_18 = arith.constant 0 : index
    %23 = vector.load %arg4[%c0_17, %c0_18] : memref<32x128xbf16, #tpu.memory_space<vmem>>, vector<32x128xbf16>
    tpu.vector_store %arg4[%c0_17, %c0_18], %22 {strides = array<i32>} : memref<32x128xbf16, #tpu.memory_space<vmem>>, vector<32x128xbf16>,
    return
  }
  func.func @transform_0(%arg0: i32) -> (i32, i32) {
    %c0_i32 = arith.constant 0 : i32
    %c0_i32_0 = arith.constant 0 : i32
    return %arg0, %c0_i32 : i32, i32
  }
  func.func @transform_1(%arg0: i32) -> (i32, i32) {
    %c0_i32 = arith.constant 0 : i32
    %c0_i32_0 = arith.constant 0 : i32
    %c0_i32_1 = arith.constant 0 : i32
    return %c0_i32, %c0_i32_0 : i32, i32
  }
  func.func @transform_2(%arg0: i32) -> (i32, i32) {
    %c0_i32 = arith.constant 0 : i32
    %c0_i32_0 = arith.constant 0 : i32
    %c0_i32_1 = arith.constant 0 : i32
    return %c0_i32, %c0_i32_0 : i32, i32
  }
  func.func @transform_3(%arg0: i32) -> (i32, i32) {
    %c0_i32 = arith.constant 0 : i32
    %c0_i32_0 = arith.constant 0 : i32
    return %arg0, %c0_i32 : i32, i32
  }
  func.func @transform_4(%arg0: i32) -> (i32, i32) {
    %c0_i32 = arith.constant 0 : i32
    %c0_i32_0 = arith.constant 0 : i32
    %c0_i32_1 = arith.constant 0 : i32
    return %c0_i32, %c0_i32_0 : i32, i32
  }
  func.func @transform_5(%arg0: i32) -> (i32, i32) {
    %c0_i32 = arith.constant 0 : i32
    %c0_i32_0 = arith.constant 0 : i32
    %c0_i32_1 = arith.constant 0 : i32
    return %c0_i32, %c0_i32_0 : i32, i32
  }
}

module attributes {stable_mosaic.version = 11 : i64} {
  func.func @_conv_relu_stats_kernel(%arg0: i32, %arg1: memref<128x128xbf16, #tpu.memory_space<vmem>>, %arg2: memref<128x128xbf16, #tpu.memory_space<vmem>>, %arg3: memref<1x128xf32, #tpu.memory_space<vmem>>, %arg4: memref<128x128xbf16, #tpu.memory_space<vmem>>, %arg5: memref<1x128xf32, #tpu.memory_space<vmem>>, %arg6: memref<1x128xf32, #tpu.memory_space<vmem>>) attributes {dimension_semantics = [#tpu.dimension_semantics<arbitrary>], iteration_bounds = array<i64: 1>, scalar_prefetch = 0 : i64, scratch_operands = 0 : i64, tpu.core_type = #tpu.core_type<tc>, window_params = [{transform_indices = @transform_0, window_bounds = array<i64: 128, 128>}, {pipeline_mode = #tpu.pipeline_mode<synchronous>, transform_indices = @transform_1, window_bounds = array<i64: 128, 128>}, {pipeline_mode = #tpu.pipeline_mode<synchronous>, transform_indices = @transform_2, window_bounds = array<i64: 1, 128>}, {transform_indices = @transform_3, window_bounds = array<i64: 128, 128>}, {pipeline_mode = #tpu.pipeline_mode<synchronous>, transform_indices = @transform_4, window_bounds = array<i64: 1, 128>}, {pipeline_mode = #tpu.pipeline_mode<synchronous>, transform_indices = @transform_5, window_bounds = array<i64: 1, 128>}]} {
    %c0_i32 = arith.constant 0 : i32
    %0 = arith.cmpi eq, %arg0, %c0_i32 : i32
    %1 = arith.extui %0 : i1 to i32
    %c0_i32_0 = arith.constant 0 : i32
    %2 = arith.cmpi ne, %1, %c0_i32_0 : i32
    scf.if %2 {
      %cst_19 = arith.constant 0.000000e+00 : f32
      %24 = vector.broadcast %cst_19 : f32 to vector<1x128xf32>
      %c0_20 = arith.constant 0 : index
      %c0_21 = arith.constant 0 : index
      %25 = vector.load %arg5[%c0_20, %c0_21] : memref<1x128xf32, #tpu.memory_space<vmem>>, vector<1x128xf32>
      tpu.vector_store %arg5[%c0_20, %c0_21], %24 {strides = array<i32>} : memref<1x128xf32, #tpu.memory_space<vmem>>, vector<1x128xf32>,
      %cst_22 = arith.constant 0.000000e+00 : f32
      %26 = vector.broadcast %cst_22 : f32 to vector<1x128xf32>
      %c0_23 = arith.constant 0 : index
      %c0_24 = arith.constant 0 : index
      %27 = vector.load %arg6[%c0_23, %c0_24] : memref<1x128xf32, #tpu.memory_space<vmem>>, vector<1x128xf32>
      tpu.vector_store %arg6[%c0_23, %c0_24], %26 {strides = array<i32>} : memref<1x128xf32, #tpu.memory_space<vmem>>, vector<1x128xf32>,
    } else {
    }
    %c0 = arith.constant 0 : index
    %c0_1 = arith.constant 0 : index
    %3 = vector.load %arg1[%c0, %c0_1] : memref<128x128xbf16, #tpu.memory_space<vmem>>, vector<128x128xbf16>
    %c0_2 = arith.constant 0 : index
    %c0_3 = arith.constant 0 : index
    %4 = vector.load %arg2[%c0_2, %c0_3] : memref<128x128xbf16, #tpu.memory_space<vmem>>, vector<128x128xbf16>
    %cst = arith.constant dense<0.000000e+00> : vector<128x128xf32>
    %5 = tpu.matmul %3, %4, %cst {dimension_numbers = #tpu.dot_dimension_numbers<[1], [0], [0], [1], [0, 0, 1, 1], [], []>} : vector<128x128xbf16>, vector<128x128xbf16>, vector<128x128xf32> -> vector<128x128xf32>
    %c0_4 = arith.constant 0 : index
    %c0_5 = arith.constant 0 : index
    %6 = vector.load %arg3[%c0_4, %c0_5] : memref<1x128xf32, #tpu.memory_space<vmem>>, vector<1x128xf32>
    %7 = vector.broadcast %6 : vector<1x128xf32> to vector<128x128xf32>
    %8 = arith.addf %5, %7 : vector<128x128xf32>
    %cst_6 = arith.constant 0.000000e+00 : f32
    %9 = vector.broadcast %cst_6 : f32 to vector<128x128xf32>
    %10 = arith.maximumf %8, %9 : vector<128x128xf32>
    %c0_7 = arith.constant 0 : index
    %c0_8 = arith.constant 0 : index
    %11 = vector.load %arg5[%c0_7, %c0_8] : memref<1x128xf32, #tpu.memory_space<vmem>>, vector<1x128xf32>
    %cst_9 = arith.constant dense<0.000000e+00> : vector<128xf32>
    %12 = vector.multi_reduction <add>, %10, %cst_9 [0] : vector<128x128xf32> to vector<128xf32>
    %13 = vector.shape_cast %12 : vector<128xf32> to vector<1x128xf32>
    %14 = arith.addf %11, %13 : vector<1x128xf32>
    %c0_10 = arith.constant 0 : index
    %c0_11 = arith.constant 0 : index
    %15 = vector.load %arg5[%c0_10, %c0_11] : memref<1x128xf32, #tpu.memory_space<vmem>>, vector<1x128xf32>
    tpu.vector_store %arg5[%c0_10, %c0_11], %14 {strides = array<i32>} : memref<1x128xf32, #tpu.memory_space<vmem>>, vector<1x128xf32>,
    %c0_12 = arith.constant 0 : index
    %c0_13 = arith.constant 0 : index
    %16 = vector.load %arg6[%c0_12, %c0_13] : memref<1x128xf32, #tpu.memory_space<vmem>>, vector<1x128xf32>
    %17 = arith.mulf %10, %10 : vector<128x128xf32>
    %cst_14 = arith.constant dense<0.000000e+00> : vector<128xf32>
    %18 = vector.multi_reduction <add>, %17, %cst_14 [0] : vector<128x128xf32> to vector<128xf32>
    %19 = vector.shape_cast %18 : vector<128xf32> to vector<1x128xf32>
    %20 = arith.addf %16, %19 : vector<1x128xf32>
    %c0_15 = arith.constant 0 : index
    %c0_16 = arith.constant 0 : index
    %21 = vector.load %arg6[%c0_15, %c0_16] : memref<1x128xf32, #tpu.memory_space<vmem>>, vector<1x128xf32>
    tpu.vector_store %arg6[%c0_15, %c0_16], %20 {strides = array<i32>} : memref<1x128xf32, #tpu.memory_space<vmem>>, vector<1x128xf32>,
    %22 = arith.truncf %10 : vector<128x128xf32> to vector<128x128xbf16>
    %c0_17 = arith.constant 0 : index
    %c0_18 = arith.constant 0 : index
    %23 = vector.load %arg4[%c0_17, %c0_18] : memref<128x128xbf16, #tpu.memory_space<vmem>>, vector<128x128xbf16>
    tpu.vector_store %arg4[%c0_17, %c0_18], %22 {strides = array<i32>} : memref<128x128xbf16, #tpu.memory_space<vmem>>, vector<128x128xbf16>,
    return
  }
  func.func @transform_0(%arg0: i32) -> (i32, i32) {
    %c0_i32 = arith.constant 0 : i32
    %c0_i32_0 = arith.constant 0 : i32
    return %arg0, %c0_i32 : i32, i32
  }
  func.func @transform_1(%arg0: i32) -> (i32, i32) {
    %c0_i32 = arith.constant 0 : i32
    %c0_i32_0 = arith.constant 0 : i32
    %c0_i32_1 = arith.constant 0 : i32
    return %c0_i32, %c0_i32_0 : i32, i32
  }
  func.func @transform_2(%arg0: i32) -> (i32, i32) {
    %c0_i32 = arith.constant 0 : i32
    %c0_i32_0 = arith.constant 0 : i32
    %c0_i32_1 = arith.constant 0 : i32
    return %c0_i32, %c0_i32_0 : i32, i32
  }
  func.func @transform_3(%arg0: i32) -> (i32, i32) {
    %c0_i32 = arith.constant 0 : i32
    %c0_i32_0 = arith.constant 0 : i32
    return %arg0, %c0_i32 : i32, i32
  }
  func.func @transform_4(%arg0: i32) -> (i32, i32) {
    %c0_i32 = arith.constant 0 : i32
    %c0_i32_0 = arith.constant 0 : i32
    %c0_i32_1 = arith.constant 0 : i32
    return %c0_i32, %c0_i32_0 : i32, i32
  }
  func.func @transform_5(%arg0: i32) -> (i32, i32) {
    %c0_i32 = arith.constant 0 : i32
    %c0_i32_0 = arith.constant 0 : i32
    %c0_i32_1 = arith.constant 0 : i32
    return %c0_i32, %c0_i32_0 : i32, i32
  }
}

module attributes {stable_mosaic.version = 11 : i64} {
  func.func @_conv_sigmoid_kernel(%arg0: i32, %arg1: memref<512x288xbf16, #tpu.memory_space<vmem>>, %arg2: memref<288x8xbf16, #tpu.memory_space<vmem>>, %arg3: memref<1x8xf32, #tpu.memory_space<vmem>>, %arg4: memref<512x8xf32, #tpu.memory_space<vmem>>) attributes {dimension_semantics = [#tpu.dimension_semantics<parallel>], iteration_bounds = array<i64: 1>, scalar_prefetch = 0 : i64, scratch_operands = 0 : i64, tpu.core_type = #tpu.core_type<tc>, window_params = [{transform_indices = @transform_0, window_bounds = array<i64: 512, 288>}, {pipeline_mode = #tpu.pipeline_mode<synchronous>, transform_indices = @transform_1, window_bounds = array<i64: 288, 8>}, {pipeline_mode = #tpu.pipeline_mode<synchronous>, transform_indices = @transform_2, window_bounds = array<i64: 1, 8>}, {transform_indices = @transform_3, window_bounds = array<i64: 512, 8>}]} {
    %c0 = arith.constant 0 : index
    %c0_0 = arith.constant 0 : index
    %0 = vector.load %arg1[%c0, %c0_0] : memref<512x288xbf16, #tpu.memory_space<vmem>>, vector<512x288xbf16>
    %c0_1 = arith.constant 0 : index
    %c0_2 = arith.constant 0 : index
    %1 = vector.load %arg2[%c0_1, %c0_2] : memref<288x8xbf16, #tpu.memory_space<vmem>>, vector<288x8xbf16>
    %cst = arith.constant dense<0.000000e+00> : vector<512x8xf32>
    %2 = tpu.matmul %0, %1, %cst {dimension_numbers = #tpu.dot_dimension_numbers<[1], [0], [0], [1], [0, 0, 1, 1], [], []>} : vector<512x288xbf16>, vector<288x8xbf16>, vector<512x8xf32> -> vector<512x8xf32>
    %c0_3 = arith.constant 0 : index
    %c0_4 = arith.constant 0 : index
    %3 = vector.load %arg3[%c0_3, %c0_4] : memref<1x8xf32, #tpu.memory_space<vmem>>, vector<1x8xf32>
    %4 = vector.broadcast %3 : vector<1x8xf32> to vector<512x8xf32>
    %5 = arith.addf %2, %4 : vector<512x8xf32>
    %6 = arith.negf %5 : vector<512x8xf32>
    %7 = math.exp %6 : vector<512x8xf32>
    %cst_5 = arith.constant 1.000000e+00 : f32
    %8 = vector.broadcast %cst_5 : f32 to vector<512x8xf32>
    %9 = arith.addf %8, %7 : vector<512x8xf32>
    %10 = arith.divf %8, %9 : vector<512x8xf32>
    %c0_6 = arith.constant 0 : index
    %c0_7 = arith.constant 0 : index
    %11 = vector.load %arg4[%c0_6, %c0_7] : memref<512x8xf32, #tpu.memory_space<vmem>>, vector<512x8xf32>
    tpu.vector_store %arg4[%c0_6, %c0_7], %10 {strides = array<i32>} : memref<512x8xf32, #tpu.memory_space<vmem>>, vector<512x8xf32>,
    return
  }
  func.func @transform_0(%arg0: i32) -> (i32, i32) {
    %c0_i32 = arith.constant 0 : i32
    %c0_i32_0 = arith.constant 0 : i32
    return %arg0, %c0_i32 : i32, i32
  }
  func.func @transform_1(%arg0: i32) -> (i32, i32) {
    %c0_i32 = arith.constant 0 : i32
    %c0_i32_0 = arith.constant 0 : i32
    %c0_i32_1 = arith.constant 0 : i32
    return %c0_i32, %c0_i32_0 : i32, i32
  }
  func.func @transform_2(%arg0: i32) -> (i32, i32) {
    %c0_i32 = arith.constant 0 : i32
    %c0_i32_0 = arith.constant 0 : i32
    %c0_i32_1 = arith.constant 0 : i32
    return %c0_i32, %c0_i32_0 : i32, i32
  }
  func.func @transform_3(%arg0: i32) -> (i32, i32) {
    %c0_i32 = arith.constant 0 : i32
    %c0_i32_0 = arith.constant 0 : i32
    return %arg0, %c0_i32 : i32, i32
  }
}

</mosaic_0001>

<bundles_post_ra>
// kernel: autoencoder_forward.10
= control target key start
LH: loop header
LB: loop body
LE: loop exit
PB: predicated region body
PF: predicated region fallthrough
CT: control target
= control target key end

     0   :  { %s370_s0 = inlined_call_operand.vmem [shape: bf16[128,128], index: 0, kind: input, shape index: {}]   ;;  %s371_s1 = inlined_call_operand.vmem [shape: f32[1,128], index: 1, kind: input, shape index: {}]   ;;  %s372_s2 = inlined_call_operand.vmem [shape: f32[1,128], index: 2, kind: input, shape index: {}]   ;;  %s373_s3 = inlined_call_operand.vmem [shape: bf16[128,128], index: 3, kind: output, shape index: {}]  }
   0x1   :  { %v211_v0 = vld [vmem:[%s370_s0] sm:$0xff]   ;;  %v282_v4 = vld [vmem:[%s370_s0 + $0x8] sm:$0xff]   ;;  %v283_v5 = vld [vmem:[%s370_s0 + $0x10] sm:$0xff]  }
   0x2   :  { %v176_v1 = vld [vmem:[%s371_s1] ss:$0 sm:$0xff]  ;;  %v212_v2 = vunpack.c.l.bf16 %v211_v0  ;;  %v213_v3 = vunpack.c.h.bf16 %v211_v0  ;;  %v284_v6 = vld [vmem:[%s370_s0 + $0x18] sm:$0xff]   ;;  %v216_v8 = vunpack.c.l.bf16 %v282_v4  ;;  %v217_v9 = vunpack.c.h.bf16 %v282_v4  ;;  %v286_v25 = vld [vmem:[%s370_s0 + $0x28] sm:$0xff]  }
   0x3   :  { %v177_v7 = vld [vmem:[%s372_s2] ss:$0 sm:$0xff]  ;;  %v220_v10 = vunpack.c.l.bf16 %v283_v5  ;;  %v221_v11 = vunpack.c.h.bf16 %v283_v5  ;;  %v224_v14 = vunpack.c.l.bf16 %v284_v6  ;;  %v225_v15 = vunpack.c.h.bf16 %v284_v6  ;;  %v287_v30 = vld [vmem:[%s370_s0 + $0x30] sm:$0xff]   ;;  %v288_v35 = vld [vmem:[%s370_s0 + $0x38] sm:$0xff]  }
   0x4   :  { %v53_v12 = vmul.f32 %v212_v2, %v176_v1  ;;  %v54_v13 = vmul.f32 %v213_v3, %v176_v1  ;;  %v55_v16 = vmul.f32 %v216_v8, %v176_v1  ;;  %v56_v17 = vmul.f32 %v217_v9, %v176_v1  ;;  %v285_v20 = vld [vmem:[%s370_s0 + $0x20] sm:$0xff]  }
   0x5   :  { %v57_v18 = vmul.f32 %v220_v10, %v176_v1  ;;  %v58_v19 = vmul.f32 %v221_v11, %v176_v1  ;;  %v59_v23 = vmul.f32 %v224_v14, %v176_v1  ;;  %v60_v24 = vmul.f32 %v225_v15, %v176_v1 }
   0x6   :  { %v76_v21 = vadd.f32 %v177_v7, %v53_v12  ;;  %v77_v22 = vadd.f32 %v177_v7, %v54_v13  ;;  %v78_v26 = vadd.f32 %v177_v7, %v55_v16  ;;  %v79_v27 = vadd.f32 %v177_v7, %v56_v17 }
   0x7   :  { %v80_v28 = vadd.f32 %v177_v7, %v57_v18  ;;  %v81_v29 = vadd.f32 %v177_v7, %v58_v19  ;;  %v82_v32 = vadd.f32 %v177_v7, %v59_v23  ;;  %v83_v33 = vadd.f32 %v177_v7, %v60_v24 }
   0x8   :  { %v245_v31 = vpack.c.bf16 %v77_v22, %v76_v21  ;;  %v228_v34 = vunpack.c.l.bf16 %v285_v20  ;;  %v250_v36 = vpack.c.bf16 %v79_v27, %v78_v26  ;;  %v229_v38 = vunpack.c.h.bf16 %v285_v20 }
   0x9   :  { %v255_v37 = vpack.c.bf16 %v81_v29, %v80_v28  ;;  %v232_v39 = vunpack.c.l.bf16 %v286_v25  ;;  %v260_v40 = vpack.c.bf16 %v83_v33, %v82_v32  ;;  %v233_v42 = vunpack.c.h.bf16 %v286_v25 }
   0xa   :  { %246 = vst [vmem:[%s373_s3] sm:$0xff] %v245_v31   ;;  %v61_v41 = vmul.f32 %v228_v34, %v176_v1  ;;  %v236_v43 = vunpack.c.l.bf16 %v287_v30  ;;  %289 = vst [vmem:[%s373_s3 + $0x8] sm:$0xff] %v250_v36   ;;  %v62_v44 = vmul.f32 %v229_v38, %v176_v1  ;;  %v237_v46 = vunpack.c.h.bf16 %v287_v30 }
   0xb   :  { %290 = vst [vmem:[%s373_s3 + $0x10] sm:$0xff] %v255_v37   ;;  %v63_v45 = vmul.f32 %v232_v39, %v176_v1  ;;  %v240_v47 = vunpack.c.l.bf16 %v288_v35  ;;  %291 = vst [vmem:[%s373_s3 + $0x18] sm:$0xff] %v260_v40   ;;  %v64_v49 = vmul.f32 %v233_v42, %v176_v1  ;;  %v241_v51 = vunpack.c.h.bf16 %v288_v35 }
   0xc   :  { %v84_v48 = vadd.f32 %v177_v7, %v61_v41  ;;  %v65_v50 = vmul.f32 %v236_v43, %v176_v1  ;;  %v85_v52 = vadd.f32 %v177_v7, %v62_v44  ;;  %v66_v54 = vmul.f32 %v237_v46, %v176_v1 }
   0xd   :  { %v86_v53 = vadd.f32 %v177_v7, %v63_v45  ;;  %v67_v55 = vmul.f32 %v240_v47, %v176_v1  ;;  %v87_v56 = vadd.f32 %v177_v7, %v64_v49  ;;  %v68_v58 = vmul.f32 %v241_v51, %v176_v1 }
   0xe   :  { %v88_v57 = vadd.f32 %v177_v7, %v65_v50  ;;  %v265_v59 = vpack.c.bf16 %v85_v52, %v84_v48  ;;  %v89_v60 = vadd.f32 %v177_v7, %v66_v54 }
   0xf   :  { %v90_v61 = vadd.f32 %v177_v7, %v67_v55  ;;  %v270_v62 = vpack.c.bf16 %v87_v56, %v86_v53  ;;  %v91_v63 = vadd.f32 %v177_v7, %v68_v58 }
  0x10   :  { %292 = vst [vmem:[%s373_s3 + $0x20] sm:$0xff] %v265_v59   ;;  %v275_v0 = vpack.c.bf16 %v89_v60, %v88_v57 }
  0x11   :  { %293 = vst [vmem:[%s373_s3 + $0x28] sm:$0xff] %v270_v62   ;;  %v280_v2 = vpack.c.bf16 %v91_v63, %v90_v61 }
  0x12   :  { %294 = vst [vmem:[%s373_s3 + $0x30] sm:$0xff] %v275_v0  }
  0x13   :  { %295 = vst [vmem:[%s373_s3 + $0x38] sm:$0xff] %v280_v2  }

// kernel: autoencoder_forward.9
= control target key start
LH: loop header
LB: loop body
LE: loop exit
PB: predicated region body
PF: predicated region fallthrough
CT: control target
= control target key end

     0   :  { %11 = vsyncpa [#allocation3], 0  ;;  %s768_s0 = inlined_call_operand.vmem [shape: bf16[128,16], index: 0, kind: input, shape index: {}]   ;;  %s769_s1 = inlined_call_operand.hbm [shape: bf16[16,128], index: 1, kind: input, shape index: {}]   ;;  %s770_s2 = inlined_call_operand.hbm [shape: f32[1,128], index: 2, kind: input, shape index: {}]   ;;  %s771_s3 = inlined_call_operand.vmem [shape: bf16[128,128], index: 3, kind: output, shape index: {0}]   ;;  %s772_s4 = inlined_call_operand.vmem [shape: f32[1,128], index: 4, kind: output, shape index: {1}]   ;;  %s773_s5 = inlined_call_operand.vmem [shape: f32[1,128], index: 5, kind: output, shape index: {2}]  }
   0x1   :  { %12 = vsyncpa [#allocation5], 0  ;;  %s605_s18 = smov [#allocation2]   ;;  %s557_s22 = scalar_lea.hbm %s769_s1, 128 }
   0x2   :  { %s20_s19 = sshll.u32 %s605_s18, 4  ;;  %p558_p0 = scmp.ne.s32.totalorder %s769_s1, %s557_s22  ;;  %s21_s19 = int_to_ptr.vmem [resolvable:$true] %s20_s19 }
   0x3   :  { %p561_p1 = scmp.lt.u32.totalorder %s557_s22, %s769_s1 }
   0x5   :  { %p563_p2 = pnand %p561_p1, %p558_p0 }
   0x7   :  { %566 = shalt.err (!%p563_p2)
}
   0x8   :  { %s567_s27 = scalar_lea.vmem %s21_s19, 128  ;;  %p572_p4 = scmp.lt.s32.totalorder %s21_s19, %s21_s19 }
   0x9   :  { %p568_p3 = scmp.ne.s32.totalorder %s21_s19, %s567_s27  ;;  %p573_p5 = scmp.lt.s32.totalorder %s567_s27, %s567_s27 }
   0xb   :  { %p574_p6 = por %p573_p5, %p572_p4 }
   0xd   :  { %p575_p7 = pnand %p574_p6, %p568_p3 }
   0xf   :  { %578 = shalt.err (!%p575_p7)
}
  0x10   :  { %s606_s28 = smov 64   ;;  %s607_s29 = smov 4  }
  0x11   :  { %26 = dma.hbm_to_vmem [thread:$0]  %s769_s1, 128, %s21_s19, [#allocation3], %s606_s28, %s606_s28, %s607_s29  }
  0x12   :  { %s608_s7 = smov [#allocation4]   ;;  %s579_s11 = scalar_lea.hbm %s770_s2, 16 }
  0x13   :  { %s33_s8 = sshll.u32 %s608_s7, 4  ;;  %p580_p8 = scmp.ne.s32.totalorder %s770_s2, %s579_s11  ;;  %s34_s8 = int_to_ptr.vmem [resolvable:$true] %s33_s8 }
  0x14   :  { %p583_p9 = scmp.lt.u32.totalorder %s579_s11, %s770_s2 }
  0x16   :  { %p585_p10 = pnand %p583_p9, %p580_p8 }
  0x18   :  { %588 = shalt.err (!%p585_p10)
}
  0x19   :  { %s589_s16 = scalar_lea.vmem %s34_s8, 16  ;;  %s593_s1 = scalar_lea.vmem %s34_s8, 32 }
  0x1a   :  { %p590_p11 = scmp.ne.s32.totalorder %s34_s8, %s589_s16  ;;  %p594_p12 = scmp.lt.s32.totalorder %s34_s8, %s34_s8 }
  0x1b   :  { %p595_p13 = scmp.lt.s32.totalorder %s593_s1, %s589_s16 }
  0x1d   :  { %p596_p0 = por %p595_p13, %p594_p12 }
  0x1f   :  { %p597_p1 = pnand %p596_p0, %p590_p11 }
  0x21   :  { %600 = shalt.err (!%p597_p1)
}
  0x22   :  { %36 = dma.hbm_to_vmem [thread:$0]  %s770_s2, 16, %s34_s8, [#allocation5]  }
  0x23   :  { %601 = dma.done.wait [#allocation3], 128  }
  0x24   :  { %602 = vsyncadd [#allocation3], 4294967168 }
  0x25   :  { %603 = dma.done.wait [#allocation5], 16  }
  0x26   :  { %604 = vsyncadd [#allocation5], 4294967280  ;;  %v548_v0 = vld [vmem:[#allocation2] sm:$0xff]   ;;  %vm121_vm0 = vcmask 130048   ;;  %v550_v2 = vld [vmem:[%s768_s0 + $0x8] sm:$0xff]   ;;  %v609_v9 = vmov 0.0  }
  0x27   :  { %v549_v1 = vld [vmem:[%s768_s0] sm:$0xff]   ;;  %523 = vmatprep.subr.bf16.mxu0 %v548_v0  ;;  %541 = vmatprep.subr.bf16.mxu1 %v548_v0  ;;  %v551_v3 = vld [vmem:[%s768_s0 + $0x10] sm:$0xff]   ;;  %v554_v5 = vld [vmem:[%s768_s0 + $0x28] sm:$0xff]   ;;  %48 = vst [vmem:[%s772_s4] sm:$0x1] %v609_v9 }
  0x28   :  { %524 = vmatpush3.bf16.msra.mxu0 %v548_v0  ;;  %525 = vmatprep.mubr.msk.bf16.mxu0 %vm121_vm0, %v549_v1  ;;  %v553_v4 = vld [vmem:[%s768_s0 + $0x20] sm:$0xff]   ;;  %v555_v6 = vld [vmem:[%s768_s0 + $0x30] sm:$0xff]   ;;  %v552_v7 = vld [vmem:[%s768_s0 + $0x18] sm:$0xff]   ;;  %49 = vst [vmem:[%s773_s5] sm:$0x1] %v609_v9 }
  0x29   :  { %542 = vmatpush3.bf16.msra.mxu1 %v548_v0  ;;  %533 = vmatprep.mubr.msk.bf16.mxu1 %vm121_vm0, %v553_v4  ;;  %v556_v8 = vld [vmem:[%s768_s0 + $0x38] sm:$0xff]   ;;  %v702_v10 = vld [vmem:[#allocation4] ss:$0 sm:$0xff] }
  0x2b   :  { %526 = vmatmul.mubr.msk.bf16.vlgmr.msra.gmra.mrb[0].mxu0 %vm121_vm0, %v550_v2 }
  0x2c   :  { %529 = vmatprep.mubr.msk.bf16.mxu0 %vm121_vm0, %v551_v3  ;;  %534 = vmatmul.mubr.msk.bf16.vlgmr.msra.gmra.mrb[0].mxu1 %vm121_vm0, %v554_v5 }
  0x2d   :  { %537 = vmatprep.mubr.msk.bf16.mxu1 %vm121_vm0, %v555_v6 }
  0x33   :  { %530 = vmatmul.mubr.msk.bf16.gmra.mrb[4].mxu0 %vm121_vm0, %v552_v7 }
  0x34   :  { %538 = vmatmul.mubr.msk.bf16.gmra.mrb[4].mxu1 %vm121_vm0, %v556_v8 }
  0xfe   :  { %v527_v11 = vpop.f32.mrb[0].mxu0 }
  0xff   :  { %v189_v12 = vadd.f32 %v527_v11, %v702_v10  ;;  %v180_v13 = vpop.f32.mrb[1].mxu0  ;;  %v535_v16 = vpop.f32.mrb[0].mxu1 }
 0x100   :  { %v181_v14 = vadd.f32 %v702_v10, %v180_v13  ;;  %v528_v15 = vpop.f32.mrb[2].mxu0  ;;  %v221_v19 = vadd.f32 %v535_v16, %v702_v10  ;;  %v212_v20 = vpop.f32.mrb[1].mxu1 }
 0x101   :  { %v192_v17 = vadd.f32 %v528_v15, %v702_v10  ;;  %v183_v18 = vpop.f32.mrb[3].mxu0  ;;  %v213_v23 = vadd.f32 %v702_v10, %v212_v20  ;;  %v536_v24 = vpop.f32.mrb[2].mxu1  ;;  %v245_v25 = vmax.f32 %v189_v12, 0.0 }
 0x102   :  { %v243_v21 = vmax.f32 %v181_v14, 0.0  ;;  %v184_v22 = vadd.f32 %v702_v10, %v183_v18  ;;  %v710_v27 = vmax.f32 %v221_v19, 0.0  ;;  %v224_v28 = vadd.f32 %v536_v24, %v702_v10  ;;  %v215_v29 = vpop.f32.mrb[3].mxu1 }
 0x103   :  { %v246_v26 = vmax.f32 %v192_v17, 0.0  ;;  %v216_v31 = vadd.f32 %v702_v10, %v215_v29  ;;  %v251_v33 = vmax.f32 %v213_v23, 0.0  ;;  %v286_v44 = vmul.f32 %v245_v25, %v245_v25 }
 0x104   :  { %v244_v30 = vmax.f32 %v184_v22, 0.0  ;;  %v714_v34 = vmax.f32 %v224_v28, 0.0  ;;  %v284_v35 = vmul.f32 %v243_v21, %v243_v21 }
 0x105   :  { %v475_v32 = vpack.c.bf16 %v246_v26, %v245_v25  ;;  %v252_v43 = vmax.f32 %v216_v31, 0.0  ;;  %v287_v50 = vmul.f32 %v246_v26, %v246_v26  ;;  %v292_v23 = vmul.f32 %v251_v33, %v251_v33 }
 0x106   :  { %v260_v36 = vadd.f32 %v244_v30, %v243_v21  ;;  %v285_v37 = vmul.f32 %v244_v30, %v244_v30  ;;  %v470_v38 = vpack.c.bf16 %v244_v30, %v243_v21  ;;  %v531_v39 = vpop.f32.mrb[4].mxu0  ;;  %v495_v42 = vpack.c.bf16 %v714_v34, %v710_v27 }
 0x107   :  { %507 = vst [vmem:[%s771_s3 + $0x8] sm:$0xff] %v475_v32   ;;  %v205_v40 = vadd.f32 %v531_v39, %v702_v10  ;;  %v196_v41 = vpop.f32.mrb[5].mxu0  ;;  %v539_v49 = vpop.f32.mrb[4].mxu1  ;;  %v490_v53 = vpack.c.bf16 %v252_v43, %v251_v33  ;;  %v293_v30 = vmul.f32 %v252_v43, %v252_v43  ;;  %v294_v31 = vmul.f32 %v710_v27, %v710_v27 }
 0x108   :  { %v261_v45 = vadd.f32 %v260_v36, %v245_v25  ;;  %v300_v46 = vadd.f32 %v285_v37, %v284_v35  ;;  %471 = vst [vmem:[%s771_s3] sm:$0xff] %v470_v38   ;;  %v197_v47 = vadd.f32 %v702_v10, %v196_v41  ;;  %v532_v48 = vpop.f32.mrb[6].mxu0  ;;  %511 = vst [vmem:[%s771_s3 + $0x28] sm:$0xff] %v495_v42   ;;  %v228_v54 = vpop.f32.mrb[5].mxu1 }
 0x109   :  { %v208_v51 = vadd.f32 %v532_v48, %v702_v10  ;;  %v199_v52 = vpop.f32.mrb[7].mxu0  ;;  %v540_v59 = vpop.f32.mrb[6].mxu1  ;;  %v249_v60 = vmax.f32 %v205_v40, 0.0  ;;  %510 = vst [vmem:[%s771_s3 + $0x20] sm:$0xff] %v490_v53   ;;  %v237_v62 = vadd.f32 %v539_v49, %v702_v10  ;;  %v229_v63 = vadd.f32 %v702_v10, %v228_v54 }
 0x10a   :  { %v301_v55 = vadd.f32 %v300_v46, %v286_v44  ;;  %v247_v56 = vmax.f32 %v197_v47, 0.0  ;;  %v262_v57 = vadd.f32 %v261_v45, %v246_v26  ;;  %v200_v58 = vadd.f32 %v702_v10, %v199_v52  ;;  %v231_v0 = vpop.f32.mrb[7].mxu1 }
 0x10b   :  { %v250_v61 = vmax.f32 %v208_v51, 0.0  ;;  %v257_v11 = vmax.f32 %v237_v62, 0.0  ;;  %v255_v12 = vmax.f32 %v229_v63, 0.0  ;;  %v240_v13 = vadd.f32 %v540_v59, %v702_v10 }
 0x10c   :  { %v263_v1 = vadd.f32 %v262_v57, %v247_v56  ;;  %v288_v2 = vmul.f32 %v247_v56, %v247_v56  ;;  %v302_v3 = vadd.f32 %v301_v55, %v287_v50  ;;  %v248_v4 = vmax.f32 %v200_v58, 0.0  ;;  %v259_v58 = vld [vmem:[%s772_s4] sm:$0x1] }
 0x10d   :  { %v485_v5 = vpack.c.bf16 %v250_v61, %v249_v60  ;;  %v232_v14 = vadd.f32 %v702_v10, %v231_v0  ;;  %v290_v15 = vmul.f32 %v249_v60, %v249_v60  ;;  %v258_v18 = vmax.f32 %v240_v13, 0.0 }
 0x10e   :  { %v303_v6 = vadd.f32 %v302_v3, %v288_v2  ;;  %v264_v7 = vadd.f32 %v263_v1, %v248_v4  ;;  %v289_v8 = vmul.f32 %v248_v4, %v248_v4  ;;  %v480_v9 = vpack.c.bf16 %v248_v4, %v247_v56 }
 0x10f   :  { %509 = vst [vmem:[%s771_s3 + $0x18] sm:$0xff] %v485_v5   ;;  %v256_v19 = vmax.f32 %v232_v14, 0.0  ;;  %v291_v20 = vmul.f32 %v250_v61, %v250_v61  ;;  %v505_v24 = vpack.c.bf16 %v258_v18, %v257_v11  ;;  %v296_v38 = vmul.f32 %v255_v12, %v255_v12 }
 0x110   :  { %v265_v16 = vadd.f32 %v264_v7, %v249_v60  ;;  %v304_v17 = vadd.f32 %v303_v6, %v289_v8  ;;  %508 = vst [vmem:[%s771_s3 + $0x10] sm:$0xff] %v480_v9   ;;  %v298_v45 = vmul.f32 %v257_v11, %v257_v11  ;;  %v299_v47 = vmul.f32 %v258_v18, %v258_v18 }
 0x111   :  { %v500_v25 = vpack.c.bf16 %v256_v19, %v255_v12  ;;  %513 = vst [vmem:[%s771_s3 + $0x38] sm:$0xff] %v505_v24   ;;  %v297_v44 = vmul.f32 %v256_v19, %v256_v19 }
 0x112   :  { %v305_v21 = vadd.f32 %v304_v17, %v290_v15  ;;  %v266_v22 = vadd.f32 %v265_v16, %v250_v61  ;;  %v283_v61 = vld [vmem:[%s773_s5] sm:$0x1] }
 0x113   :  { %512 = vst [vmem:[%s771_s3 + $0x30] sm:$0xff] %v500_v25  }
 0x114   :  { %v267_v26 = vadd.f32 %v266_v22, %v251_v33  ;;  %v306_v28 = vadd.f32 %v305_v21, %v291_v20  ;;  %v295_v33 = vmul.f32 %v714_v34, %v714_v34 }
 0x116   :  { %v307_v10 = vadd.f32 %v306_v28, %v292_v23  ;;  %v268_v29 = vadd.f32 %v267_v26, %v252_v43 }
 0x118   :  { %v269_v32 = vadd.f32 %v268_v29, %v710_v27  ;;  %v308_v35 = vadd.f32 %v307_v10, %v293_v30 }
 0x11a   :  { %v309_v36 = vadd.f32 %v308_v35, %v294_v31  ;;  %v270_v37 = vadd.f32 %v269_v32, %v714_v34 }
 0x11c   :  { %v271_v39 = vadd.f32 %v270_v37, %v255_v12  ;;  %v310_v40 = vadd.f32 %v309_v36, %v295_v33 }
 0x11e   :  { %v311_v41 = vadd.f32 %v310_v40, %v296_v38  ;;  %v272_v42 = vadd.f32 %v271_v39, %v256_v19 }
 0x120   :  { %v273_v43 = vadd.f32 %v272_v42, %v257_v11  ;;  %v312_v46 = vadd.f32 %v311_v41, %v297_v44 }
 0x122   :  { %v274_v48 = vadd.f32 %v273_v43, %v258_v18  ;;  %v313_v49 = vadd.f32 %v312_v46, %v298_v45 }
 0x124   :  { %v275_v27 = vrot.slane %v274_v48, 4  ;;  %v314_v50 = vadd.f32 %v313_v49, %v299_v47 }
 0x126   :  { %v276_v51 = vadd.f32 %v275_v27, %v274_v48  ;;  %v315_v52 = vrot.slane %v314_v50, 4 }
 0x128   :  { %v277_v53 = vrot.slane %v276_v51, 2  ;;  %v316_v54 = vadd.f32 %v315_v52, %v314_v50 }
 0x12a   :  { %v278_v55 = vadd.f32 %v277_v53, %v276_v51  ;;  %v317_v34 = vrot.slane %v316_v54, 2 }
 0x12c   :  { %v279_v56 = vrot.slane %v278_v55, 1  ;;  %v318_v57 = vadd.f32 %v317_v34, %v316_v54 }
 0x12e   :  { %v280_v59 = vadd.f32 %v279_v56, %v278_v55  ;;  %v319_v60 = vrot.slane %v318_v57, 1 }
 0x130   :  { %v281_v62 = vadd.f32 %v280_v59, %v259_v58  ;;  %v320_v63 = vadd.f32 %v319_v60, %v318_v57 }
 0x132   :  { %282 = vst [vmem:[%s772_s4] sm:$0x1] %v281_v62  ;;  %v321_v0 = vadd.f32 %v320_v63, %v283_v61 }
 0x134   :  { %322 = vst [vmem:[%s773_s5] sm:$0x1] %v321_v0 }
 0x135   :  { %415 = vsyncpa [#allocation3], 1 }
 0x136   :  { %416 = vsyncpa [#allocation5], 1 }

// kernel: autoencoder_forward.12
= control target key start
LH: loop header
LB: loop body
LE: loop exit
PB: predicated region body
PF: predicated region fallthrough
CT: control target
= control target key end

     0   :  { %s172_s0 = inlined_call_operand.vmem [shape: bf16[32,128], index: 0, kind: input, shape index: {}]   ;;  %s173_s1 = inlined_call_operand.vmem [shape: f32[1,128], index: 1, kind: input, shape index: {}]   ;;  %s174_s2 = inlined_call_operand.vmem [shape: f32[1,128], index: 2, kind: input, shape index: {}]   ;;  %s175_s3 = inlined_call_operand.vmem [shape: bf16[32,128], index: 3, kind: output, shape index: {}]  }
   0x1   :  { %v103_v0 = vld [vmem:[%s172_s0] sm:$0xff]   ;;  %v120_v4 = vld [vmem:[%s172_s0 + $0x8] sm:$0xff]  }
   0x2   :  { %v92_v1 = vld [vmem:[%s173_s1] ss:$0 sm:$0xff]  ;;  %v104_v2 = vunpack.c.l.bf16 %v103_v0  ;;  %v105_v3 = vunpack.c.h.bf16 %v103_v0  ;;  %v108_v6 = vunpack.c.l.bf16 %v120_v4  ;;  %v109_v7 = vunpack.c.h.bf16 %v120_v4 }
   0x3   :  { %v93_v5 = vld [vmem:[%s174_s2] ss:$0 sm:$0xff] }
   0x4   :  { %v29_v8 = vmul.f32 %v104_v2, %v92_v1  ;;  %v30_v9 = vmul.f32 %v105_v3, %v92_v1  ;;  %v31_v10 = vmul.f32 %v108_v6, %v92_v1  ;;  %v32_v11 = vmul.f32 %v109_v7, %v92_v1 }
   0x6   :  { %v40_v12 = vadd.f32 %v93_v5, %v29_v8  ;;  %v41_v13 = vadd.f32 %v93_v5, %v30_v9  ;;  %v42_v14 = vadd.f32 %v93_v5, %v31_v10  ;;  %v43_v15 = vadd.f32 %v93_v5, %v32_v11 }
   0x8   :  { %126 = vtanh.f32 %v40_v12 }
   0x9   :  { %128 = vtanh.f32 %v41_v13 }
   0xa   :  { %130 = vtanh.f32 %v42_v14 }
   0xb   :  { %132 = vtanh.f32 %v43_v15 }
  0x12   :  { %v127_v16 = vpop.eup %126 }
  0x13   :  { %v129_v17 = vpop.eup %128  ;;  %v48_v18 = vmax.f32 %v127_v16, 0.0 }
  0x14   :  { %v131_v19 = vpop.eup %130  ;;  %v49_v20 = vmax.f32 %v129_v17, 0.0 }
  0x15   :  { %v133_v21 = vpop.eup %132  ;;  %v52_v22 = vmin.f32 %v48_v18, 1.0  ;;  %v50_v23 = vmax.f32 %v131_v19, 0.0 }
  0x16   :  { %v53_v24 = vmin.f32 %v49_v20, 1.0  ;;  %v51_v25 = vmax.f32 %v133_v21, 0.0 }
  0x17   :  { %v56_v26 = vmul.f32 31.0, %v52_v22  ;;  %v54_v27 = vmin.f32 %v50_v23, 1.0 }
  0x18   :  { %v57_v28 = vmul.f32 31.0, %v53_v24  ;;  %v55_v29 = vmin.f32 %v51_v25, 1.0 }
  0x19   :  { %v122_v30 = vround.rtne.f32 %v56_v26  ;;  %v58_v31 = vmul.f32 31.0, %v54_v27 }
  0x1a   :  { %v123_v32 = vround.rtne.f32 %v57_v28  ;;  %v59_v33 = vmul.f32 31.0, %v55_v29 }
  0x1b   :  { %v64_v34 = vmul.f32 0.032258064, %v122_v30  ;;  %v124_v35 = vround.rtne.f32 %v58_v31 }
  0x1c   :  { %v65_v36 = vmul.f32 0.032258064, %v123_v32  ;;  %v125_v37 = vround.rtne.f32 %v59_v33 }
  0x1d   :  { %v66_v38 = vmul.f32 0.032258064, %v124_v35 }
  0x1e   :  { %v113_v39 = vpack.c.bf16 %v65_v36, %v64_v34  ;;  %v67_v40 = vmul.f32 0.032258064, %v125_v37 }
  0x20   :  { %114 = vst [vmem:[%s175_s3] sm:$0xff] %v113_v39   ;;  %v118_v41 = vpack.c.bf16 %v67_v40, %v66_v38 }
  0x22   :  { %121 = vst [vmem:[%s175_s3 + $0x8] sm:$0xff] %v118_v41  }

// kernel: autoencoder_forward.11
= control target key start
LH: loop header
LB: loop body
LE: loop exit
PB: predicated region body
PF: predicated region fallthrough
CT: control target
= control target key end

     0   :  { %vm213_vm0 = vcmask 261120   ;;  %v495_v24 = vmov 0.0   ;;  %s625_s1 = inlined_call_operand.vmem [shape: bf16[288,128], index: 1, kind: input, shape index: {}]   ;;  %s626_s0 = inlined_call_operand.vmem [shape: bf16[32,288], index: 0, kind: input, shape index: {}]   ;;  %s627_s4 = inlined_call_operand.vmem [shape: f32[1,128], index: 4, kind: output, shape index: {1}]   ;;  %s628_s5 = inlined_call_operand.vmem [shape: f32[1,128], index: 5, kind: output, shape index: {2}]   ;;  %s629_s2 = inlined_call_operand.vmem [shape: f32[1,128], index: 2, kind: input, shape index: {}]   ;;  %s630_s3 = inlined_call_operand.vmem [shape: bf16[32,128], index: 3, kind: output, shape index: {0}]  }
   0x1   :  { %v469_v0 = vld [vmem:[%s625_s1 + $0x40] sm:$0xff]   ;;  %v471_v2 = vld [vmem:[%s625_s1 + $0x48] sm:$0xff]   ;;  %v473_v4 = vld [vmem:[%s625_s1 + $0x50] sm:$0xff]   ;;  %22 = vst [vmem:[%s627_s4] sm:$0x1] %v495_v24 }
   0x2   :  { %v470_v1 = vld [vmem:[%s625_s1] sm:$0xff]   ;;  %428 = vmatprep.subr.bf16.mxu0 %v469_v0  ;;  %v472_v3 = vld [vmem:[%s625_s1 + $0x8] sm:$0xff]   ;;  %v474_v5 = vld [vmem:[%s625_s1 + $0x10] sm:$0xff]   ;;  %23 = vst [vmem:[%s628_s5] sm:$0x1] %v495_v24 }
   0x3   :  { %429 = vmatpush3.bf16.msra.mxu0 %v470_v1  ;;  %v475_v6 = vld [vmem:[%s625_s1 + $0x58] sm:$0xff]   ;;  %v477_v8 = vld [vmem:[%s625_s1 + $0x60] sm:$0xff]   ;;  %v479_v11 = vld [vmem:[%s625_s1 + $0x68] sm:$0xff]  }
   0x4   :  { %430 = vmatprep.subr.bf16.mxu0 %v471_v2  ;;  %v476_v7 = vld [vmem:[%s625_s1 + $0x18] sm:$0xff]   ;;  %v478_v9 = vld [vmem:[%s625_s1 + $0x20] sm:$0xff]   ;;  %v480_v12 = vld [vmem:[%s625_s1 + $0x28] sm:$0xff]  }
   0x5   :  { %v484_v10 = vld [vmem:[%s625_s1 + $0x80] sm:$0xff]   ;;  %v481_v13 = vld [vmem:[%s625_s1 + $0x70] sm:$0xff]   ;;  %v489_v15 = vld [vmem:[%s625_s1 + $0x88] sm:$0xff]  }
   0x6   :  { %460 = vmatprep.subr.bf16.mxu1 %v484_v10  ;;  %v488_v14 = vld [vmem:[%s626_s0 + $0x4] ss:$12 sps:$4 sm:$0xff]   ;;  %v490_v16 = vld [vmem:[%s626_s0 + $0x8] ss:$12 sps:$4 sm:$0xff]   ;;  %v491_v17 = vld [vmem:[%s626_s0 + $0x20] ss:$12 sps:$4 sm:$0xff]  }
   0x7   :  { %431 = vmatpush3.bf16.msra.mxu0 %v472_v3  ;;  %461 = vmatpush3.bf16.msra.mxu1 %v484_v10  ;;  %v482_v18 = vld [vmem:[%s625_s1 + $0x30] sm:$0xff]   ;;  %v483_v19 = vld [vmem:[%s625_s1 + $0x78] sm:$0xff]   ;;  %v486_v21 = vld [vmem:[%s626_s0] ss:$12 sps:$4 sm:$0xff]  }
   0x8   :  { %432 = vmatprep.subr.bf16.mxu0 %v473_v4  ;;  %252 = vmatprep.mubr.bf16.mxu0 %v488_v14  ;;  %v485_v20 = vld [vmem:[%s625_s1 + $0x38] sm:$0xff]   ;;  %v382_v31 = vld [vmem:[%s629_s2] ss:$0 sm:$0xff] }
   0x9   :  { %462 = vmatprep.subr.bf16.mxu1 %v489_v15  ;;  %464 = vmatprep.mubr.msk.bf16.mxu1 %vm213_vm0, %v490_v16  ;;  %v492_v22 = vld [vmem:[%s626_s0 + $0x1c] ss:$12 sps:$4 sm:$0xff]   ;;  %v494_v23 = vld [vmem:[%s626_s0 + $0x18] ss:$12 sps:$4 sm:$0xff]   ;;  %v334_v14 = vld [vmem:[%s628_s5] sm:$0x1] }
   0xb   :  { %433 = vmatpush3.bf16.msra.mxu0 %v474_v5  ;;  %463 = vmatpush3.bf16.msra.mxu1 %v489_v15 }
   0xc   :  { %434 = vmatprep.subr.bf16.mxu0 %v475_v6 }
   0xe   :  { %465 = vmatmul.mubr.msk.bf16.vlgmr.msra.gmra.mrb[0].mxu1 %vm213_vm0, %v491_v17 }
   0xf   :  { %435 = vmatpush3.bf16.msra.mxu0 %v476_v7 }
  0x10   :  { %436 = vmatprep.subr.bf16.mxu0 %v477_v8 }
  0x13   :  { %437 = vmatpush3.bf16.msra.mxu0 %v478_v9 }
  0x14   :  { %438 = vmatprep.subr.bf16.mxu0 %v479_v11  ;;  %v322_v11 = vld [vmem:[%s627_s4] sm:$0x1] }
  0x17   :  { %439 = vmatpush3.bf16.msra.mxu0 %v480_v12 }
  0x18   :  { %440 = vmatprep.subr.bf16.mxu0 %v481_v13 }
  0x1b   :  { %441 = vmatpush3.bf16.msra.mxu0 %v482_v18 }
  0x1c   :  { %442 = vmatprep.subr.bf16.mxu0 %v483_v19 }
  0x1f   :  { %443 = vmatpush3.bf16.msra.mxu0 %v485_v20 }
  0x22   :  { %253 = vmatmul.mubr.bf16.vlgmr.msra.gmra.mrb[0].mxu0 %v486_v21 }
  0x23   :  { %260 = vmatprep.mubr.bf16.mxu0 %v492_v22 }
  0x2a   :  { %261 = vmatmul.mubr.bf16.gmra.mrb[4].mxu0 %v494_v23 }
  0xe1   :  { %v466_v25 = vpop.f32.mrb[0].mxu1 }
  0xe2   :  { %v303_v26 = vpop.f32.mrb[1].mxu1 }
  0xe3   :  { %v467_v27 = vpop.f32.mrb[2].mxu1 }
  0xe4   :  { %v306_v28 = vpop.f32.mrb[3].mxu1 }
  0xf5   :  { %v444_v29 = vpop.f32.mrb[0].mxu0 }
  0xf6   :  { %v445_v30 = vpop.f32.mrb[1].mxu0 }
  0xf7   :  { %v446_v32 = vadd.f32 %v445_v30, %v444_v29  ;;  %v447_v33 = vpop.f32.mrb[2].mxu0 }
  0xf8   :  { %v448_v34 = vpop.f32.mrb[3].mxu0 }
  0xf9   :  { %v449_v35 = vadd.f32 %v448_v34, %v447_v33  ;;  %v255_v36 = vadd.f32 %v446_v32, %v382_v31 }
  0xfb   :  { %v304_v37 = vadd.f32 %v303_v26, %v255_v36  ;;  %v258_v38 = vadd.f32 %v449_v35, %v382_v31 }
  0xfd   :  { %v318_v39 = vmax.f32 %v304_v37, 0.0  ;;  %v307_v40 = vadd.f32 %v306_v28, %v258_v38  ;;  %v450_v41 = vpop.f32.mrb[4].mxu0 }
  0xfe   :  { %v451_v42 = vpop.f32.mrb[5].mxu0 }
  0xff   :  { %v319_v43 = vmax.f32 %v307_v40, 0.0  ;;  %v452_v44 = vadd.f32 %v451_v42, %v450_v41  ;;  %v453_v45 = vpop.f32.mrb[6].mxu0  ;;  %v335_v46 = vmul.f32 %v318_v39, %v318_v39 }
 0x100   :  { %v454_v47 = vpop.f32.mrb[7].mxu0 }
 0x101   :  { %v323_v48 = vadd.f32 %v319_v43, %v318_v39  ;;  %v336_v49 = vmul.f32 %v319_v43, %v319_v43  ;;  %v420_v50 = vpack.c.bf16 %v319_v43, %v318_v39  ;;  %v263_v51 = vadd.f32 %v452_v44, %v382_v31 }
 0x102   :  { %v455_v52 = vadd.f32 %v454_v47, %v453_v45 }
 0x103   :  { %v339_v53 = vadd.f32 %v336_v49, %v335_v46  ;;  %421 = vst [vmem:[%s630_s3] sm:$0xff] %v420_v50   ;;  %v312_v54 = vadd.f32 %v466_v25, %v263_v51 }
 0x104   :  { %v266_v55 = vadd.f32 %v455_v52, %v382_v31 }
 0x105   :  { %v320_v56 = vmax.f32 %v312_v54, 0.0 }
 0x106   :  { %v315_v57 = vadd.f32 %v467_v27, %v266_v55 }
 0x107   :  { %v324_v58 = vadd.f32 %v323_v48, %v320_v56  ;;  %v337_v59 = vmul.f32 %v320_v56, %v320_v56 }
 0x108   :  { %v321_v60 = vmax.f32 %v315_v57, 0.0 }
 0x109   :  { %v340_v61 = vadd.f32 %v339_v53, %v337_v59 }
 0x10a   :  { %v325_v62 = vadd.f32 %v324_v58, %v321_v60  ;;  %v338_v63 = vmul.f32 %v321_v60, %v321_v60  ;;  %v425_v0 = vpack.c.bf16 %v321_v60, %v320_v56 }
 0x10c   :  { %v326_v1 = vrot.slane %v325_v62, 4  ;;  %v341_v2 = vadd.f32 %v340_v61, %v338_v63  ;;  %427 = vst [vmem:[%s630_s3 + $0x8] sm:$0xff] %v425_v0  }
 0x10e   :  { %v327_v3 = vadd.f32 %v326_v1, %v325_v62  ;;  %v342_v4 = vrot.slane %v341_v2, 4 }
 0x110   :  { %v328_v5 = vrot.slane %v327_v3, 2  ;;  %v343_v6 = vadd.f32 %v342_v4, %v341_v2 }
 0x112   :  { %v329_v7 = vadd.f32 %v328_v5, %v327_v3  ;;  %v344_v8 = vrot.slane %v343_v6, 2 }
 0x114   :  { %v330_v9 = vrot.slane %v329_v7, 1  ;;  %v345_v10 = vadd.f32 %v344_v8, %v343_v6 }
 0x116   :  { %v331_v12 = vadd.f32 %v330_v9, %v329_v7  ;;  %v346_v13 = vrot.slane %v345_v10, 1 }
 0x118   :  { %v332_v15 = vadd.f32 %v331_v12, %v322_v11  ;;  %v347_v16 = vadd.f32 %v346_v13, %v345_v10 }
 0x11a   :  { %333 = vst [vmem:[%s627_s4] sm:$0x1] %v332_v15  ;;  %v348_v17 = vadd.f32 %v347_v16, %v334_v14 }
 0x11c   :  { %349 = vst [vmem:[%s628_s5] sm:$0x1] %v348_v17 }

// kernel: autoencoder_forward.14
= control target key start
LH: loop header
LB: loop body
LE: loop exit
PB: predicated region body
PF: predicated region fallthrough
CT: control target
= control target key end

     0   :  { %s136_s0 = inlined_call_operand.vmem [shape: bf16[32,128], index: 0, kind: input, shape index: {}]   ;;  %s137_s1 = inlined_call_operand.vmem [shape: f32[1,128], index: 1, kind: input, shape index: {}]   ;;  %s138_s2 = inlined_call_operand.vmem [shape: f32[1,128], index: 2, kind: input, shape index: {}]   ;;  %s139_s3 = inlined_call_operand.vmem [shape: bf16[32,128], index: 3, kind: output, shape index: {}]  }
   0x1   :  { %v79_v0 = vld [vmem:[%s136_s0] sm:$0xff]   ;;  %v96_v4 = vld [vmem:[%s136_s0 + $0x8] sm:$0xff]  }
   0x2   :  { %v68_v1 = vld [vmem:[%s137_s1] ss:$0 sm:$0xff]  ;;  %v80_v2 = vunpack.c.l.bf16 %v79_v0  ;;  %v81_v3 = vunpack.c.h.bf16 %v79_v0  ;;  %v84_v6 = vunpack.c.l.bf16 %v96_v4  ;;  %v85_v7 = vunpack.c.h.bf16 %v96_v4 }
   0x3   :  { %v69_v5 = vld [vmem:[%s138_s2] ss:$0 sm:$0xff] }
   0x4   :  { %v29_v8 = vmul.f32 %v80_v2, %v68_v1  ;;  %v30_v9 = vmul.f32 %v81_v3, %v68_v1  ;;  %v31_v10 = vmul.f32 %v84_v6, %v68_v1  ;;  %v32_v11 = vmul.f32 %v85_v7, %v68_v1 }
   0x6   :  { %v40_v12 = vadd.f32 %v69_v5, %v29_v8  ;;  %v41_v13 = vadd.f32 %v69_v5, %v30_v9  ;;  %v42_v14 = vadd.f32 %v69_v5, %v31_v10  ;;  %v43_v15 = vadd.f32 %v69_v5, %v32_v11 }
   0x8   :  { %v89_v16 = vpack.c.bf16 %v41_v13, %v40_v12  ;;  %v94_v17 = vpack.c.bf16 %v43_v15, %v42_v14 }
   0xa   :  { %90 = vst [vmem:[%s139_s3] sm:$0xff] %v89_v16   ;;  %97 = vst [vmem:[%s139_s3 + $0x8] sm:$0xff] %v94_v17  }

// kernel: autoencoder_forward.13
= control target key start
LH: loop header
LB: loop body
LE: loop exit
PB: predicated region body
PF: predicated region fallthrough
CT: control target
= control target key end

     0   :  { %v295_v10 = vmov 0.0   ;;  %s383_s1 = inlined_call_operand.vmem [shape: bf16[128,128], index: 1, kind: input, shape index: {}]   ;;  %s384_s0 = inlined_call_operand.vmem [shape: bf16[32,128], index: 0, kind: input, shape index: {}]   ;;  %s385_s4 = inlined_call_operand.vmem [shape: f32[1,128], index: 4, kind: output, shape index: {1}]   ;;  %s386_s5 = inlined_call_operand.vmem [shape: f32[1,128], index: 5, kind: output, shape index: {2}]   ;;  %s387_s2 = inlined_call_operand.vmem [shape: f32[1,128], index: 2, kind: input, shape index: {}]   ;;  %s388_s3 = inlined_call_operand.vmem [shape: bf16[32,128], index: 3, kind: output, shape index: {0}]  }
   0x1   :  { %v285_v0 = vld [vmem:[%s383_s1] sm:$0xff]   ;;  %v286_v1 = vld [vmem:[%s383_s1 + $0x8] sm:$0xff]   ;;  %v287_v2 = vld [vmem:[%s383_s1 + $0x10] sm:$0xff]   ;;  %22 = vst [vmem:[%s385_s4] sm:$0x1] %v295_v10 }
   0x2   :  { %264 = vmatprep.subr.bf16.mxu0 %v285_v0  ;;  %v288_v3 = vld [vmem:[%s383_s1 + $0x18] sm:$0xff]   ;;  %v293_v4 = vld [vmem:[%s384_s0] sm:$0xff]   ;;  %v290_v6 = vld [vmem:[%s383_s1 + $0x28] sm:$0xff]   ;;  %23 = vst [vmem:[%s386_s5] sm:$0x1] %v295_v10 }
   0x3   :  { %265 = vmatpush3.bf16.msra.mxu0 %v285_v0  ;;  %280 = vmatprep.mubr.bf16.mxu0 %v293_v4  ;;  %v289_v5 = vld [vmem:[%s383_s1 + $0x20] sm:$0xff]   ;;  %v291_v7 = vld [vmem:[%s383_s1 + $0x30] sm:$0xff]   ;;  %v292_v8 = vld [vmem:[%s383_s1 + $0x38] sm:$0xff]  }
   0x4   :  { %266 = vmatprep.subr.bf16.mxu0 %v286_v1  ;;  %v294_v9 = vld [vmem:[%s384_s0 + $0x8] sm:$0xff]   ;;  %v224_v11 = vld [vmem:[%s387_s2] ss:$0 sm:$0xff] }
   0x7   :  { %267 = vmatpush3.bf16.msra.mxu0 %v286_v1 }
   0x8   :  { %268 = vmatprep.subr.bf16.mxu0 %v287_v2  ;;  %v164_v45 = vld [vmem:[%s385_s4] sm:$0x1] }
   0x9   :  { %v176_v48 = vld [vmem:[%s386_s5] sm:$0x1] }
   0xb   :  { %269 = vmatpush3.bf16.msra.mxu0 %v287_v2 }
   0xc   :  { %270 = vmatprep.subr.bf16.mxu0 %v288_v3 }
   0xf   :  { %271 = vmatpush3.bf16.msra.mxu0 %v288_v3 }
  0x10   :  { %272 = vmatprep.subr.bf16.mxu0 %v289_v5 }
  0x13   :  { %273 = vmatpush3.bf16.msra.mxu0 %v289_v5 }
  0x14   :  { %274 = vmatprep.subr.bf16.mxu0 %v290_v6 }
  0x17   :  { %275 = vmatpush3.bf16.msra.mxu0 %v290_v6 }
  0x18   :  { %276 = vmatprep.subr.bf16.mxu0 %v291_v7 }
  0x1b   :  { %277 = vmatpush3.bf16.msra.mxu0 %v291_v7 }
  0x1c   :  { %278 = vmatprep.subr.bf16.mxu0 %v292_v8 }
  0x1f   :  { %279 = vmatpush3.bf16.msra.mxu0 %v292_v8 }
  0x22   :  { %281 = vmatmul.mubr.bf16.vlgmr.msra.gmra.mrb[0].mxu0 %v294_v9 }
  0xf5   :  { %v282_v12 = vpop.f32.mrb[0].mxu0 }
  0xf6   :  { %v154_v13 = vadd.f32 %v282_v12, %v224_v11  ;;  %v145_v14 = vpop.f32.mrb[1].mxu0 }
  0xf7   :  { %v146_v15 = vadd.f32 %v224_v11, %v145_v14  ;;  %v283_v16 = vpop.f32.mrb[2].mxu0 }
  0xf8   :  { %v157_v17 = vadd.f32 %v283_v16, %v224_v11  ;;  %v148_v18 = vpop.f32.mrb[3].mxu0  ;;  %v162_v21 = vmax.f32 %v154_v13, 0.0 }
  0xf9   :  { %v160_v19 = vmax.f32 %v146_v15, 0.0  ;;  %v149_v20 = vadd.f32 %v224_v11, %v148_v18 }
  0xfa   :  { %v163_v22 = vmax.f32 %v157_v17, 0.0  ;;  %v179_v29 = vmul.f32 %v162_v21, %v162_v21 }
  0xfb   :  { %v161_v23 = vmax.f32 %v149_v20, 0.0  ;;  %v177_v25 = vmul.f32 %v160_v19, %v160_v19 }
  0xfc   :  { %v251_v24 = vpack.c.bf16 %v163_v22, %v162_v21  ;;  %v180_v32 = vmul.f32 %v163_v22, %v163_v22 }
  0xfd   :  { %v165_v26 = vadd.f32 %v161_v23, %v160_v19  ;;  %v178_v27 = vmul.f32 %v161_v23, %v161_v23  ;;  %v246_v28 = vpack.c.bf16 %v161_v23, %v160_v19 }
  0xfe   :  { %253 = vst [vmem:[%s388_s3 + $0x8] sm:$0xff] %v251_v24  }
  0xff   :  { %v166_v30 = vadd.f32 %v165_v26, %v162_v21  ;;  %v181_v31 = vadd.f32 %v178_v27, %v177_v25  ;;  %247 = vst [vmem:[%s388_s3] sm:$0xff] %v246_v28  }
 0x101   :  { %v167_v33 = vadd.f32 %v166_v30, %v163_v22  ;;  %v182_v34 = vadd.f32 %v181_v31, %v179_v29 }
 0x103   :  { %v168_v35 = vrot.slane %v167_v33, 4  ;;  %v183_v36 = vadd.f32 %v182_v34, %v180_v32 }
 0x105   :  { %v169_v37 = vadd.f32 %v168_v35, %v167_v33  ;;  %v184_v38 = vrot.slane %v183_v36, 4 }
 0x107   :  { %v170_v39 = vrot.slane %v169_v37, 2  ;;  %v185_v40 = vadd.f32 %v184_v38, %v183_v36 }
 0x109   :  { %v171_v41 = vadd.f32 %v170_v39, %v169_v37  ;;  %v186_v42 = vrot.slane %v185_v40, 2 }
 0x10b   :  { %v172_v43 = vrot.slane %v171_v41, 1  ;;  %v187_v44 = vadd.f32 %v186_v42, %v185_v40 }
 0x10d   :  { %v173_v46 = vadd.f32 %v172_v43, %v171_v41  ;;  %v188_v47 = vrot.slane %v187_v44, 1 }
 0x10f   :  { %v174_v49 = vadd.f32 %v173_v46, %v164_v45  ;;  %v189_v50 = vadd.f32 %v188_v47, %v187_v44 }
 0x111   :  { %175 = vst [vmem:[%s385_s4] sm:$0x1] %v174_v49  ;;  %v190_v51 = vadd.f32 %v189_v50, %v176_v48 }
 0x113   :  { %191 = vst [vmem:[%s386_s5] sm:$0x1] %v190_v51 }

// kernel: autoencoder_forward.15
= control target key start
LH: loop header
LB: loop body
LE: loop exit
PB: predicated region body
PF: predicated region fallthrough
CT: control target
= control target key end

     0   :  { %v605_v16 = vmov 0.0   ;;  %s771_s1 = inlined_call_operand.vmem [shape: bf16[128,128], index: 1, kind: input, shape index: {}]   ;;  %s772_s0 = inlined_call_operand.vmem [shape: bf16[128,128], index: 0, kind: input, shape index: {}]   ;;  %s773_s4 = inlined_call_operand.vmem [shape: f32[1,128], index: 4, kind: output, shape index: {1}]   ;;  %s774_s5 = inlined_call_operand.vmem [shape: f32[1,128], index: 5, kind: output, shape index: {2}]   ;;  %s775_s2 = inlined_call_operand.vmem [shape: f32[1,128], index: 2, kind: input, shape index: {}]   ;;  %s776_s3 = inlined_call_operand.vmem [shape: bf16[128,128], index: 3, kind: output, shape index: {0}]  }
   0x1   :  { %v589_v0 = vld [vmem:[%s771_s1] sm:$0xff]   ;;  %v590_v1 = vld [vmem:[%s771_s1 + $0x8] sm:$0xff]   ;;  %v591_v2 = vld [vmem:[%s771_s1 + $0x10] sm:$0xff]   ;;  %22 = vst [vmem:[%s773_s4] sm:$0x1] %v605_v16 }
   0x2   :  { %540 = vmatprep.subr.bf16.mxu0 %v589_v0  ;;  %572 = vmatprep.subr.bf16.mxu1 %v589_v0  ;;  %v592_v3 = vld [vmem:[%s771_s1 + $0x18] sm:$0xff]   ;;  %v597_v4 = vld [vmem:[%s772_s0] sm:$0xff]   ;;  %v594_v7 = vld [vmem:[%s771_s1 + $0x28] sm:$0xff]   ;;  %23 = vst [vmem:[%s774_s5] sm:$0x1] %v605_v16 }
   0x3   :  { %541 = vmatpush3.bf16.msra.mxu0 %v589_v0  ;;  %580 = vmatpush3.bf16.msra.mxu1 %v589_v0  ;;  %v593_v5 = vld [vmem:[%s771_s1 + $0x20] sm:$0xff]   ;;  %v595_v8 = vld [vmem:[%s771_s1 + $0x30] sm:$0xff]   ;;  %v596_v9 = vld [vmem:[%s771_s1 + $0x38] sm:$0xff]  }
   0x4   :  { %542 = vmatprep.subr.bf16.mxu0 %v590_v1  ;;  %573 = vmatprep.subr.bf16.mxu1 %v590_v1  ;;  %v601_v6 = vld [vmem:[%s772_s0 + $0x20] sm:$0xff]   ;;  %v598_v10 = vld [vmem:[%s772_s0 + $0x8] sm:$0xff]   ;;  %v599_v12 = vld [vmem:[%s772_s0 + $0x10] sm:$0xff]  }
   0x5   :  { %556 = vmatprep.mubr.bf16.mxu0 %v597_v4  ;;  %564 = vmatprep.mubr.bf16.mxu1 %v601_v6  ;;  %v602_v11 = vld [vmem:[%s772_s0 + $0x28] sm:$0xff]   ;;  %v603_v13 = vld [vmem:[%s772_s0 + $0x30] sm:$0xff]   ;;  %v600_v14 = vld [vmem:[%s772_s0 + $0x18] sm:$0xff]  }
   0x6   :  { %v604_v15 = vld [vmem:[%s772_s0 + $0x38] sm:$0xff]   ;;  %v693_v17 = vld [vmem:[%s775_s2] ss:$0 sm:$0xff] }
   0x7   :  { %543 = vmatpush3.bf16.msra.mxu0 %v590_v1  ;;  %581 = vmatpush3.bf16.msra.mxu1 %v590_v1 }
   0x8   :  { %544 = vmatprep.subr.bf16.mxu0 %v591_v2  ;;  %574 = vmatprep.subr.bf16.mxu1 %v591_v2 }
   0xb   :  { %545 = vmatpush3.bf16.msra.mxu0 %v591_v2  ;;  %582 = vmatpush3.bf16.msra.mxu1 %v591_v2 }
   0xc   :  { %546 = vmatprep.subr.bf16.mxu0 %v592_v3  ;;  %575 = vmatprep.subr.bf16.mxu1 %v592_v3 }
   0xf   :  { %547 = vmatpush3.bf16.msra.mxu0 %v592_v3  ;;  %583 = vmatpush3.bf16.msra.mxu1 %v592_v3 }
  0x10   :  { %548 = vmatprep.subr.bf16.mxu0 %v593_v5  ;;  %576 = vmatprep.subr.bf16.mxu1 %v593_v5 }
  0x13   :  { %549 = vmatpush3.bf16.msra.mxu0 %v593_v5  ;;  %584 = vmatpush3.bf16.msra.mxu1 %v593_v5 }
  0x14   :  { %550 = vmatprep.subr.bf16.mxu0 %v594_v7  ;;  %577 = vmatprep.subr.bf16.mxu1 %v594_v7 }
  0x17   :  { %551 = vmatpush3.bf16.msra.mxu0 %v594_v7  ;;  %585 = vmatpush3.bf16.msra.mxu1 %v594_v7 }
  0x18   :  { %552 = vmatprep.subr.bf16.mxu0 %v595_v8  ;;  %578 = vmatprep.subr.bf16.mxu1 %v595_v8 }
  0x1b   :  { %553 = vmatpush3.bf16.msra.mxu0 %v595_v8  ;;  %586 = vmatpush3.bf16.msra.mxu1 %v595_v8 }
  0x1c   :  { %554 = vmatprep.subr.bf16.mxu0 %v596_v9  ;;  %579 = vmatprep.subr.bf16.mxu1 %v596_v9 }
  0x1f   :  { %555 = vmatpush3.bf16.msra.mxu0 %v596_v9  ;;  %587 = vmatpush3.bf16.msra.mxu1 %v596_v9 }
  0x22   :  { %557 = vmatmul.mubr.bf16.vlgmr.msra.gmra.mrb[0].mxu0 %v598_v10  ;;  %565 = vmatmul.mubr.bf16.vlgmr.msra.gmra.mrb[0].mxu1 %v602_v11 }
  0x23   :  { %560 = vmatprep.mubr.bf16.mxu0 %v599_v12  ;;  %568 = vmatprep.mubr.bf16.mxu1 %v603_v13 }
  0x2a   :  { %561 = vmatmul.mubr.bf16.gmra.mrb[4].mxu0 %v600_v14  ;;  %569 = vmatmul.mubr.bf16.gmra.mrb[4].mxu1 %v604_v15 }
  0xf5   :  { %v558_v18 = vpop.f32.mrb[0].mxu0  ;;  %v566_v19 = vpop.f32.mrb[0].mxu1 }
  0xf6   :  { %v202_v20 = vadd.f32 %v558_v18, %v693_v17  ;;  %v193_v21 = vpop.f32.mrb[1].mxu0  ;;  %v234_v22 = vadd.f32 %v566_v19, %v693_v17  ;;  %v225_v23 = vpop.f32.mrb[1].mxu1 }
  0xf7   :  { %v194_v24 = vadd.f32 %v693_v17, %v193_v21  ;;  %v559_v25 = vpop.f32.mrb[2].mxu0  ;;  %v226_v26 = vadd.f32 %v693_v17, %v225_v23  ;;  %v567_v27 = vpop.f32.mrb[2].mxu1 }
  0xf8   :  { %v205_v28 = vadd.f32 %v559_v25, %v693_v17  ;;  %v196_v29 = vpop.f32.mrb[3].mxu0  ;;  %v700_v30 = vmax.f32 %v234_v22, 0.0  ;;  %v237_v31 = vadd.f32 %v567_v27, %v693_v17  ;;  %v228_v32 = vpop.f32.mrb[3].mxu1  ;;  %v258_v36 = vmax.f32 %v202_v20, 0.0 }
  0xf9   :  { %v256_v33 = vmax.f32 %v194_v24, 0.0  ;;  %v197_v34 = vadd.f32 %v693_v17, %v196_v29  ;;  %v229_v35 = vadd.f32 %v693_v17, %v228_v32  ;;  %v705_v38 = vmax.f32 %v226_v26, 0.0 }
  0xfa   :  { %v259_v37 = vmax.f32 %v205_v28, 0.0  ;;  %v707_v39 = vmax.f32 %v237_v31, 0.0  ;;  %v299_v55 = vmul.f32 %v258_v36, %v258_v36 }
  0xfb   :  { %v257_v40 = vmax.f32 %v197_v34, 0.0  ;;  %v709_v41 = vmax.f32 %v229_v35, 0.0  ;;  %v297_v44 = vmul.f32 %v256_v33, %v256_v33  ;;  %v305_v32 = vmul.f32 %v705_v38, %v705_v38 }
  0xfc   :  { %v485_v42 = vpack.c.bf16 %v259_v37, %v258_v36  ;;  %v505_v43 = vpack.c.bf16 %v707_v39, %v700_v30  ;;  %v300_v61 = vmul.f32 %v259_v37, %v259_v37 }
  0xfd   :  { %v273_v45 = vadd.f32 %v257_v40, %v256_v33  ;;  %v298_v46 = vmul.f32 %v257_v40, %v257_v40  ;;  %v480_v47 = vpack.c.bf16 %v257_v40, %v256_v33  ;;  %v562_v48 = vpop.f32.mrb[4].mxu0  ;;  %v570_v49 = vpop.f32.mrb[4].mxu1  ;;  %v500_v52 = vpack.c.bf16 %v709_v41, %v705_v38 }
  0xfe   :  { %517 = vst [vmem:[%s776_s3 + $0x8] sm:$0xff] %v485_v42   ;;  %v218_v50 = vadd.f32 %v562_v48, %v693_v17  ;;  %v209_v51 = vpop.f32.mrb[5].mxu0  ;;  %521 = vst [vmem:[%s776_s3 + $0x28] sm:$0xff] %v505_v43   ;;  %v250_v53 = vadd.f32 %v570_v49, %v693_v17  ;;  %v241_v54 = vpop.f32.mrb[5].mxu1  ;;  %v307_v40 = vmul.f32 %v700_v30, %v700_v30 }
  0xff   :  { %v274_v56 = vadd.f32 %v273_v45, %v258_v36  ;;  %v313_v57 = vadd.f32 %v298_v46, %v297_v44  ;;  %481 = vst [vmem:[%s776_s3] sm:$0xff] %v480_v47   ;;  %v210_v58 = vadd.f32 %v693_v17, %v209_v51  ;;  %v563_v59 = vpop.f32.mrb[6].mxu0  ;;  %v571_v60 = vpop.f32.mrb[6].mxu1  ;;  %520 = vst [vmem:[%s776_s3 + $0x20] sm:$0xff] %v500_v52  }
 0x100   :  { %v221_v62 = vadd.f32 %v563_v59, %v693_v17  ;;  %v212_v63 = vpop.f32.mrb[7].mxu0  ;;  %v253_v0 = vadd.f32 %v571_v60, %v693_v17  ;;  %v244_v1 = vpop.f32.mrb[7].mxu1  ;;  %v262_v6 = vmax.f32 %v218_v50, 0.0  ;;  %v270_v8 = vmax.f32 %v250_v53, 0.0 }
 0x101   :  { %v314_v2 = vadd.f32 %v313_v57, %v299_v55  ;;  %v260_v3 = vmax.f32 %v210_v58, 0.0  ;;  %v275_v4 = vadd.f32 %v274_v56, %v259_v37  ;;  %v213_v5 = vadd.f32 %v693_v17, %v212_v63 }
 0x102   :  { %v263_v7 = vmax.f32 %v221_v62, 0.0  ;;  %v242_v9 = vadd.f32 %v693_v17, %v241_v54  ;;  %v271_v15 = vmax.f32 %v253_v0, 0.0  ;;  %v245_v23 = vadd.f32 %v693_v17, %v244_v1  ;;  %v272_v1 = vld [vmem:[%s773_s4] sm:$0x1] }
 0x103   :  { %v276_v10 = vadd.f32 %v275_v4, %v260_v3  ;;  %v301_v11 = vmul.f32 %v260_v3, %v260_v3  ;;  %v315_v12 = vadd.f32 %v314_v2, %v300_v61  ;;  %v261_v13 = vmax.f32 %v213_v5, 0.0  ;;  %v296_v4 = vld [vmem:[%s774_s5] sm:$0x1] }
 0x104   :  { %v495_v14 = vpack.c.bf16 %v263_v7, %v262_v6  ;;  %v268_v21 = vmax.f32 %v242_v9, 0.0  ;;  %v515_v22 = vpack.c.bf16 %v271_v15, %v270_v8  ;;  %v303_v24 = vmul.f32 %v262_v6, %v262_v6 }
 0x105   :  { %v316_v16 = vadd.f32 %v315_v12, %v301_v11  ;;  %v277_v18 = vadd.f32 %v276_v10, %v261_v13  ;;  %v302_v19 = vmul.f32 %v261_v13, %v261_v13  ;;  %v490_v20 = vpack.c.bf16 %v261_v13, %v260_v3 }
 0x106   :  { %519 = vst [vmem:[%s776_s3 + $0x18] sm:$0xff] %v495_v14   ;;  %523 = vst [vmem:[%s776_s3 + $0x38] sm:$0xff] %v515_v22   ;;  %v269_v27 = vmax.f32 %v245_v23, 0.0  ;;  %v304_v28 = vmul.f32 %v263_v7, %v263_v7  ;;  %v306_v37 = vmul.f32 %v709_v41, %v709_v41  ;;  %v309_v46 = vmul.f32 %v268_v21, %v268_v21 }
 0x107   :  { %v278_v25 = vadd.f32 %v277_v18, %v262_v6  ;;  %v317_v26 = vadd.f32 %v316_v16, %v302_v19  ;;  %518 = vst [vmem:[%s776_s3 + $0x10] sm:$0xff] %v490_v20   ;;  %v311_v52 = vmul.f32 %v270_v8, %v270_v8  ;;  %v312_v54 = vmul.f32 %v271_v15, %v271_v15 }
 0x108   :  { %v510_v33 = vpack.c.bf16 %v269_v27, %v268_v21  ;;  %v310_v51 = vmul.f32 %v269_v27, %v269_v27 }
 0x109   :  { %v318_v29 = vadd.f32 %v317_v26, %v303_v24  ;;  %v279_v31 = vadd.f32 %v278_v25, %v263_v7 }
 0x10a   :  { %522 = vst [vmem:[%s776_s3 + $0x30] sm:$0xff] %v510_v33  }
 0x10b   :  { %v280_v17 = vadd.f32 %v279_v31, %v705_v38  ;;  %v319_v34 = vadd.f32 %v318_v29, %v304_v28  ;;  %v308_v38 = vmul.f32 %v707_v39, %v707_v39 }
 0x10d   :  { %v320_v35 = vadd.f32 %v319_v34, %v305_v32  ;;  %v281_v36 = vadd.f32 %v280_v17, %v709_v41 }
 0x10f   :  { %v282_v42 = vadd.f32 %v281_v36, %v700_v30  ;;  %v321_v43 = vadd.f32 %v320_v35, %v306_v37 }
 0x111   :  { %v322_v44 = vadd.f32 %v321_v43, %v307_v40  ;;  %v283_v45 = vadd.f32 %v282_v42, %v707_v39 }
 0x113   :  { %v284_v47 = vadd.f32 %v283_v45, %v268_v21  ;;  %v323_v48 = vadd.f32 %v322_v44, %v308_v38 }
 0x115   :  { %v324_v49 = vadd.f32 %v323_v48, %v309_v46  ;;  %v285_v50 = vadd.f32 %v284_v47, %v269_v27 }
 0x117   :  { %v286_v41 = vadd.f32 %v285_v50, %v270_v8  ;;  %v325_v53 = vadd.f32 %v324_v49, %v310_v51 }
 0x119   :  { %v287_v55 = vadd.f32 %v286_v41, %v271_v15  ;;  %v326_v56 = vadd.f32 %v325_v53, %v311_v52 }
 0x11b   :  { %v288_v30 = vrot.slane %v287_v55, 4  ;;  %v327_v57 = vadd.f32 %v326_v56, %v312_v54 }
 0x11d   :  { %v289_v58 = vadd.f32 %v288_v30, %v287_v55  ;;  %v328_v59 = vrot.slane %v327_v57, 4 }
 0x11f   :  { %v290_v60 = vrot.slane %v289_v58, 2  ;;  %v329_v61 = vadd.f32 %v328_v59, %v327_v57 }
 0x121   :  { %v291_v62 = vadd.f32 %v290_v60, %v289_v58  ;;  %v330_v39 = vrot.slane %v329_v61, 2 }
 0x123   :  { %v292_v63 = vrot.slane %v291_v62, 1  ;;  %v331_v0 = vadd.f32 %v330_v39, %v329_v61 }
 0x125   :  { %v293_v2 = vadd.f32 %v292_v63, %v291_v62  ;;  %v332_v3 = vrot.slane %v331_v0, 1 }
 0x127   :  { %v294_v5 = vadd.f32 %v293_v2, %v272_v1  ;;  %v333_v6 = vadd.f32 %v332_v3, %v331_v0 }
 0x129   :  { %295 = vst [vmem:[%s773_s4] sm:$0x1] %v294_v5  ;;  %v334_v7 = vadd.f32 %v333_v6, %v296_v4 }
 0x12b   :  { %335 = vst [vmem:[%s774_s5] sm:$0x1] %v334_v7 }

// kernel: autoencoder_forward.17
= control target key start
LH: loop header
LB: loop body
LE: loop exit
PB: predicated region body
PF: predicated region fallthrough
CT: control target
= control target key end

     0   :  { %v2651_v0 = vmov 0   ;;  %vm774_vm0 = vcmask 261120   ;;  %vm1833_vm1 = vcmask 64512   ;;  %s3564_s1 = inlined_call_operand.vmem [shape: bf16[288,8], index: 1, kind: input, shape index: {}]   ;;  %s3565_s0 = inlined_call_operand.vmem [shape: bf16[512,288], index: 0, kind: input, shape index: {}]   ;;  %s3566_s2 = inlined_call_operand.vmem [shape: f32[1,8], index: 2, kind: input, shape index: {}]   ;;  %s3567_s3 = inlined_call_operand.vmem [shape: f32[512,8], index: 3, kind: output, shape index: {}]  }
   0x1   :  { %871 = vmatprep.subr.bf16.mxu0 %v2651_v0  ;;  %2215 = vmatprep.subr.bf16.mxu1 %v2651_v0  ;;  %v2248_v1 = vld [vmem:[%s3564_s1] sm:$0xff]   ;;  %v2249_v2 = vld [vmem:[%s3564_s1 + $0x8] sm:$0xff]   ;;  %v2250_v3 = vld [vmem:[%s3564_s1 + $0x10] sm:$0xff]  }
   0x2   :  { %872 = vmatpush1.bf16.msra.mxu0 %v2248_v1  ;;  %2231 = vmatpush1.bf16.msra.mxu1 %v2248_v1  ;;  %v2251_v4 = vld [vmem:[%s3564_s1 + $0x18] sm:$0xff]   ;;  %v2252_v5 = vld [vmem:[%s3564_s1 + $0x20] sm:$0xff]   ;;  %v2253_v7 = vld [vmem:[%s3564_s1 + $0x28] sm:$0xff]  }
   0x3   :  { %873 = vmatprep.subr.bf16.mxu0 %v2651_v0  ;;  %2216 = vmatprep.subr.bf16.mxu1 %v2651_v0  ;;  %v2266_v6 = vld [vmem:[%s3565_s0 + $0x4] ss:$12 sps:$4 sm:$0xff]   ;;  %v2255_v10 = vld [vmem:[%s3564_s1 + $0x38] sm:$0xff]   ;;  %v2257_v12 = vld [vmem:[%s3564_s1 + $0x48] sm:$0xff]  }
   0x4   :  { %v2269_v8 = vld [vmem:[%s3565_s0 + $0x244] ss:$12 sps:$4 sm:$0xff]   ;;  %903 = vmatprep.mubr.bf16.mxu0 %v2266_v6  ;;  %v2259_v14 = vld [vmem:[%s3564_s1 + $0x58] sm:$0xff]   ;;  %v2261_v16 = vld [vmem:[%s3564_s1 + $0x68] sm:$0xff]  }
   0x5   :  { %1095 = vmatprep.mubr.bf16.mxu1 %v2269_v8  ;;  %v2254_v9 = vld [vmem:[%s3564_s1 + $0x30] sm:$0xff]   ;;  %v2256_v11 = vld [vmem:[%s3564_s1 + $0x40] sm:$0xff]   ;;  %v2263_v18 = vld [vmem:[%s3564_s1 + $0x78] sm:$0xff]  }
   0x6   :  { %874 = vmatpush1.bf16.msra.mxu0 %v2249_v2  ;;  %2232 = vmatpush1.bf16.msra.mxu1 %v2249_v2  ;;  %v2258_v13 = vld [vmem:[%s3564_s1 + $0x50] sm:$0xff]   ;;  %v2260_v15 = vld [vmem:[%s3564_s1 + $0x60] sm:$0xff]   ;;  %v2271_v22 = vld [vmem:[%s3565_s0 + $0x1c] ss:$12 sps:$4 sm:$0xff]  }
   0x7   :  { %875 = vmatprep.subr.bf16.mxu0 %v2651_v0  ;;  %2217 = vmatprep.subr.bf16.mxu1 %v2651_v0  ;;  %v2262_v17 = vld [vmem:[%s3564_s1 + $0x70] sm:$0xff]   ;;  %v2270_v19 = vld [vmem:[%s3564_s1 + $0x80] sm:$0xff]   ;;  %v2273_v23 = vld [vmem:[%s3565_s0 + $0x25c] ss:$12 sps:$4 sm:$0xff]  }
   0x8   :  { %v2264_v20 = vld [vmem:[%s3565_s0] ss:$12 sps:$4 sm:$0xff]   ;;  %v2275_v25 = vld [vmem:[%s3565_s0 + $0x18] ss:$12 sps:$4 sm:$0xff]   ;;  %v2281_v29 = vld [vmem:[%s3565_s0 + $0x30] ss:$12 sps:$4 sm:$0xff]  }
   0x9   :  { %v2267_v21 = vld [vmem:[%s3565_s0 + $0x240] ss:$12 sps:$4 sm:$0xff]   ;;  %v2276_v26 = vld [vmem:[%s3565_s0 + $0x258] ss:$12 sps:$4 sm:$0xff]   ;;  %v2282_v30 = vld [vmem:[%s3565_s0 + $0x270] ss:$12 sps:$4 sm:$0xff]  }
   0xa   :  { %876 = vmatpush1.bf16.msra.mxu0 %v2250_v3  ;;  %2233 = vmatpush1.bf16.msra.mxu1 %v2250_v3  ;;  %v2295_v24 = vld [vmem:[%s3564_s1 + $0x88] sm:$0xff]   ;;  %v2277_v27 = vld [vmem:[%s3565_s0 + $0x34] ss:$12 sps:$4 sm:$0xff]   ;;  %v2289_v35 = vld [vmem:[%s3565_s0 + $0x64] ss:$12 sps:$4 sm:$0xff]  }
   0xb   :  { %877 = vmatprep.subr.bf16.mxu0 %v2651_v0  ;;  %2218 = vmatprep.subr.bf16.mxu1 %v2651_v0  ;;  %v2279_v28 = vld [vmem:[%s3565_s0 + $0x274] ss:$12 sps:$4 sm:$0xff]   ;;  %v2283_v31 = vld [vmem:[%s3565_s0 + $0x4c] ss:$12 sps:$4 sm:$0xff]   ;;  %v2291_v36 = vld [vmem:[%s3565_s0 + $0x2a4] ss:$12 sps:$4 sm:$0xff]  }
   0xc   :  { %v2285_v32 = vld [vmem:[%s3565_s0 + $0x28c] ss:$12 sps:$4 sm:$0xff]   ;;  %v2287_v33 = vld [vmem:[%s3565_s0 + $0x48] ss:$12 sps:$4 sm:$0xff]   ;;  %v2306_v45 = vld [vmem:[%s3565_s0 + $0x90] ss:$12 sps:$4 sm:$0xff]  }
   0xd   :  { %v2288_v34 = vld [vmem:[%s3565_s0 + $0x288] ss:$12 sps:$4 sm:$0xff]   ;;  %v2293_v37 = vld [vmem:[%s3565_s0 + $0x60] ss:$12 sps:$4 sm:$0xff]   ;;  %v2300_v41 = vld [vmem:[%s3565_s0 + $0x78] ss:$12 sps:$4 sm:$0xff]  }
   0xe   :  { %878 = vmatpush1.bf16.msra.mxu0 %v2251_v4  ;;  %2234 = vmatpush1.bf16.msra.mxu1 %v2251_v4  ;;  %v2294_v38 = vld [vmem:[%s3565_s0 + $0x2a0] ss:$12 sps:$4 sm:$0xff]   ;;  %v2296_v39 = vld [vmem:[%s3565_s0 + $0x7c] ss:$12 sps:$4 sm:$0xff]   ;;  %v2301_v42 = vld [vmem:[%s3565_s0 + $0x2b8] ss:$12 sps:$4 sm:$0xff]  }
   0xf   :  { %879 = vmatprep.subr.bf16.mxu0 %v2651_v0  ;;  %2219 = vmatprep.subr.bf16.mxu1 %v2651_v0  ;;  %v2298_v40 = vld [vmem:[%s3565_s0 + $0x2bc] ss:$12 sps:$4 sm:$0xff]   ;;  %v2302_v43 = vld [vmem:[%s3565_s0 + $0x94] ss:$12 sps:$4 sm:$0xff]   ;;  %v2308_v47 = vld [vmem:[%s3565_s0 + $0xac] ss:$12 sps:$4 sm:$0xff]  }
  0x10   :  { %v2304_v44 = vld [vmem:[%s3565_s0 + $0x2d4] ss:$12 sps:$4 sm:$0xff]   ;;  %v2307_v46 = vld [vmem:[%s3565_s0 + $0x2d0] ss:$12 sps:$4 sm:$0xff]   ;;  %v2310_v48 = vld [vmem:[%s3565_s0 + $0x2ec] ss:$12 sps:$4 sm:$0xff]  }
  0x11   :  { %v2312_v49 = vld [vmem:[%s3565_s0 + $0xa8] ss:$12 sps:$4 sm:$0xff]   ;;  %v2314_v51 = vld [vmem:[%s3565_s0 + $0xc4] ss:$12 sps:$4 sm:$0xff]   ;;  %v2317_v53 = vld [vmem:[%s3565_s0 + $0xc0] ss:$12 sps:$4 sm:$0xff]  }
  0x12   :  { %880 = vmatpush1.bf16.msra.mxu0 %v2252_v5  ;;  %2235 = vmatpush1.bf16.msra.mxu1 %v2252_v5  ;;  %v2313_v50 = vld [vmem:[%s3565_s0 + $0x2e8] ss:$12 sps:$4 sm:$0xff]   ;;  %v2318_v54 = vld [vmem:[%s3565_s0 + $0x20] ss:$12 sps:$4 sm:$0xff]   ;;  %v2321_v56 = vld [vmem:[%s3565_s0 + $0x38] ss:$12 sps:$4 sm:$0xff]  }
  0x13   :  { %881 = vmatprep.subr.bf16.mxu0 %v2651_v0  ;;  %2220 = vmatprep.subr.bf16.mxu1 %v2651_v0  ;;  %v2316_v52 = vld [vmem:[%s3565_s0 + $0x8] ss:$12 sps:$4 sm:$0xff]   ;;  %v2322_v57 = vld [vmem:[%s3565_s0 + $0xd8] ss:$12 sps:$4 sm:$0xff]   ;;  %v2323_v58 = vld [vmem:[%s3565_s0 + $0x50] ss:$12 sps:$4 sm:$0xff]  }
  0x14   :  { %v2319_v55 = vld [vmem:[%s3565_s0 + $0xdc] ss:$12 sps:$4 sm:$0xff]   ;;  %v2324_v59 = vld [vmem:[%s3565_s0 + $0xf4] ss:$12 sps:$4 sm:$0xff]   ;;  %v2329_v63 = vld [vmem:[%s3565_s0 + $0x10c] ss:$12 sps:$4 sm:$0xff]  }
  0x15   :  { %v2326_v60 = vld [vmem:[%s3565_s0 + $0x68] ss:$12 sps:$4 sm:$0xff]   ;;  %v2327_v61 = vld [vmem:[%s3565_s0 + $0xf0] ss:$12 sps:$4 sm:$0xff]   ;;  %v2328_v62 = vld [vmem:[%s3565_s0 + $0x80] ss:$12 sps:$4 sm:$0xff]  }
  0x16   :  { %882 = vmatpush1.bf16.msra.mxu0 %v2253_v7  ;;  %2236 = vmatpush1.bf16.msra.mxu1 %v2253_v7  ;;  %v2332_v1 = vld [vmem:[%s3565_s0 + $0x108] ss:$12 sps:$4 sm:$0xff]   ;;  %v2333_v2 = vld [vmem:[%s3565_s0 + $0xb0] ss:$12 sps:$4 sm:$0xff]   ;;  %v2337_v5 = vld [vmem:[%s3565_s0 + $0x120] ss:$12 sps:$4 sm:$0xff]  }
  0x17   :  { %883 = vmatprep.subr.bf16.mxu0 %v2651_v0  ;;  %2221 = vmatprep.subr.bf16.mxu1 %v2651_v0  ;;  %v2334_v3 = vld [vmem:[%s3565_s0 + $0x124] ss:$12 sps:$4 sm:$0xff]   ;;  %v2336_v4 = vld [vmem:[%s3565_s0 + $0xc8] ss:$12 sps:$4 sm:$0xff]   ;;  %v2338_v6 = vld [vmem:[%s3565_s0 + $0xe0] ss:$12 sps:$4 sm:$0xff]  }
  0x18   :  { %v2339_v7 = vld [vmem:[%s3565_s0 + $0x13c] ss:$12 sps:$4 sm:$0xff]   ;;  %v2341_v8 = vld [vmem:[%s3565_s0 + $0xf8] ss:$12 sps:$4 sm:$0xff]  }
  0x1a   :  { %884 = vmatpush1.bf16.msra.mxu0 %v2254_v9  ;;  %2237 = vmatpush1.bf16.msra.mxu1 %v2254_v9  ;;  %v2342_v9 = vld [vmem:[%s3565_s0 + $0x138] ss:$12 sps:$4 sm:$0xff]  }
  0x1b   :  { %885 = vmatprep.subr.bf16.mxu0 %v2651_v0  ;;  %2222 = vmatprep.subr.bf16.mxu1 %v2651_v0 }
  0x1e   :  { %886 = vmatpush1.bf16.msra.mxu0 %v2255_v10  ;;  %2238 = vmatpush1.bf16.msra.mxu1 %v2255_v10  ;;  %v2343_v10 = vld [vmem:[%s3565_s0 + $0x110] ss:$12 sps:$4 sm:$0xff]  }
  0x1f   :  { %887 = vmatprep.subr.bf16.mxu0 %v2651_v0  ;;  %2223 = vmatprep.subr.bf16.mxu1 %v2651_v0 }
  0x22   :  { %888 = vmatpush1.bf16.msra.mxu0 %v2256_v11  ;;  %2239 = vmatpush1.bf16.msra.mxu1 %v2256_v11  ;;  %v2344_v11 = vld [vmem:[%s3565_s0 + $0x154] ss:$12 sps:$4 sm:$0xff]  }
  0x23   :  { %889 = vmatprep.subr.bf16.mxu0 %v2651_v0  ;;  %2224 = vmatprep.subr.bf16.mxu1 %v2651_v0 }
  0x26   :  { %890 = vmatpush1.bf16.msra.mxu0 %v2257_v12  ;;  %2240 = vmatpush1.bf16.msra.mxu1 %v2257_v12  ;;  %v2346_v12 = vld [vmem:[%s3565_s0 + $0x128] ss:$12 sps:$4 sm:$0xff]  }
  0x27   :  { %891 = vmatprep.subr.bf16.mxu0 %v2651_v0  ;;  %2225 = vmatprep.subr.bf16.mxu1 %v2651_v0 }
  0x2a   :  { %892 = vmatpush1.bf16.msra.mxu0 %v2258_v13  ;;  %2241 = vmatpush1.bf16.msra.mxu1 %v2258_v13  ;;  %v2347_v13 = vld [vmem:[%s3565_s0 + $0x150] ss:$12 sps:$4 sm:$0xff]  }
  0x2b   :  { %893 = vmatprep.subr.bf16.mxu0 %v2651_v0  ;;  %2226 = vmatprep.subr.bf16.mxu1 %v2651_v0 }
  0x2e   :  { %894 = vmatpush1.bf16.msra.mxu0 %v2259_v14  ;;  %2242 = vmatpush1.bf16.msra.mxu1 %v2259_v14  ;;  %v2348_v14 = vld [vmem:[%s3565_s0 + $0x140] ss:$12 sps:$4 sm:$0xff]  }
  0x2f   :  { %895 = vmatprep.subr.bf16.mxu0 %v2651_v0  ;;  %2227 = vmatprep.subr.bf16.mxu1 %v2651_v0 }
  0x32   :  { %896 = vmatpush1.bf16.msra.mxu0 %v2260_v15  ;;  %2243 = vmatpush1.bf16.msra.mxu1 %v2260_v15  ;;  %v2349_v15 = vld [vmem:[%s3565_s0 + $0x16c] ss:$12 sps:$4 sm:$0xff]  }
  0x33   :  { %897 = vmatprep.subr.bf16.mxu0 %v2651_v0  ;;  %2228 = vmatprep.subr.bf16.mxu1 %v2651_v0 }
  0x36   :  { %898 = vmatpush1.bf16.msra.mxu0 %v2261_v16  ;;  %2244 = vmatpush1.bf16.msra.mxu1 %v2261_v16  ;;  %v2351_v16 = vld [vmem:[%s3565_s0 + $0x158] ss:$12 sps:$4 sm:$0xff]  }
  0x37   :  { %899 = vmatprep.subr.bf16.mxu0 %v2651_v0  ;;  %2229 = vmatprep.subr.bf16.mxu1 %v2651_v0 }
  0x3a   :  { %900 = vmatpush1.bf16.msra.mxu0 %v2262_v17  ;;  %2245 = vmatpush1.bf16.msra.mxu1 %v2262_v17  ;;  %v2352_v17 = vld [vmem:[%s3565_s0 + $0x168] ss:$12 sps:$4 sm:$0xff]  }
  0x3b   :  { %901 = vmatprep.subr.bf16.mxu0 %v2651_v0  ;;  %2230 = vmatprep.subr.bf16.mxu1 %v2651_v0  ;;  %v2331_v0 = vld [vmem:[%s3565_s0 + $0x98] ss:$12 sps:$4 sm:$0xff]  }
  0x3e   :  { %902 = vmatpush1.bf16.msra.mxu0 %v2263_v18  ;;  %2246 = vmatpush1.bf16.msra.mxu1 %v2263_v18  ;;  %v2353_v18 = vld [vmem:[%s3565_s0 + $0x170] ss:$12 sps:$4 sm:$0xff]  }
  0x3f   :  { %2147 = vmatprep.subr.bf16.mxu1 %v2270_v19 }
  0x41   :  { %904 = vmatmul.mubr.bf16.vlgmr.msra.gmra.mrb[0].mxu0 %v2264_v20  ;;  %1096 = vmatmul.mubr.bf16.vlgmr.msra.gmra.mrb[0].mxu1 %v2267_v21  ;;  %v2356_v20 = vld [vmem:[%s3565_s0 + $0x188] ss:$12 sps:$4 sm:$0xff]   ;;  %v2357_v21 = vld [vmem:[%s3565_s0 + $0x180] ss:$12 sps:$4 sm:$0xff]  }
  0x42   :  { %2148 = vmatpush3.bf16.msra.mxu1 %v2270_v19  ;;  %911 = vmatprep.mubr.bf16.mxu0 %v2271_v22  ;;  %v2354_v19 = vld [vmem:[%s3565_s0 + $0x184] ss:$12 sps:$4 sm:$0xff]   ;;  %v2358_v22 = vld [vmem:[%s3565_s0 + $0x1a0] ss:$12 sps:$4 sm:$0xff]  }
  0x43   :  { %1103 = vmatprep.mubr.bf16.mxu1 %v2273_v23  ;;  %2149 = vmatprep.subr.bf16.mxu1 %v2295_v24  ;;  %v2359_v23 = vld [vmem:[%s3565_s0 + $0x19c] ss:$12 sps:$4 sm:$0xff]  }
  0x46   :  { %2150 = vmatpush3.bf16.msra.mxu1 %v2295_v24  ;;  %v2361_v24 = vld [vmem:[%s3565_s0 + $0x1b8] ss:$12 sps:$4 sm:$0xff]  }
  0x49   :  { %912 = vmatmul.mubr.bf16.gmra.mrb[4].mxu0 %v2275_v25  ;;  %1104 = vmatmul.mubr.bf16.gmra.mrb[4].mxu1 %v2276_v26  ;;  %v2362_v25 = vld [vmem:[%s3565_s0 + $0x198] ss:$12 sps:$4 sm:$0xff]   ;;  %v2363_v26 = vld [vmem:[%s3565_s0 + $0x1d0] ss:$12 sps:$4 sm:$0xff]  }
  0x4a   :  { %919 = vmatprep.mubr.bf16.mxu0 %v2277_v27  ;;  %1111 = vmatprep.mubr.bf16.mxu1 %v2279_v28  ;;  %v2364_v27 = vld [vmem:[%s3565_s0 + $0x1b4] ss:$12 sps:$4 sm:$0xff]  }
  0x4b   :  { %v2366_v28 = vld [vmem:[%s3565_s0 + $0x1e8] ss:$12 sps:$4 sm:$0xff]  }
  0x51   :  { %920 = vmatmul.mubr.bf16.gmra.mrb[8].mxu0 %v2281_v29  ;;  %1112 = vmatmul.mubr.bf16.gmra.mrb[8].mxu1 %v2282_v30  ;;  %v2367_v29 = vld [vmem:[%s3565_s0 + $0x1b0] ss:$12 sps:$4 sm:$0xff]   ;;  %v2368_v30 = vld [vmem:[%s3565_s0 + $0x200] ss:$12 sps:$4 sm:$0xff]  }
  0x52   :  { %927 = vmatprep.mubr.bf16.mxu0 %v2283_v31  ;;  %1119 = vmatprep.mubr.bf16.mxu1 %v2285_v32  ;;  %v2369_v31 = vld [vmem:[%s3565_s0 + $0x1cc] ss:$12 sps:$4 sm:$0xff]  }
  0x53   :  { %v2371_v32 = vld [vmem:[%s3565_s0 + $0x218] ss:$12 sps:$4 sm:$0xff]  }
  0x59   :  { %928 = vmatmul.mubr.bf16.gmra.mrb[12].mxu0 %v2287_v33  ;;  %1120 = vmatmul.mubr.bf16.gmra.mrb[12].mxu1 %v2288_v34  ;;  %v2372_v33 = vld [vmem:[%s3565_s0 + $0x1c8] ss:$12 sps:$4 sm:$0xff]   ;;  %v2373_v34 = vld [vmem:[%s3565_s0 + $0x230] ss:$12 sps:$4 sm:$0xff]  }
  0x5a   :  { %935 = vmatprep.mubr.bf16.mxu0 %v2289_v35  ;;  %1127 = vmatprep.mubr.bf16.mxu1 %v2291_v36  ;;  %v2374_v35 = vld [vmem:[%s3565_s0 + $0x1e4] ss:$12 sps:$4 sm:$0xff]   ;;  %v2376_v36 = vld [vmem:[%s3565_s0 + $0x248] ss:$12 sps:$4 sm:$0xff]  }
  0x61   :  { %936 = vmatmul.mubr.bf16.gmra.mrb[16].mxu0 %v2293_v37  ;;  %1128 = vmatmul.mubr.bf16.gmra.mrb[16].mxu1 %v2294_v38  ;;  %v2377_v37 = vld [vmem:[%s3565_s0 + $0x1e0] ss:$12 sps:$4 sm:$0xff]  }
  0x62   :  { %943 = vmatprep.mubr.bf16.mxu0 %v2296_v39  ;;  %1135 = vmatprep.mubr.bf16.mxu1 %v2298_v40  ;;  %v2378_v38 = vld [vmem:[%s3565_s0 + $0x260] ss:$12 sps:$4 sm:$0xff]   ;;  %v2379_v39 = vld [vmem:[%s3565_s0 + $0x1fc] ss:$12 sps:$4 sm:$0xff]   ;;  %v2381_v40 = vld [vmem:[%s3565_s0 + $0x278] ss:$12 sps:$4 sm:$0xff]  }
  0x69   :  { %944 = vmatmul.mubr.bf16.gmra.mrb[20].mxu0 %v2300_v41  ;;  %1136 = vmatmul.mubr.bf16.gmra.mrb[20].mxu1 %v2301_v42  ;;  %v2382_v41 = vld [vmem:[%s3565_s0 + $0x1f8] ss:$12 sps:$4 sm:$0xff]   ;;  %v2383_v42 = vld [vmem:[%s3565_s0 + $0x290] ss:$12 sps:$4 sm:$0xff]  }
  0x6a   :  { %951 = vmatprep.mubr.bf16.mxu0 %v2302_v43  ;;  %1143 = vmatprep.mubr.bf16.mxu1 %v2304_v44  ;;  %v2384_v43 = vld [vmem:[%s3565_s0 + $0x214] ss:$12 sps:$4 sm:$0xff]  }
  0x6b   :  { %v2386_v44 = vld [vmem:[%s3565_s0 + $0x2a8] ss:$12 sps:$4 sm:$0xff]  }
  0x71   :  { %952 = vmatmul.mubr.bf16.gmra.mrb[24].mxu0 %v2306_v45  ;;  %1144 = vmatmul.mubr.bf16.gmra.mrb[24].mxu1 %v2307_v46  ;;  %v2387_v45 = vld [vmem:[%s3565_s0 + $0x210] ss:$12 sps:$4 sm:$0xff]   ;;  %v2388_v46 = vld [vmem:[%s3565_s0 + $0x2c0] ss:$12 sps:$4 sm:$0xff]  }
  0x72   :  { %959 = vmatprep.mubr.bf16.mxu0 %v2308_v47  ;;  %1151 = vmatprep.mubr.bf16.mxu1 %v2310_v48  ;;  %v2389_v47 = vld [vmem:[%s3565_s0 + $0x22c] ss:$12 sps:$4 sm:$0xff]  }
  0x73   :  { %v2391_v48 = vld [vmem:[%s3565_s0 + $0x2d8] ss:$12 sps:$4 sm:$0xff]  }
  0x79   :  { %960 = vmatmul.mubr.bf16.gmra.mrb[28].mxu0 %v2312_v49  ;;  %1152 = vmatmul.mubr.bf16.gmra.mrb[28].mxu1 %v2313_v50  ;;  %v2392_v49 = vld [vmem:[%s3565_s0 + $0x228] ss:$12 sps:$4 sm:$0xff]   ;;  %v2393_v50 = vld [vmem:[%s3565_s0 + $0x2f0] ss:$12 sps:$4 sm:$0xff]  }
  0x7a   :  { %967 = vmatprep.mubr.bf16.mxu0 %v2314_v51  ;;  %2151 = vmatprep.mubr.msk.bf16.mxu1 %vm774_vm0, %v2316_v52 }
  0x81   :  { %968 = vmatmul.mubr.bf16.gmra.mrb[32].mxu0 %v2317_v53  ;;  %2152 = vmatmul.mubr.msk.bf16.vlgmr.msra.gmra.mrb[32].mxu1 %vm774_vm0, %v2318_v54 }
  0x82   :  { %975 = vmatprep.mubr.bf16.mxu0 %v2319_v55  ;;  %2155 = vmatprep.mubr.msk.bf16.mxu1 %vm774_vm0, %v2321_v56 }
  0x89   :  { %976 = vmatmul.mubr.bf16.gmra.mrb[36].mxu0 %v2322_v57  ;;  %2156 = vmatmul.mubr.msk.bf16.gmra.mrb[36].mxu1 %vm774_vm0, %v2323_v58 }
  0x8a   :  { %983 = vmatprep.mubr.bf16.mxu0 %v2324_v59  ;;  %2159 = vmatprep.mubr.msk.bf16.mxu1 %vm774_vm0, %v2326_v60 }
  0x91   :  { %984 = vmatmul.mubr.bf16.gmra.mrb[40].mxu0 %v2327_v61  ;;  %2160 = vmatmul.mubr.msk.bf16.gmra.mrb[40].mxu1 %vm774_vm0, %v2328_v62 }
  0x92   :  { %991 = vmatprep.mubr.bf16.mxu0 %v2329_v63  ;;  %2163 = vmatprep.mubr.msk.bf16.mxu1 %vm774_vm0, %v2331_v0 }
  0x99   :  { %992 = vmatmul.mubr.bf16.gmra.mrb[44].mxu0 %v2332_v1  ;;  %2164 = vmatmul.mubr.msk.bf16.gmra.mrb[44].mxu1 %vm774_vm0, %v2333_v2 }
  0x9a   :  { %999 = vmatprep.mubr.bf16.mxu0 %v2334_v3  ;;  %2167 = vmatprep.mubr.msk.bf16.mxu1 %vm774_vm0, %v2336_v4 }
  0xa1   :  { %1000 = vmatmul.mubr.bf16.gmra.mrb[48].mxu0 %v2337_v5  ;;  %2168 = vmatmul.mubr.msk.bf16.gmra.mrb[48].mxu1 %vm774_vm0, %v2338_v6 }
  0xa2   :  { %1007 = vmatprep.mubr.bf16.mxu0 %v2339_v7  ;;  %2171 = vmatprep.mubr.msk.bf16.mxu1 %vm774_vm0, %v2341_v8 }
  0xa9   :  { %1008 = vmatmul.mubr.bf16.gmra.mrb[52].mxu0 %v2342_v9  ;;  %2172 = vmatmul.mubr.msk.bf16.gmra.mrb[52].mxu1 %vm774_vm0, %v2343_v10 }
  0xaa   :  { %1015 = vmatprep.mubr.bf16.mxu0 %v2344_v11  ;;  %2175 = vmatprep.mubr.msk.bf16.mxu1 %vm774_vm0, %v2346_v12 }
  0xb1   :  { %1016 = vmatmul.mubr.bf16.gmra.mrb[56].mxu0 %v2347_v13  ;;  %2176 = vmatmul.mubr.msk.bf16.gmra.mrb[56].mxu1 %vm774_vm0, %v2348_v14 }
  0xb2   :  { %1023 = vmatprep.mubr.bf16.mxu0 %v2349_v15  ;;  %2179 = vmatprep.mubr.msk.bf16.mxu1 %vm774_vm0, %v2351_v16 }
  0xb9   :  { %1024 = vmatmul.mubr.bf16.gmra.mrb[60].mxu0 %v2352_v17  ;;  %2180 = vmatmul.mubr.msk.bf16.gmra.mrb[60].mxu1 %vm774_vm0, %v2353_v18 }
  0xba   :  { %1031 = vmatprep.mubr.bf16.mxu0 %v2354_v19  ;;  %2183 = vmatprep.mubr.msk.bf16.mxu1 %vm774_vm0, %v2356_v20 }
  0xc1   :  { %1032 = vmatmul.mubr.bf16.gmra.mrb[64].mxu0 %v2357_v21  ;;  %2184 = vmatmul.mubr.msk.bf16.gmra.mrb[64].mxu1 %vm774_vm0, %v2358_v22 }
  0xc2   :  { %1039 = vmatprep.mubr.bf16.mxu0 %v2359_v23  ;;  %2187 = vmatprep.mubr.msk.bf16.mxu1 %vm774_vm0, %v2361_v24 }
  0xc9   :  { %1040 = vmatmul.mubr.bf16.gmra.mrb[68].mxu0 %v2362_v25  ;;  %2188 = vmatmul.mubr.msk.bf16.gmra.mrb[68].mxu1 %vm774_vm0, %v2363_v26 }
  0xca   :  { %1047 = vmatprep.mubr.bf16.mxu0 %v2364_v27  ;;  %2191 = vmatprep.mubr.msk.bf16.mxu1 %vm774_vm0, %v2366_v28 }
  0xd1   :  { %1048 = vmatmul.mubr.bf16.gmra.mrb[72].mxu0 %v2367_v29  ;;  %2192 = vmatmul.mubr.msk.bf16.gmra.mrb[72].mxu1 %vm774_vm0, %v2368_v30 }
  0xd2   :  { %1055 = vmatprep.mubr.bf16.mxu0 %v2369_v31  ;;  %2195 = vmatprep.mubr.msk.bf16.mxu1 %vm774_vm0, %v2371_v32 }
  0xd9   :  { %1056 = vmatmul.mubr.bf16.gmra.mrb[76].mxu0 %v2372_v33  ;;  %2196 = vmatmul.mubr.msk.bf16.gmra.mrb[76].mxu1 %vm774_vm0, %v2373_v34 }
  0xda   :  { %1063 = vmatprep.mubr.bf16.mxu0 %v2374_v35  ;;  %2199 = vmatprep.mubr.msk.bf16.mxu1 %vm774_vm0, %v2376_v36 }
  0xe1   :  { %1064 = vmatmul.mubr.bf16.gmra.mrb[80].mxu0 %v2377_v37  ;;  %2200 = vmatmul.mubr.msk.bf16.gmra.mrb[80].mxu1 %vm774_vm0, %v2378_v38 }
  0xe2   :  { %1071 = vmatprep.mubr.bf16.mxu0 %v2379_v39  ;;  %2203 = vmatprep.mubr.msk.bf16.mxu1 %vm774_vm0, %v2381_v40 }
  0xe9   :  { %1072 = vmatmul.mubr.bf16.gmra.mrb[84].mxu0 %v2382_v41  ;;  %2204 = vmatmul.mubr.msk.bf16.gmra.mrb[84].mxu1 %vm774_vm0, %v2383_v42 }
  0xea   :  { %1079 = vmatprep.mubr.bf16.mxu0 %v2384_v43  ;;  %2207 = vmatprep.mubr.msk.bf16.mxu1 %vm774_vm0, %v2386_v44 }
  0xf1   :  { %1080 = vmatmul.mubr.bf16.gmra.mrb[88].mxu0 %v2387_v45  ;;  %2208 = vmatmul.mubr.msk.bf16.gmra.mrb[88].mxu1 %vm774_vm0, %v2388_v46 }
  0xf2   :  { %1087 = vmatprep.mubr.bf16.mxu0 %v2389_v47  ;;  %2211 = vmatprep.mubr.msk.bf16.mxu1 %vm774_vm0, %v2391_v48 }
  0xf9   :  { %1088 = vmatmul.mubr.bf16.gmra.mrb[92].mxu0 %v2392_v49  ;;  %2212 = vmatmul.mubr.msk.bf16.gmra.mrb[92].mxu1 %vm774_vm0, %v2393_v50 }
 0x114   :  { %v3078_v51 = vpop.f32.mrb[0].mxu0  ;;  %v3080_v52 = vpop.f32.mrb[0].mxu1 }
 0x115   :  { %v907_v53 = vpop.f32.mrb[1].mxu0  ;;  %v1099_v54 = vpop.f32.mrb[1].mxu1 }
 0x116   :  { %v3082_v55 = vpop.f32.mrb[2].mxu0  ;;  %v3084_v56 = vpop.f32.mrb[2].mxu1  ;;  %v3141_v53 = vld [vmem:[%s3566_s2] ss:$0 sm:$0xff] }
 0x117   :  { %v910_v57 = vpop.f32.mrb[3].mxu0  ;;  %v1102_v58 = vpop.f32.mrb[3].mxu1 }
 0x118   :  { %v906_v57 = vadd.f32 %v3141_v53, %v3078_v51 }
 0x11c   :  { %v913_v59 = vpop.f32.mrb[4].mxu0  ;;  %v3086_v60 = vpop.f32.mrb[4].mxu1 }
 0x11d   :  { %v915_v61 = vpop.f32.mrb[5].mxu0  ;;  %v1107_v62 = vpop.f32.mrb[5].mxu1  ;;  %v914_v54 = vadd.f32 %v3141_v53, %v913_v59 }
 0x11e   :  { %v916_v63 = vpop.f32.mrb[6].mxu0  ;;  %v3088_v0 = vpop.f32.mrb[6].mxu1 }
 0x11f   :  { %v918_v1 = vpop.f32.mrb[7].mxu0  ;;  %v1110_v2 = vpop.f32.mrb[7].mxu1  ;;  %v917_v62 = vadd.f32 %v3141_v53, %v916_v63 }
 0x124   :  { %v3090_v3 = vpop.f32.mrb[8].mxu0  ;;  %v3092_v4 = vpop.f32.mrb[8].mxu1 }
 0x125   :  { %v923_v5 = vpop.f32.mrb[9].mxu0  ;;  %v1115_v6 = vpop.f32.mrb[9].mxu1 }
 0x126   :  { %v3094_v7 = vpop.f32.mrb[10].mxu0  ;;  %v3096_v8 = vpop.f32.mrb[10].mxu1  ;;  %v909_v6 = vadd.f32 %v3141_v53, %v3082_v55  ;;  %v922_v55 = vadd.f32 %v3141_v53, %v3090_v3 }
 0x127   :  { %v926_v9 = vpop.f32.mrb[11].mxu0  ;;  %v1118_v10 = vpop.f32.mrb[11].mxu1 }
 0x12c   :  { %v3098_v11 = vpop.f32.mrb[12].mxu0  ;;  %v3100_v12 = vpop.f32.mrb[12].mxu1 }
 0x12d   :  { %v931_v13 = vpop.f32.mrb[13].mxu0  ;;  %v1123_v14 = vpop.f32.mrb[13].mxu1 }
 0x12e   :  { %v3102_v15 = vpop.f32.mrb[14].mxu0  ;;  %v3104_v16 = vpop.f32.mrb[14].mxu1 }
 0x12f   :  { %v934_v17 = vpop.f32.mrb[15].mxu0  ;;  %v1126_v18 = vpop.f32.mrb[15].mxu1 }
 0x134   :  { %v3106_v19 = vpop.f32.mrb[16].mxu0  ;;  %v3108_v20 = vpop.f32.mrb[16].mxu1 }
 0x135   :  { %v939_v21 = vpop.f32.mrb[17].mxu0  ;;  %v1131_v22 = vpop.f32.mrb[17].mxu1 }
 0x136   :  { %v3110_v23 = vpop.f32.mrb[18].mxu0  ;;  %v3112_v24 = vpop.f32.mrb[18].mxu1 }
 0x137   :  { %v942_v25 = vpop.f32.mrb[19].mxu0  ;;  %v1134_v26 = vpop.f32.mrb[19].mxu1 }
 0x138   :  { %v930_v25 = vadd.f32 %v3141_v53, %v3098_v11 }
 0x13c   :  { %v3114_v27 = vpop.f32.mrb[20].mxu0  ;;  %v3116_v28 = vpop.f32.mrb[20].mxu1 }
 0x13d   :  { %v947_v29 = vpop.f32.mrb[21].mxu0  ;;  %v1139_v30 = vpop.f32.mrb[21].mxu1 }
 0x13e   :  { %v3118_v31 = vpop.f32.mrb[22].mxu0  ;;  %v3120_v32 = vpop.f32.mrb[22].mxu1  ;;  %v933_v30 = vadd.f32 %v3141_v53, %v3102_v15 }
 0x13f   :  { %v950_v33 = vpop.f32.mrb[23].mxu0  ;;  %v1142_v34 = vpop.f32.mrb[23].mxu1 }
 0x144   :  { %v3122_v35 = vpop.f32.mrb[24].mxu0  ;;  %v3124_v36 = vpop.f32.mrb[24].mxu1 }
 0x145   :  { %v955_v37 = vpop.f32.mrb[25].mxu0  ;;  %v1147_v38 = vpop.f32.mrb[25].mxu1 }
 0x146   :  { %v3126_v39 = vpop.f32.mrb[26].mxu0  ;;  %v3128_v40 = vpop.f32.mrb[26].mxu1  ;;  %v925_v38 = vadd.f32 %v3141_v53, %v3094_v7 }
 0x147   :  { %v958_v41 = vpop.f32.mrb[27].mxu0  ;;  %v1150_v42 = vpop.f32.mrb[27].mxu1 }
 0x14c   :  { %v3130_v43 = vpop.f32.mrb[28].mxu0  ;;  %v3132_v44 = vpop.f32.mrb[28].mxu1 }
 0x14d   :  { %v963_v45 = vpop.f32.mrb[29].mxu0  ;;  %v1155_v46 = vpop.f32.mrb[29].mxu1 }
 0x14e   :  { %v3134_v47 = vpop.f32.mrb[30].mxu0  ;;  %v3136_v48 = vpop.f32.mrb[30].mxu1 }
 0x14f   :  { %v966_v49 = vpop.f32.mrb[31].mxu0  ;;  %v1158_v50 = vpop.f32.mrb[31].mxu1 }
 0x154   :  { %v3146_v58 = vpop.f32.mrb[32].mxu0  ;;  %v2153_v61 = vpop.f32.mrb[32].mxu1 }
 0x155   :  { %v1203_v1 = vadd.f32 %v2153_v61, %v914_v54  ;;  %v971_v2 = vpop.f32.mrb[33].mxu0  ;;  %v1194_v5 = vpop.f32.mrb[33].mxu1 }
 0x156   :  { %v1195_v9 = vadd.f32 %v1194_v5, %v906_v57  ;;  %v3151_v10 = vpop.f32.mrb[34].mxu0  ;;  %v2154_v13 = vpop.f32.mrb[34].mxu1 }
 0x157   :  { %v2051_v14 = vmul.f32 -1.442695, %v1203_v1  ;;  %v1206_v59 = vadd.f32 %v2154_v13, %v917_v62  ;;  %v974_v17 = vpop.f32.mrb[35].mxu0  ;;  %v1197_v18 = vpop.f32.mrb[35].mxu1  ;;  %v946_v62 = vadd.f32 %v3141_v53, %v3114_v27  ;;  %v938_v1 = vadd.f32 %v3141_v53, %v3106_v19 }
 0x158   :  { %v2049_v51 = vmul.f32 -1.442695, %v1195_v9  ;;  %v1198_v21 = vadd.f32 %v1197_v18, %v909_v6  ;;  %v941_v13 = vadd.f32 %v3141_v53, %v3110_v23  ;;  %v949_v27 = vadd.f32 %v3141_v53, %v3118_v31 }
 0x159   :  { %2394 = vpow2.f32 %v2051_v14  ;;  %v2052_v22 = vmul.f32 -1.442695, %v1206_v59 }
 0x15a   :  { %2396 = vpow2.f32 %v2049_v51  ;;  %v2050_v63 = vmul.f32 -1.442695, %v1198_v21 }
 0x15b   :  { %2398 = vpow2.f32 %v2052_v22 }
 0x15c   :  { %2400 = vpow2.f32 %v2050_v63  ;;  %v3157_v26 = vpop.f32.mrb[36].mxu0  ;;  %v2157_v29 = vpop.f32.mrb[36].mxu1 }
 0x15d   :  { %v1219_v33 = vadd.f32 %v2157_v29, %v930_v25  ;;  %v979_v34 = vpop.f32.mrb[37].mxu0  ;;  %v1210_v37 = vpop.f32.mrb[37].mxu1 }
 0x15e   :  { %v1211_v41 = vadd.f32 %v1210_v37, %v922_v55  ;;  %v3163_v42 = vpop.f32.mrb[38].mxu0  ;;  %v2158_v11 = vpop.f32.mrb[38].mxu1 }
 0x15f   :  { %v2055_v45 = vmul.f32 -1.442695, %v1219_v33  ;;  %v1222_v46 = vadd.f32 %v2158_v11, %v933_v30  ;;  %v982_v3 = vpop.f32.mrb[39].mxu0  ;;  %v1213_v49 = vpop.f32.mrb[39].mxu1 }
 0x160   :  { %v2053_v50 = vmul.f32 -1.442695, %v1211_v41  ;;  %v1214_v54 = vadd.f32 %v1213_v49, %v925_v38  ;;  %v962_v41 = vadd.f32 %v3141_v53, %v3130_v43 }
 0x161   :  { %2402 = vpow2.f32 %v2055_v45  ;;  %v2056_v57 = vmul.f32 -1.442695, %v1222_v46  ;;  %v954_v45 = vadd.f32 %v3141_v53, %v3122_v35 }
 0x162   :  { %2404 = vpow2.f32 %v2053_v50  ;;  %v2054_v15 = vmul.f32 -1.442695, %v1214_v54  ;;  %v957_v54 = vadd.f32 %v3141_v53, %v3126_v39 }
 0x163   :  { %v2395_v61 = vpop.eup %2394  ;;  %2406 = vpow2.f32 %v2056_v57 }
 0x164   :  { %v2397_v7 = vpop.eup %2396  ;;  %v1643_v2 = vadd.f32 1.0, %v2395_v61  ;;  %2408 = vpow2.f32 %v2054_v15  ;;  %v3169_v5 = vpop.f32.mrb[40].mxu0 }
 0x165   :  { %v2161_v6 = vpop.f32.mrb[40].mxu1  ;;  %v2399_v9 = vpop.eup %2398  ;;  %v1641_v14 = vadd.f32 1.0, %v2397_v7  ;;  %v965_v7 = vadd.f32 %v3141_v53, %v3134_v47 }
 0x166   :  { %v1235_v59 = vadd.f32 %v2161_v6, %v946_v62  ;;  %v987_v17 = vpop.f32.mrb[41].mxu0  ;;  %v1226_v18 = vpop.f32.mrb[41].mxu1  ;;  %2410 = vrcp.f32 %v1643_v2  ;;  %v1644_v21 = vadd.f32 1.0, %v2399_v9 }
 0x167   :  { %v2401_v51 = vpop.eup %2400  ;;  %v1227_v19 = vadd.f32 %v1226_v18, %v938_v1  ;;  %v3175_v22 = vpop.f32.mrb[42].mxu0  ;;  %2412 = vrcp.f32 %v1641_v14 }
 0x168   :  { %v2162_v63 = vpop.f32.mrb[42].mxu1  ;;  %v1642_v25 = vadd.f32 1.0, %v2401_v51  ;;  %v2059_v55 = vmul.f32 -1.442695, %v1235_v59  ;;  %v990_v29 = vpop.f32.mrb[43].mxu0  ;;  %2414 = vrcp.f32 %v1644_v21 }
 0x169   :  { %v1229_v30 = vpop.f32.mrb[43].mxu1  ;;  %v2057_v23 = vmul.f32 -1.442695, %v1227_v19  ;;  %v1238_v33 = vadd.f32 %v2162_v63, %v949_v27  ;;  %v970_v29 = vadd.f32 %v3141_v53, %v3146_v58 }
 0x16a   :  { %v1230_v34 = vadd.f32 %v1229_v30, %v941_v13  ;;  %2416 = vrcp.f32 %v1642_v25  ;;  %v978_v25 = vadd.f32 %v3141_v53, %v3157_v26 }
 0x16b   :  { %2418 = vpow2.f32 %v2059_v55  ;;  %v2060_v37 = vmul.f32 -1.442695, %v1238_v33  ;;  %v2403_v31 = vpop.eup %2402 }
 0x16c   :  { %v2058_v38 = vmul.f32 -1.442695, %v1230_v34  ;;  %2420 = vpow2.f32 %v2057_v23  ;;  %v2405_v11 = vpop.eup %2404  ;;  %v1647_v46 = vadd.f32 1.0, %v2403_v31  ;;  %v3181_v3 = vpop.f32.mrb[44].mxu0 }
 0x16d   :  { %2422 = vpow2.f32 %v2060_v37  ;;  %v2165_v49 = vpop.f32.mrb[44].mxu1  ;;  %v2407_v50 = vpop.eup %2406  ;;  %v1645_v57 = vadd.f32 1.0, %v2405_v11 }
 0x16e   :  { %2424 = vpow2.f32 %v2058_v38  ;;  %v1251_v15 = vadd.f32 %v2165_v49, %v962_v41  ;;  %v995_v61 = vpop.f32.mrb[45].mxu0  ;;  %v1242_v43 = vpop.f32.mrb[45].mxu1  ;;  %v1648_v35 = vadd.f32 1.0, %v2407_v50  ;;  %v981_v41 = vadd.f32 %v3141_v53, %v3163_v42 }
 0x16f   :  { %v2409_v62 = vpop.eup %2408  ;;  %2426 = vrcp.f32 %v1647_v46  ;;  %v1243_v1 = vadd.f32 %v1242_v43, %v954_v45  ;;  %v3187_v2 = vpop.f32.mrb[46].mxu0  ;;  %v973_v50 = vadd.f32 %v3141_v53, %v3151_v10 }
 0x170   :  { %v2166_v6 = vpop.f32.mrb[46].mxu1  ;;  %2428 = vrcp.f32 %v1645_v57  ;;  %v1646_v9 = vadd.f32 1.0, %v2409_v62  ;;  %v2063_v13 = vmul.f32 -1.442695, %v1251_v15  ;;  %v998_v14 = vpop.f32.mrb[47].mxu0 }
 0x171   :  { %v1245_v39 = vpop.f32.mrb[47].mxu1  ;;  %v2411_v59 = vpop.eup %2410  ;;  %2430 = vrcp.f32 %v1648_v35  ;;  %v2061_v17 = vmul.f32 -1.442695, %v1243_v1  ;;  %v1254_v18 = vadd.f32 %v2166_v6, %v965_v7 }
 0x172   :  { %v1246_v51 = vadd.f32 %v1245_v39, %v957_v54  ;;  %v2413_v27 = vpop.eup %2412  ;;  %1836 = vst.msk [vmem:[%s3567_s3 + $0x10] sm:$0xff] %vm1833_vm1, %v2411_v59  ;;  %2432 = vrcp.f32 %v1646_v9  ;;  %v986_v59 = vadd.f32 %v3141_v53, %v3169_v5  ;;  %v989_v5 = vadd.f32 %v3141_v53, %v3175_v22 }
 0x173   :  { %v2415_v47 = vpop.eup %2414  ;;  %1834 = vst.msk [vmem:[%s3567_s3] sm:$0xff] %vm1833_vm1, %v2413_v27  ;;  %2434 = vpow2.f32 %v2063_v13  ;;  %v2064_v21 = vmul.f32 -1.442695, %v1254_v18  ;;  %v994_v13 = vadd.f32 %v3141_v53, %v3181_v3 }
 0x174   :  { %v2062_v19 = vmul.f32 -1.442695, %v1246_v51  ;;  %v2417_v63 = vpop.eup %2416  ;;  %1837 = vst.msk [vmem:[%s3567_s3 + $0x18] sm:$0xff] %vm1833_vm1, %v2415_v47  ;;  %2436 = vpow2.f32 %v2061_v17  ;;  %v3209_v30 = vpop.f32.mrb[48].mxu0 }
 0x175   :  { %v2419_v55 = vpop.eup %2418  ;;  %1835 = vst.msk [vmem:[%s3567_s3 + $0x8] sm:$0xff] %vm1833_vm1, %v2417_v63  ;;  %2438 = vpow2.f32 %v2064_v21  ;;  %v2169_v23 = vpop.f32.mrb[48].mxu1 }
 0x176   :  { %v2421_v33 = vpop.eup %2420  ;;  %v1651_v34 = vadd.f32 1.0, %v2419_v55  ;;  %2440 = vpow2.f32 %v2062_v19  ;;  %v1267_v37 = vadd.f32 %v2169_v23, %v978_v25  ;;  %v1003_v38 = vpop.f32.mrb[49].mxu0  ;;  %v997_v25 = vadd.f32 %v3141_v53, %v3187_v2 }
 0x177   :  { %v1258_v26 = vpop.f32.mrb[49].mxu1  ;;  %v2423_v31 = vpop.eup %2422  ;;  %v1649_v58 = vadd.f32 1.0, %v2421_v33 }
 0x178   :  { %v1259_v11 = vadd.f32 %v1258_v26, %v970_v29  ;;  %v3213_v45 = vpop.f32.mrb[50].mxu0  ;;  %v2170_v46 = vpop.f32.mrb[50].mxu1  ;;  %2442 = vrcp.f32 %v1651_v34  ;;  %v1652_v54 = vadd.f32 1.0, %v2423_v31  ;;  %v2067_v57 = vmul.f32 -1.442695, %v1267_v37 }
 0x179   :  { %v2425_v49 = vpop.eup %2424  ;;  %v1006_v15 = vpop.f32.mrb[51].mxu0  ;;  %2444 = vrcp.f32 %v1649_v58  ;;  %v1270_v35 = vadd.f32 %v2170_v46, %v981_v41 }
 0x17a   :  { %v1261_v61 = vpop.f32.mrb[51].mxu1  ;;  %v2427_v43 = vpop.eup %2426  ;;  %v1650_v62 = vadd.f32 1.0, %v2425_v49  ;;  %v2065_v7 = vmul.f32 -1.442695, %v1259_v11  ;;  %2446 = vrcp.f32 %v1652_v54  ;;  %v1002_v15 = vadd.f32 %v3141_v53, %v3209_v30 }
 0x17b   :  { %v2429_v42 = vpop.eup %2428  ;;  %1840 = vst.msk [vmem:[%s3567_s3 + $0x30] sm:$0xff] %vm1833_vm1, %v2427_v43  ;;  %v1262_v1 = vadd.f32 %v1261_v61, %v973_v50  ;;  %v2068_v10 = vmul.f32 -1.442695, %v1270_v35  ;;  %v1005_v30 = vadd.f32 %v3141_v53, %v3213_v45 }
 0x17c   :  { %v2431_v6 = vpop.eup %2430  ;;  %1838 = vst.msk [vmem:[%s3567_s3 + $0x20] sm:$0xff] %vm1833_vm1, %v2429_v42  ;;  %2448 = vrcp.f32 %v1650_v62  ;;  %v1009_v17 = vpop.f32.mrb[52].mxu0 }
 0x17d   :  { %v2433_v9 = vpop.eup %2432  ;;  %1841 = vst.msk [vmem:[%s3567_s3 + $0x38] sm:$0xff] %vm1833_vm1, %v2431_v6  ;;  %2450 = vpow2.f32 %v2067_v57  ;;  %v2066_v14 = vmul.f32 -1.442695, %v1262_v1  ;;  %v2173_v18 = vpop.f32.mrb[52].mxu1  ;;  %v1010_v50 = vadd.f32 %v3141_v53, %v1009_v17 }
 0x17e   :  { %v2435_v39 = vpop.eup %2434  ;;  %1839 = vst.msk [vmem:[%s3567_s3 + $0x28] sm:$0xff] %vm1833_vm1, %v2433_v9  ;;  %2452 = vpow2.f32 %v2065_v7  ;;  %v1283_v47 = vadd.f32 %v2173_v18, %v994_v13  ;;  %v1011_v21 = vpop.f32.mrb[53].mxu0 }
 0x17f   :  { %v2437_v51 = vpop.eup %2436  ;;  %v1655_v27 = vadd.f32 1.0, %v2435_v39  ;;  %2454 = vpow2.f32 %v2068_v10  ;;  %v1274_v3 = vpop.f32.mrb[53].mxu1 }
 0x180   :  { %v2439_v19 = vpop.eup %2438  ;;  %v1653_v63 = vadd.f32 1.0, %v2437_v51  ;;  %2456 = vpow2.f32 %v2066_v14  ;;  %v1275_v55 = vadd.f32 %v1274_v3, %v986_v59  ;;  %v1012_v29 = vpop.f32.mrb[54].mxu0  ;;  %v2071_v37 = vmul.f32 -1.442695, %v1283_v47 }
 0x181   :  { %v2174_v23 = vpop.f32.mrb[54].mxu1  ;;  %v2441_v33 = vpop.eup %2440  ;;  %2458 = vrcp.f32 %v1655_v27  ;;  %v1656_v34 = vadd.f32 1.0, %v2439_v19  ;;  %v1013_v7 = vadd.f32 %v3141_v53, %v1012_v29 }
 0x182   :  { %v1014_v38 = vpop.f32.mrb[55].mxu0  ;;  %v1277_v26 = vpop.f32.mrb[55].mxu1  ;;  %2460 = vrcp.f32 %v1653_v63  ;;  %v1654_v31 = vadd.f32 1.0, %v2441_v33  ;;  %v2069_v41 = vmul.f32 -1.442695, %v1275_v55  ;;  %v1286_v58 = vadd.f32 %v2174_v23, %v997_v25 }
 0x183   :  { %v2443_v11 = vpop.eup %2442  ;;  %2462 = vrcp.f32 %v1656_v34  ;;  %v1278_v2 = vadd.f32 %v1277_v26, %v989_v5 }
 0x184   :  { %v2445_v46 = vpop.eup %2444  ;;  %1844 = vst.msk [vmem:[%s3567_s3 + $0x50] sm:$0xff] %vm1833_vm1, %v2443_v11  ;;  %2464 = vrcp.f32 %v1654_v31  ;;  %v2072_v22 = vmul.f32 -1.442695, %v1286_v58  ;;  %v1017_v61 = vpop.f32.mrb[56].mxu0 }
 0x185   :  { %v2447_v49 = vpop.eup %2446  ;;  %1842 = vst.msk [vmem:[%s3567_s3 + $0x40] sm:$0xff] %vm1833_vm1, %v2445_v46  ;;  %2466 = vpow2.f32 %v2071_v37  ;;  %v2070_v54 = vmul.f32 -1.442695, %v1278_v2  ;;  %v2177_v43 = vpop.f32.mrb[56].mxu1  ;;  %v1018_v5 = vadd.f32 %v3141_v53, %v1017_v61 }
 0x186   :  { %v2449_v57 = vpop.eup %2448  ;;  %1845 = vst.msk [vmem:[%s3567_s3 + $0x58] sm:$0xff] %vm1833_vm1, %v2447_v49  ;;  %2468 = vpow2.f32 %v2069_v41  ;;  %v1299_v35 = vadd.f32 %v2177_v43, %v1010_v50  ;;  %v1019_v42 = vpop.f32.mrb[57].mxu0 }
 0x187   :  { %v2451_v62 = vpop.eup %2450  ;;  %1843 = vst.msk [vmem:[%s3567_s3 + $0x48] sm:$0xff] %vm1833_vm1, %v2449_v57  ;;  %2470 = vpow2.f32 %v2072_v22  ;;  %v1290_v1 = vpop.f32.mrb[57].mxu1 }
 0x188   :  { %v2453_v6 = vpop.eup %2452  ;;  %v1659_v10 = vadd.f32 1.0, %v2451_v62  ;;  %2472 = vpow2.f32 %v2070_v54  ;;  %v1291_v9 = vadd.f32 %v1290_v1, %v1002_v15  ;;  %v1020_v13 = vpop.f32.mrb[58].mxu0  ;;  %v2075_v21 = vmul.f32 -1.442695, %v1299_v35 }
 0x189   :  { %v2178_v14 = vpop.f32.mrb[58].mxu1  ;;  %v2455_v39 = vpop.eup %2454  ;;  %v1657_v59 = vadd.f32 1.0, %v2453_v6  ;;  %v1021_v2 = vadd.f32 %v3141_v53, %v1020_v13 }
 0x18a   :  { %v1302_v17 = vadd.f32 %v2178_v14, %v1013_v7  ;;  %v1022_v18 = vpop.f32.mrb[59].mxu0  ;;  %v1293_v51 = vpop.f32.mrb[59].mxu1  ;;  %2474 = vrcp.f32 %v1659_v10  ;;  %v1660_v47 = vadd.f32 1.0, %v2455_v39  ;;  %v2073_v25 = vmul.f32 -1.442695, %v1291_v9 }
 0x18b   :  { %v2457_v27 = vpop.eup %2456  ;;  %v1294_v3 = vadd.f32 %v1293_v51, %v1005_v30  ;;  %2476 = vrcp.f32 %v1657_v59 }
 0x18c   :  { %v2459_v19 = vpop.eup %2458  ;;  %v1658_v63 = vadd.f32 1.0, %v2457_v27  ;;  %2478 = vrcp.f32 %v1660_v47  ;;  %v2076_v45 = vmul.f32 -1.442695, %v1302_v17  ;;  %v1025_v34 = vpop.f32.mrb[60].mxu0 }
 0x18d   :  { %v2461_v55 = vpop.eup %2460  ;;  %1848 = vst.msk [vmem:[%s3567_s3 + $0x70] sm:$0xff] %vm1833_vm1, %v2459_v19  ;;  %v2074_v23 = vmul.f32 -1.442695, %v1294_v3  ;;  %v2181_v37 = vpop.f32.mrb[60].mxu1  ;;  %v1026_v26 = vadd.f32 %v3141_v53, %v1025_v34 }
 0x18e   :  { %v2463_v29 = vpop.eup %2462  ;;  %1846 = vst.msk [vmem:[%s3567_s3 + $0x60] sm:$0xff] %vm1833_vm1, %v2461_v55  ;;  %2480 = vrcp.f32 %v1658_v63  ;;  %v1027_v31 = vpop.f32.mrb[61].mxu0 }
 0x18f   :  { %v2465_v33 = vpop.eup %2464  ;;  %1849 = vst.msk [vmem:[%s3567_s3 + $0x78] sm:$0xff] %vm1833_vm1, %v2463_v29  ;;  %2482 = vpow2.f32 %v2075_v21  ;;  %v1306_v41 = vpop.f32.mrb[61].mxu1  ;;  %v1315_v57 = vadd.f32 %v2181_v37, %v1026_v26 }
 0x190   :  { %v2467_v38 = vpop.eup %2466  ;;  %1847 = vst.msk [vmem:[%s3567_s3 + $0x68] sm:$0xff] %vm1833_vm1, %v2465_v33  ;;  %2484 = vpow2.f32 %v2073_v25  ;;  %v1307_v46 = vadd.f32 %v1306_v41, %v1018_v5  ;;  %v1028_v22 = vpop.f32.mrb[62].mxu0 }
 0x191   :  { %v2469_v58 = vpop.eup %2468  ;;  %v1663_v11 = vadd.f32 1.0, %v2467_v38  ;;  %2486 = vpow2.f32 %v2076_v45  ;;  %v2182_v49 = vpop.f32.mrb[62].mxu1  ;;  %v1029_v15 = vadd.f32 %v3141_v53, %v1028_v22  ;;  %v2079_v6 = vmul.f32 -1.442695, %v1315_v57 }
 0x192   :  { %v2471_v50 = vpop.eup %2470  ;;  %v1661_v54 = vadd.f32 1.0, %v2469_v58  ;;  %2488 = vpow2.f32 %v2074_v23  ;;  %v1030_v61 = vpop.f32.mrb[63].mxu0  ;;  %v2077_v35 = vmul.f32 -1.442695, %v1307_v46 }
 0x193   :  { %v1309_v43 = vpop.f32.mrb[63].mxu1  ;;  %v2473_v62 = vpop.eup %2472  ;;  %2490 = vrcp.f32 %v1663_v11  ;;  %v1664_v7 = vadd.f32 1.0, %v2471_v50  ;;  %v1318_v10 = vadd.f32 %v2182_v49, %v1029_v15 }
 0x194   :  { %v1310_v42 = vadd.f32 %v1309_v43, %v1021_v2  ;;  %2492 = vrcp.f32 %v1661_v54  ;;  %v1662_v1 = vadd.f32 1.0, %v2473_v62  ;;  %v2475_v30 = vpop.eup %2474  ;;  %v1033_v59 = vpop.f32.mrb[64].mxu0 }
 0x195   :  { %2494 = vrcp.f32 %v1664_v7  ;;  %v2477_v9 = vpop.eup %2476  ;;  %1852 = vst.msk [vmem:[%s3567_s3 + $0x90] sm:$0xff] %vm1833_vm1, %v2475_v30  ;;  %v2080_v13 = vmul.f32 -1.442695, %v1318_v10  ;;  %v2185_v17 = vpop.f32.mrb[64].mxu1  ;;  %v1034_v51 = vadd.f32 %v3141_v53, %v1033_v59 }
 0x196   :  { %2496 = vrcp.f32 %v1662_v1  ;;  %v2078_v14 = vmul.f32 -1.442695, %v1310_v42  ;;  %v2479_v39 = vpop.eup %2478  ;;  %1850 = vst.msk [vmem:[%s3567_s3 + $0x80] sm:$0xff] %vm1833_vm1, %v2477_v9  ;;  %v1035_v27 = vpop.f32.mrb[65].mxu0 }
 0x197   :  { %2498 = vpow2.f32 %v2079_v6  ;;  %1853 = vst.msk [vmem:[%s3567_s3 + $0x98] sm:$0xff] %vm1833_vm1, %v2479_v39  ;;  %v1322_v47 = vpop.f32.mrb[65].mxu1  ;;  %v1036_v3 = vpop.f32.mrb[66].mxu0 }
 0x198   :  { %v2481_v18 = vpop.eup %2480  ;;  %2500 = vpow2.f32 %v2077_v35  ;;  %v2186_v19 = vpop.f32.mrb[66].mxu1  ;;  %v1323_v55 = vadd.f32 %v1322_v47, %v1034_v51  ;;  %v1037_v45 = vadd.f32 %v3141_v53, %v1036_v3 }
 0x199   :  { %v2483_v21 = vpop.eup %2482  ;;  %1851 = vst.msk [vmem:[%s3567_s3 + $0x88] sm:$0xff] %vm1833_vm1, %v2481_v18  ;;  %2502 = vpow2.f32 %v2080_v13  ;;  %v1038_v29 = vpop.f32.mrb[67].mxu0 }
 0x19a   :  { %v2485_v63 = vpop.eup %2484  ;;  %v1667_v25 = vadd.f32 1.0, %v2483_v21  ;;  %2504 = vpow2.f32 %v2078_v14  ;;  %v1325_v23 = vpop.f32.mrb[67].mxu1  ;;  %v2081_v38 = vmul.f32 -1.442695, %v1323_v55 }
 0x19b   :  { %v2487_v33 = vpop.eup %2486  ;;  %v1665_v5 = vadd.f32 1.0, %v2485_v63  ;;  %v1326_v26 = vadd.f32 %v1325_v23, %v1037_v45 }
 0x19c   :  { %v2489_v34 = vpop.eup %2488  ;;  %2506 = vrcp.f32 %v1667_v25  ;;  %v1668_v37 = vadd.f32 1.0, %v2487_v33  ;;  %v1041_v46 = vpop.f32.mrb[68].mxu0 }
 0x19d   :  { %v2491_v31 = vpop.eup %2490  ;;  %2508 = vrcp.f32 %v1665_v5  ;;  %v1666_v41 = vadd.f32 1.0, %v2489_v34  ;;  %v2082_v11 = vmul.f32 -1.442695, %v1326_v26  ;;  %v3309_v22 = vpop.f32.mrb[68].mxu1  ;;  %v1042_v50 = vadd.f32 %v3141_v53, %v1041_v46 }
 0x19e   :  { %v2493_v58 = vpop.eup %2492  ;;  %1856 = vst.msk [vmem:[%s3567_s3 + $0xb0] sm:$0xff] %vm1833_vm1, %v2491_v31  ;;  %2510 = vrcp.f32 %v1668_v37  ;;  %v1043_v54 = vpop.f32.mrb[69].mxu0 }
 0x19f   :  { %v2495_v2 = vpop.eup %2494  ;;  %1854 = vst.msk [vmem:[%s3567_s3 + $0xa0] sm:$0xff] %vm1833_vm1, %v2493_v58  ;;  %2512 = vrcp.f32 %v1666_v41  ;;  %v1338_v57 = vpop.f32.mrb[69].mxu1  ;;  %v1331_v35 = vadd.f32 %v2185_v17, %v1042_v50 }
 0x1a0   :  { %v2497_v49 = vpop.eup %2496  ;;  %1857 = vst.msk [vmem:[%s3567_s3 + $0xb8] sm:$0xff] %vm1833_vm1, %v2495_v2  ;;  %2514 = vpow2.f32 %v2081_v38  ;;  %v1044_v61 = vpop.f32.mrb[70].mxu0 }
 0x1a1   :  { %v2499_v15 = vpop.eup %2498  ;;  %1855 = vst.msk [vmem:[%s3567_s3 + $0xa8] sm:$0xff] %vm1833_vm1, %v2497_v49  ;;  %2516 = vpow2.f32 %v2082_v11  ;;  %v3320_v43 = vpop.f32.mrb[70].mxu1  ;;  %v1045_v42 = vadd.f32 %v3141_v53, %v1044_v61  ;;  %v2083_v14 = vmul.f32 -1.442695, %v1331_v35 }
 0x1a2   :  { %v2501_v62 = vpop.eup %2500  ;;  %v1671_v7 = vadd.f32 1.0, %v2499_v15  ;;  %v1046_v1 = vpop.f32.mrb[71].mxu0 }
 0x1a3   :  { %v1341_v6 = vpop.f32.mrb[71].mxu1  ;;  %v2503_v10 = vpop.eup %2502  ;;  %v1669_v30 = vadd.f32 1.0, %v2501_v62  ;;  %v1334_v39 = vadd.f32 %v2186_v19, %v1045_v42 }
 0x1a4   :  { %v2505_v9 = vpop.eup %2504  ;;  %2518 = vrcp.f32 %v1671_v7  ;;  %v1672_v13 = vadd.f32 1.0, %v2503_v10  ;;  %v1049_v17 = vpop.f32.mrb[72].mxu0 }
 0x1a5   :  { %2520 = vrcp.f32 %v1669_v30  ;;  %v1670_v59 = vadd.f32 1.0, %v2505_v9  ;;  %v2084_v51 = vmul.f32 -1.442695, %v1334_v39  ;;  %v3327_v47 = vpop.f32.mrb[72].mxu1  ;;  %v1050_v3 = vadd.f32 %v3141_v53, %v1049_v17  ;;  %v1051_v19 = vpop.f32.mrb[73].mxu0 }
 0x1a6   :  { %v2507_v18 = vpop.eup %2506  ;;  %2522 = vrcp.f32 %v1672_v13  ;;  %v3334_v63 = vpop.f32.mrb[73].mxu1 }
 0x1a7   :  { %v2509_v27 = vpop.eup %2508  ;;  %1860 = vst.msk [vmem:[%s3567_s3 + $0xd0] sm:$0xff] %vm1833_vm1, %v2507_v18  ;;  %2524 = vrcp.f32 %v1670_v59  ;;  %v1052_v55 = vpop.f32.mrb[74].mxu0  ;;  %v1339_v23 = vadd.f32 %v1338_v57, %v1050_v3  ;;  %v1106_v59 = vadd.f32 %v3141_v53, %v3086_v60 }
 0x1a8   :  { %v2511_v21 = vpop.eup %2510  ;;  %1858 = vst.msk [vmem:[%s3567_s3 + $0xc0] sm:$0xff] %vm1833_vm1, %v2509_v27  ;;  %2526 = vpow2.f32 %v2083_v14  ;;  %v3340_v45 = vpop.f32.mrb[74].mxu1  ;;  %v1053_v33 = vadd.f32 %v3141_v53, %v1052_v55  ;;  %v1101_v55 = vadd.f32 %v3141_v53, %v3084_v56 }
 0x1a9   :  { %v2513_v25 = vpop.eup %2512  ;;  %1861 = vst.msk [vmem:[%s3567_s3 + $0xd8] sm:$0xff] %vm1833_vm1, %v2511_v21  ;;  %2528 = vpow2.f32 %v2084_v51  ;;  %v1054_v5 = vpop.f32.mrb[75].mxu0  ;;  %v2085_v31 = vmul.f32 -1.442695, %v1339_v23 }
 0x1aa   :  { %v2515_v29 = vpop.eup %2514  ;;  %1859 = vst.msk [vmem:[%s3567_s3 + $0xc8] sm:$0xff] %vm1833_vm1, %v2513_v25  ;;  %v3347_v34 = vpop.f32.mrb[75].mxu1  ;;  %v1342_v41 = vadd.f32 %v1341_v6, %v1053_v33 }
 0x1ab   :  { %v2517_v37 = vpop.eup %2516  ;;  %v1673_v38 = vadd.f32 1.0, %v2515_v29 }
 0x1ac   :  { %v1674_v26 = vadd.f32 1.0, %v2517_v37  ;;  %v2086_v11 = vmul.f32 -1.442695, %v1342_v41  ;;  %v1057_v46 = vpop.f32.mrb[76].mxu0  ;;  %v3353_v49 = vpop.f32.mrb[76].mxu1 }
 0x1ad   :  { %2530 = vrcp.f32 %v1673_v38  ;;  %v1058_v54 = vadd.f32 %v3141_v53, %v1057_v46  ;;  %v1059_v57 = vpop.f32.mrb[77].mxu0  ;;  %v3360_v15 = vpop.f32.mrb[77].mxu1 }
 0x1ae   :  { %v2519_v58 = vpop.eup %2518  ;;  %2532 = vrcp.f32 %v1674_v26  ;;  %v1060_v62 = vpop.f32.mrb[78].mxu0 }
 0x1af   :  { %v2521_v2 = vpop.eup %2520  ;;  %1864 = vst.msk [vmem:[%s3567_s3 + $0xf0] sm:$0xff] %vm1833_vm1, %v2519_v58  ;;  %2534 = vpow2.f32 %v2085_v31  ;;  %v3366_v7 = vpop.f32.mrb[78].mxu1  ;;  %v1347_v42 = vadd.f32 %v3309_v22, %v1058_v54  ;;  %v1061_v1 = vadd.f32 %v3141_v53, %v1060_v62  ;;  %v1098_v22 = vadd.f32 %v3141_v53, %v3080_v52 }
 0x1b0   :  { %v2523_v50 = vpop.eup %2522  ;;  %1862 = vst.msk [vmem:[%s3567_s3 + $0xe0] sm:$0xff] %vm1833_vm1, %v2521_v2  ;;  %2536 = vpow2.f32 %v2086_v11  ;;  %v1062_v6 = vpop.f32.mrb[79].mxu0  ;;  %v1109_v52 = vadd.f32 %v3141_v53, %v3088_v0  ;;  %v1122_v54 = vadd.f32 %v3141_v53, %v3100_v12  ;;  %v1114_v62 = vadd.f32 %v3141_v53, %v3092_v4 }
 0x1b1   :  { %v2525_v61 = vpop.eup %2524  ;;  %1865 = vst.msk [vmem:[%s3567_s3 + $0xf8] sm:$0xff] %vm1833_vm1, %v2523_v50  ;;  %v3374_v10 = vpop.f32.mrb[79].mxu1  ;;  %v2087_v14 = vmul.f32 -1.442695, %v1347_v42  ;;  %v1350_v39 = vadd.f32 %v3320_v43, %v1061_v1  ;;  %v1117_v4 = vadd.f32 %v3141_v53, %v3096_v8 }
 0x1b2   :  { %v2527_v35 = vpop.eup %2526  ;;  %1863 = vst.msk [vmem:[%s3567_s3 + $0xe8] sm:$0xff] %vm1833_vm1, %v2525_v61 }
 0x1b3   :  { %v2529_v30 = vpop.eup %2528  ;;  %v1675_v9 = vadd.f32 1.0, %v2527_v35  ;;  %v2088_v18 = vmul.f32 -1.442695, %v1350_v39 }
 0x1b4   :  { %v1676_v13 = vadd.f32 1.0, %v2529_v30  ;;  %v1065_v27 = vpop.f32.mrb[80].mxu0  ;;  %v2201_v17 = vpop.f32.mrb[80].mxu1 }
 0x1b5   :  { %2538 = vrcp.f32 %v1675_v9  ;;  %v1066_v43 = vadd.f32 %v3141_v53, %v1065_v27  ;;  %v1395_v3 = vadd.f32 %v2201_v17, %v1106_v59  ;;  %v1067_v60 = vpop.f32.mrb[81].mxu0  ;;  %v1386_v19 = vpop.f32.mrb[81].mxu1 }
 0x1b6   :  { %2540 = vrcp.f32 %v1676_v13  ;;  %v1387_v29 = vadd.f32 %v1386_v19, %v1098_v22  ;;  %v1068_v23 = vpop.f32.mrb[82].mxu0  ;;  %v2202_v33 = vpop.f32.mrb[82].mxu1 }
 0x1b7   :  { %v2531_v51 = vpop.eup %2530  ;;  %2542 = vpow2.f32 %v2087_v14  ;;  %v1355_v38 = vadd.f32 %v3334_v63, %v1066_v43  ;;  %v1069_v26 = vadd.f32 %v3141_v53, %v1068_v23  ;;  %v1070_v31 = vpop.f32.mrb[83].mxu0  ;;  %v2099_v58 = vmul.f32 -1.442695, %v1395_v3 }
 0x1b8   :  { %v2533_v21 = vpop.eup %2532  ;;  %1866 = vst.msk [vmem:[%s3567_s3 + $0x100] sm:$0xff] %vm1833_vm1, %v2531_v51  ;;  %2544 = vpow2.f32 %v2088_v18  ;;  %v1389_v41 = vpop.f32.mrb[83].mxu1  ;;  %v1398_v11 = vadd.f32 %v2202_v33, %v1109_v52  ;;  %v2097_v46 = vmul.f32 -1.442695, %v1387_v29  ;;  %v1125_v14 = vadd.f32 %v3141_v53, %v3104_v16 }
 0x1b9   :  { %v2535_v25 = vpop.eup %2534  ;;  %1867 = vst.msk [vmem:[%s3567_s3 + $0x108] sm:$0xff] %vm1833_vm1, %v2533_v21  ;;  %v1390_v0 = vadd.f32 %v1389_v41, %v1101_v55  ;;  %v2089_v2 = vmul.f32 -1.442695, %v1355_v38  ;;  %v1358_v50 = vadd.f32 %v3347_v34, %v1069_v26  ;;  %v1138_v29 = vadd.f32 %v3141_v53, %v3116_v28 }
 0x1ba   :  { %v2537_v5 = vpop.eup %2536  ;;  %v1677_v37 = vadd.f32 1.0, %v2535_v25  ;;  %v2100_v63 = vmul.f32 -1.442695, %v1398_v11  ;;  %v1130_v33 = vadd.f32 %v3141_v53, %v3108_v20  ;;  %v3432_v20 = vld [vmem:[%s3566_s2] ss:$0 sm:$0xff] }
 0x1bb   :  { %v1678_v56 = vadd.f32 1.0, %v2537_v5  ;;  %v2090_v57 = vmul.f32 -1.442695, %v1358_v50  ;;  %v2098_v35 = vmul.f32 -1.442695, %v1390_v0 }
 0x1bc   :  { %2546 = vrcp.f32 %v1677_v37  ;;  %v1073_v42 = vpop.f32.mrb[84].mxu0  ;;  %v2205_v1 = vpop.f32.mrb[84].mxu1 }
 0x1bd   :  { %2548 = vrcp.f32 %v1678_v56  ;;  %v1074_v12 = vadd.f32 %v3141_v53, %v1073_v42  ;;  %v1411_v34 = vadd.f32 %v2205_v1, %v1122_v54  ;;  %v1075_v30 = vpop.f32.mrb[85].mxu0  ;;  %v1402_v9 = vpop.f32.mrb[85].mxu1 }
 0x1be   :  { %2550 = vpow2.f32 %v2089_v2  ;;  %v1403_v39 = vadd.f32 %v1402_v9, %v1114_v62  ;;  %v1076_v59 = vpop.f32.mrb[86].mxu0  ;;  %v2206_v18 = vpop.f32.mrb[86].mxu1  ;;  %v1133_v62 = vadd.f32 %v3432_v20, %v3112_v24 }
 0x1bf   :  { %v2539_v61 = vpop.eup %2538  ;;  %2552 = vpow2.f32 %v2099_v58  ;;  %v1363_v27 = vadd.f32 %v3327_v47, %v1074_v12  ;;  %v2103_v17 = vmul.f32 -1.442695, %v1411_v34  ;;  %v1078_v21 = vpop.f32.mrb[87].mxu0  ;;  %v1077_v3 = vadd.f32 %v3141_v53, %v1076_v59 }
 0x1c0   :  { %v2541_v6 = vpop.eup %2540  ;;  %1868 = vst.msk [vmem:[%s3567_s3 + $0x110] sm:$0xff] %vm1833_vm1, %v2539_v61  ;;  %2554 = vpow2.f32 %v2097_v46  ;;  %v1405_v8 = vpop.f32.mrb[87].mxu1  ;;  %v2101_v16 = vmul.f32 -1.442695, %v1403_v39  ;;  %v1414_v19 = vadd.f32 %v2206_v18, %v1125_v14  ;;  %v1141_v46 = vadd.f32 %v3432_v20, %v3120_v32 }
 0x1c1   :  { %v2543_v13 = vpop.eup %2542  ;;  %1869 = vst.msk [vmem:[%s3567_s3 + $0x118] sm:$0xff] %vm1833_vm1, %v2541_v6  ;;  %2556 = vpow2.f32 %v2090_v57  ;;  %v2091_v60 = vmul.f32 -1.442695, %v1363_v27  ;;  %v1406_v25 = vadd.f32 %v1405_v8, %v1117_v4  ;;  %v1366_v55 = vadd.f32 %v3340_v45, %v1077_v3 }
 0x1c2   :  { %v2545_v51 = vpop.eup %2544  ;;  %v1679_v22 = vadd.f32 1.0, %v2543_v13  ;;  %2558 = vpow2.f32 %v2100_v63  ;;  %v2104_v47 = vmul.f32 -1.442695, %v1414_v19  ;;  %v1154_v4 = vadd.f32 %v3432_v20, %v3132_v44 }
 0x1c3   :  { %v1680_v43 = vadd.f32 1.0, %v2545_v51  ;;  %2560 = vpow2.f32 %v2098_v35  ;;  %v2092_v5 = vmul.f32 -1.442695, %v1366_v55  ;;  %v2102_v12 = vmul.f32 -1.442695, %v1406_v25 }
 0x1c4   :  { %2562 = vrcp.f32 %v1679_v22  ;;  %v1081_v37 = vpop.f32.mrb[88].mxu0  ;;  %v2209_v38 = vpop.f32.mrb[88].mxu1  ;;  %v1146_v59 = vadd.f32 %v3432_v20, %v3124_v36  ;;  %v1149_v21 = vadd.f32 %v3432_v20, %v3128_v40  ;;  %v1157_v19 = vadd.f32 %v3432_v20, %v3136_v48 }
 0x1c5   :  { %2564 = vrcp.f32 %v1680_v43  ;;  %v1082_v28 = vadd.f32 %v3432_v20, %v1081_v37  ;;  %v3435_v53 = vadd.f32 %v2209_v38, %v1138_v29  ;;  %v1083_v26 = vpop.f32.mrb[89].mxu0  ;;  %v1418_v31 = vpop.f32.mrb[89].mxu1 }
 0x1c6   :  { %v2547_v52 = vpop.eup %2546  ;;  %2566 = vpow2.f32 %v2091_v60  ;;  %v3437_v58 = vadd.f32 %v1418_v31, %v1130_v33  ;;  %v1084_v11 = vpop.f32.mrb[90].mxu0 }
 0x1c7   :  { %v2549_v23 = vpop.eup %2548  ;;  %1870 = vst.msk [vmem:[%s3567_s3 + $0x120] sm:$0xff] %vm1833_vm1, %v2547_v52  ;;  %2568 = vpow2.f32 %v2103_v17  ;;  %v2210_v0 = vpop.f32.mrb[90].mxu1  ;;  %v1371_v54 = vadd.f32 %v3360_v15, %v1082_v28  ;;  %v1085_v42 = vadd.f32 %v3432_v20, %v1084_v11  ;;  %v2107_v40 = vmul.f32 -1.442695, %v3435_v53 }
 0x1c8   :  { %v2551_v45 = vpop.eup %2550  ;;  %1871 = vst.msk [vmem:[%s3567_s3 + $0x128] sm:$0xff] %vm1833_vm1, %v2549_v23  ;;  %2570 = vpow2.f32 %v2101_v16  ;;  %v1086_v57 = vpop.f32.mrb[91].mxu0  ;;  %v1430_v34 = vadd.f32 %v2210_v0, %v1141_v46  ;;  %v2105_v38 = vmul.f32 -1.442695, %v3437_v58 }
 0x1c9   :  { %v2553_v41 = vpop.eup %2552  ;;  %v1681_v56 = vadd.f32 1.0, %v2551_v45  ;;  %2572 = vpow2.f32 %v2092_v5  ;;  %v1421_v63 = vpop.f32.mrb[91].mxu1  ;;  %v1374_v15 = vadd.f32 %v3374_v10, %v1085_v42  ;;  %v2093_v14 = vmul.f32 -1.442695, %v1371_v54 }
 0x1ca   :  { %v2555_v2 = vpop.eup %2554  ;;  %v1691_v50 = vadd.f32 1.0, %v2553_v41  ;;  %2574 = vpow2.f32 %v2104_v47  ;;  %v1422_v9 = vadd.f32 %v1421_v63, %v1133_v62  ;;  %v2108_v41 = vmul.f32 -1.442695, %v1430_v34 }
 0x1cb   :  { %v2557_v61 = vpop.eup %2556  ;;  %2576 = vrcp.f32 %v1681_v56  ;;  %v1689_v35 = vadd.f32 1.0, %v2555_v2 }
 0x1cc   :  { %v2559_v1 = vpop.eup %2558  ;;  %2578 = vrcp.f32 %v1691_v50  ;;  %v1682_v6 = vadd.f32 1.0, %v2557_v61  ;;  %v1089_v18 = vpop.f32.mrb[92].mxu0 }
 0x1cd   :  { %v2561_v32 = vpop.eup %2560  ;;  %2580 = vrcp.f32 %v1689_v35  ;;  %v1692_v30 = vadd.f32 1.0, %v2559_v1  ;;  %v2213_v10 = vpop.f32.mrb[92].mxu1  ;;  %v1090_v44 = vadd.f32 %v3432_v20, %v1089_v18 }
 0x1ce   :  { %v2563_v13 = vpop.eup %2562  ;;  %2582 = vrcp.f32 %v1682_v6  ;;  %v1690_v24 = vadd.f32 1.0, %v2561_v32  ;;  %v1443_v22 = vadd.f32 %v2213_v10, %v1154_v4  ;;  %v1091_v27 = vpop.f32.mrb[93].mxu0 }
 0x1cf   :  { %v2565_v39 = vpop.eup %2564  ;;  %1872 = vst.msk [vmem:[%s3567_s3 + $0x130] sm:$0xff] %vm1833_vm1, %v2563_v13  ;;  %2584 = vrcp.f32 %v1692_v30  ;;  %v1434_v36 = vpop.f32.mrb[93].mxu1  ;;  %v1379_v55 = vadd.f32 %v3353_v49, %v1090_v44 }
 0x1d0   :  { %v2567_v51 = vpop.eup %2566  ;;  %1873 = vst.msk [vmem:[%s3567_s3 + $0x138] sm:$0xff] %vm1833_vm1, %v2565_v39  ;;  %2586 = vrcp.f32 %v1690_v24  ;;  %v1435_v43 = vadd.f32 %v1434_v36, %v1146_v59  ;;  %v1092_v16 = vpop.f32.mrb[94].mxu0  ;;  %v2111_v54 = vmul.f32 -1.442695, %v1443_v22 }
 0x1d1   :  { %v2569_v17 = vpop.eup %2568  ;;  %v1683_v8 = vadd.f32 1.0, %v2567_v51  ;;  %2588 = vpow2.f32 %v2102_v12  ;;  %v2214_v3 = vpop.f32.mrb[94].mxu1  ;;  %v1093_v33 = vadd.f32 %v3432_v20, %v1092_v16  ;;  %v2094_v20 = vmul.f32 -1.442695, %v1374_v15 }
 0x1d2   :  { %v2571_v60 = vpop.eup %2570  ;;  %v1695_v25 = vadd.f32 1.0, %v2569_v17  ;;  %2590 = vpow2.f32 %v2093_v14  ;;  %v1094_v52 = vpop.f32.mrb[95].mxu0  ;;  %v1446_v45 = vadd.f32 %v2214_v3, %v1157_v19  ;;  %v2095_v11 = vmul.f32 -1.442695, %v1379_v55 }
 0x1d3   :  { %v1437_v29 = vpop.f32.mrb[95].mxu1  ;;  %v2573_v47 = vpop.eup %2572  ;;  %2592 = vrcp.f32 %v1683_v8  ;;  %v1693_v23 = vadd.f32 1.0, %v2571_v60  ;;  %v1382_v49 = vadd.f32 %v3366_v7, %v1093_v33  ;;  %v2106_v7 = vmul.f32 -1.442695, %v1422_v9 }
 0x1d4   :  { %v2575_v5 = vpop.eup %2574  ;;  %2594 = vrcp.f32 %v1695_v25  ;;  %v1684_v37 = vadd.f32 1.0, %v2573_v47  ;;  %v1438_v26 = vadd.f32 %v1437_v29, %v1149_v21  ;;  %v2109_v61 = vmul.f32 -1.442695, %v1435_v43 }
 0x1d5   :  { %v2577_v48 = vpop.eup %2576  ;;  %2596 = vrcp.f32 %v1693_v23  ;;  %v1696_v28 = vadd.f32 1.0, %v2575_v5  ;;  %v2096_v35 = vmul.f32 -1.442695, %v1382_v49  ;;  %v2112_v1 = vmul.f32 -1.442695, %v1446_v45 }
 0x1d6   :  { %v2579_v31 = vpop.eup %2578  ;;  %1874 = vst.msk [vmem:[%s3567_s3 + $0x140] sm:$0xff] %vm1833_vm1, %v2577_v48  ;;  %2598 = vrcp.f32 %v1684_v37  ;;  %v2110_v12 = vmul.f32 -1.442695, %v1438_v26 }
 0x1d7   :  { %v2581_v53 = vpop.eup %2580  ;;  %1884 = vst.msk [vmem:[%s3567_s3 + $0x190] sm:$0xff] %vm1833_vm1, %v2579_v31  ;;  %2600 = vrcp.f32 %v1696_v28 }
 0x1d8   :  { %v2583_v56 = vpop.eup %2582  ;;  %1882 = vst.msk [vmem:[%s3567_s3 + $0x180] sm:$0xff] %vm1833_vm1, %v2581_v53  ;;  %2602 = vpow2.f32 %v2107_v40 }
 0x1d9   :  { %v2585_v58 = vpop.eup %2584  ;;  %1875 = vst.msk [vmem:[%s3567_s3 + $0x148] sm:$0xff] %vm1833_vm1, %v2583_v56  ;;  %2604 = vpow2.f32 %v2105_v38 }
 0x1da   :  { %v2587_v0 = vpop.eup %2586  ;;  %1885 = vst.msk [vmem:[%s3567_s3 + $0x198] sm:$0xff] %vm1833_vm1, %v2585_v58  ;;  %2606 = vpow2.f32 %v2094_v20 }
 0x1db   :  { %v2589_v2 = vpop.eup %2588  ;;  %1883 = vst.msk [vmem:[%s3567_s3 + $0x188] sm:$0xff] %vm1833_vm1, %v2587_v0  ;;  %2608 = vpow2.f32 %v2108_v41 }
 0x1dc   :  { %v2591_v46 = vpop.eup %2590  ;;  %v1694_v50 = vadd.f32 1.0, %v2589_v2  ;;  %2610 = vpow2.f32 %v2106_v7 }
 0x1dd   :  { %v2593_v57 = vpop.eup %2592  ;;  %v1685_v63 = vadd.f32 1.0, %v2591_v46  ;;  %2612 = vpow2.f32 %v2095_v11 }
 0x1de   :  { %v2595_v62 = vpop.eup %2594  ;;  %1876 = vst.msk [vmem:[%s3567_s3 + $0x150] sm:$0xff] %vm1833_vm1, %v2593_v57  ;;  %2614 = vrcp.f32 %v1694_v50 }
 0x1df   :  { %v2597_v42 = vpop.eup %2596  ;;  %1888 = vst.msk [vmem:[%s3567_s3 + $0x1b0] sm:$0xff] %vm1833_vm1, %v2595_v62  ;;  %2616 = vrcp.f32 %v1685_v63 }
 0x1e0   :  { %v2599_v6 = vpop.eup %2598  ;;  %1886 = vst.msk [vmem:[%s3567_s3 + $0x1a0] sm:$0xff] %vm1833_vm1, %v2597_v42  ;;  %2618 = vpow2.f32 %v2111_v54 }
 0x1e1   :  { %v2601_v34 = vpop.eup %2600  ;;  %1877 = vst.msk [vmem:[%s3567_s3 + $0x158] sm:$0xff] %vm1833_vm1, %v2599_v6  ;;  %2620 = vpow2.f32 %v2109_v61 }
 0x1e2   :  { %v2603_v32 = vpop.eup %2602  ;;  %1889 = vst.msk [vmem:[%s3567_s3 + $0x1b8] sm:$0xff] %vm1833_vm1, %v2601_v34  ;;  %2622 = vpow2.f32 %v2096_v35 }
 0x1e3   :  { %v2605_v30 = vpop.eup %2604  ;;  %v1699_v15 = vadd.f32 1.0, %v2603_v32  ;;  %2624 = vpow2.f32 %v2112_v1 }
 0x1e4   :  { %v2607_v9 = vpop.eup %2606  ;;  %v1697_v13 = vadd.f32 1.0, %v2605_v30  ;;  %2626 = vpow2.f32 %v2110_v12 }
 0x1e5   :  { %v2609_v4 = vpop.eup %2608  ;;  %2628 = vrcp.f32 %v1699_v15  ;;  %v1686_v24 = vadd.f32 1.0, %v2607_v9 }
 0x1e6   :  { %v2611_v14 = vpop.eup %2610  ;;  %2630 = vrcp.f32 %v1697_v13  ;;  %v1700_v39 = vadd.f32 1.0, %v2609_v4 }
 0x1e7   :  { %v2613_v59 = vpop.eup %2612  ;;  %2632 = vrcp.f32 %v1686_v24  ;;  %v1698_v18 = vadd.f32 1.0, %v2611_v14 }
 0x1e8   :  { %v2615_v10 = vpop.eup %2614  ;;  %2634 = vrcp.f32 %v1700_v39  ;;  %v1687_v51 = vadd.f32 1.0, %v2613_v59 }
 0x1e9   :  { %v2617_v44 = vpop.eup %2616  ;;  %1887 = vst.msk [vmem:[%s3567_s3 + $0x1a8] sm:$0xff] %vm1833_vm1, %v2615_v10  ;;  %2636 = vrcp.f32 %v1698_v18 }
 0x1ea   :  { %v2619_v22 = vpop.eup %2618  ;;  %1878 = vst.msk [vmem:[%s3567_s3 + $0x160] sm:$0xff] %vm1833_vm1, %v2617_v44  ;;  %2638 = vrcp.f32 %v1687_v51 }
 0x1eb   :  { %v2621_v27 = vpop.eup %2620  ;;  %v1703_v36 = vadd.f32 1.0, %v2619_v22 }
 0x1ec   :  { %v2623_v17 = vpop.eup %2622  ;;  %v1701_v21 = vadd.f32 1.0, %v2621_v27 }
 0x1ed   :  { %v2625_v8 = vpop.eup %2624  ;;  %2640 = vrcp.f32 %v1703_v36  ;;  %v1688_v43 = vadd.f32 1.0, %v2623_v17 }
 0x1ee   :  { %v2627_v16 = vpop.eup %2626  ;;  %2642 = vrcp.f32 %v1701_v21  ;;  %v1704_v3 = vadd.f32 1.0, %v2625_v8 }
 0x1ef   :  { %v2629_v60 = vpop.eup %2628  ;;  %2644 = vrcp.f32 %v1688_v43  ;;  %v1702_v19 = vadd.f32 1.0, %v2627_v16 }
 0x1f0   :  { %v2631_v25 = vpop.eup %2630  ;;  %1892 = vst.msk [vmem:[%s3567_s3 + $0x1d0] sm:$0xff] %vm1833_vm1, %v2629_v60  ;;  %2646 = vrcp.f32 %v1704_v3 }
 0x1f1   :  { %v2633_v55 = vpop.eup %2632  ;;  %1890 = vst.msk [vmem:[%s3567_s3 + $0x1c0] sm:$0xff] %vm1833_vm1, %v2631_v25  ;;  %2648 = vrcp.f32 %v1702_v19 }
 0x1f2   :  { %v2635_v52 = vpop.eup %2634  ;;  %1879 = vst.msk [vmem:[%s3567_s3 + $0x168] sm:$0xff] %vm1833_vm1, %v2633_v55 }
 0x1f3   :  { %v2637_v29 = vpop.eup %2636  ;;  %1893 = vst.msk [vmem:[%s3567_s3 + $0x1d8] sm:$0xff] %vm1833_vm1, %v2635_v52 }
 0x1f4   :  { %v2639_v47 = vpop.eup %2638  ;;  %1891 = vst.msk [vmem:[%s3567_s3 + $0x1c8] sm:$0xff] %vm1833_vm1, %v2637_v29 }
 0x1f5   :  { %1880 = vst.msk [vmem:[%s3567_s3 + $0x170] sm:$0xff] %vm1833_vm1, %v2639_v47 }
 0x1f7   :  { %v2641_v23 = vpop.eup %2640 }
 0x1f8   :  { %v2643_v40 = vpop.eup %2642  ;;  %1896 = vst.msk [vmem:[%s3567_s3 + $0x1f0] sm:$0xff] %vm1833_vm1, %v2641_v23 }
 0x1f9   :  { %v2645_v33 = vpop.eup %2644  ;;  %1894 = vst.msk [vmem:[%s3567_s3 + $0x1e0] sm:$0xff] %vm1833_vm1, %v2643_v40 }
 0x1fa   :  { %v2647_v5 = vpop.eup %2646  ;;  %1881 = vst.msk [vmem:[%s3567_s3 + $0x178] sm:$0xff] %vm1833_vm1, %v2645_v33 }
 0x1fb   :  { %v2649_v37 = vpop.eup %2648  ;;  %1897 = vst.msk [vmem:[%s3567_s3 + $0x1f8] sm:$0xff] %vm1833_vm1, %v2647_v5 }
 0x1fc   :  { %1895 = vst.msk [vmem:[%s3567_s3 + $0x1e8] sm:$0xff] %vm1833_vm1, %v2649_v37 }

</bundles_post_ra>
